<compile_context>
chip_gen: v6e
topology: v6e:2x2x1
jax: 0.10.0
libtpu: 0.0.40
codegen_flags: <defaults>
</compile_context>

<pallas_src>
import numpy as np

import jax
import jax.numpy as jnp
from jax.experimental import pallas as pl
from jax.experimental.pallas import tpu as pltpu


def _round_ch(v):
    # Round channel counts up to a multiple of 16 (bf16 sublane packing / MXU).
    return max(16, ((v + 15) // 16) * 16)


def _build_masks(H, W, dilations):
    """0/1 masks, one per (dilation, kh, kw) tap with kw != 0 (horizontal shifts
    wrap across image rows in the flat layout).  kw == 0 taps never need a mask:
    their out-of-image rows read from the zero halo."""
    hh = np.arange(H)[:, None]
    ww = np.arange(W)[None, :]
    rows, idx = [], {}
    for d in dilations:
        for kh in (-1, 0, 1):
            for kw in (-1, 1):
                valid = ((hh + kh * d >= 0) & (hh + kh * d < H) &
                         (ww + kw * d >= 0) & (ww + kw * d < W))
                idx[(d, kh, kw)] = len(rows)
                rows.append(valid.reshape(-1).astype(np.float32))
    return np.stack(rows, axis=0), idx


def _pack_layer(branch_ws, branch_bs, cin_p, cout_p):
    """Pack per-branch HWIO 3x3 weights into one bf16 stack of per-tap matrices
    (n_taps, cout_p, cin_p) with tap order (branch, kh, kw) and zero-padded
    channels; fold the per-branch biases into a single (cout_p, 1) f32 vector."""
    taps = []
    for wb in branch_ws:
        _, _, cin, cout = wb.shape
        wp = jnp.zeros((3, 3, cin_p, cout_p), jnp.float32)
        wp = wp.at[:, :, :cin, :cout].set(wb.astype(jnp.float32))
        wp = jnp.transpose(wp.reshape(9, cin_p, cout_p), (0, 2, 1))  # (9, co, ci)
        taps.append(wp)
    w = jnp.concatenate(taps, axis=0).astype(jnp.bfloat16)   # (nb*9, cout_p, cin_p)
    b = jnp.zeros((cout_p,), jnp.float32)
    for bb in branch_bs:
        b = b.at[:bb.shape[0]].add(bb.astype(jnp.float32))
    return w, b.reshape(cout_p, 1)


def _const_spec(arr):
    zeros = (0,) * arr.ndim
    return pl.BlockSpec(arr.shape, lambda n, _z=zeros: _z)


def make_fused_kernel(H, W, padf, layer_cfgs, mask_rows, cin_list,
                      c_out_final, B):
    HW = H * W

    def kernel(x_ref, masks_ref, *rest):
        wb_refs = rest[:-2]
        o_ref = rest[-2]
        pad_ref = rest[-1]     # (c_max, padf + HW + padf) zero-halo buffer (f32)

        c_max = pad_ref.shape[0]
        # Zero only the halo slabs: the centre HW columns are always fully
        # rewritten (rows 0:cin) before being read.  Redone every grid step so
        # each TensorCore's private scratch instance is initialised.
        pad_ref[:, 0:padf] = jnp.zeros((c_max, padf), jnp.float32)
        pad_ref[:, padf + HW:padf + HW + padf] = jnp.zeros((c_max, padf),
                                                           jnp.float32)

        def conv_layer(a, w_ref, b_ref, cin, dils, lrelu):
            # a: (cin, HW) f32 activation of the previous layer (lane-dense).
            pad_ref[0:cin, padf:padf + HW] = a
            a_bf = a.astype(jnp.bfloat16)          # centre tap, reused per dil.
            y = None
            k = 0
            for d in dils:
                for kh in (-1, 0, 1):
                    for kw in (-1, 0, 1):
                        if kh == 0 and kw == 0:
                            tap = a_bf
                        else:
                            s = (kh * W + kw) * d
                            t = pad_ref[0:cin, padf + s:padf + s + HW]
                            if kw != 0:            # row-wrap taps need masking
                                r = mask_rows[(d, kh, kw)]
                                t = t * masks_ref[r:r + 1, :]
                            tap = t.astype(jnp.bfloat16)
                        # One small bf16 MXU matmul per tap, f32 accumulation in
                        # registers: no im2col patch-matrix VMEM round-trip.
                        c = jnp.dot(w_ref[k], tap,
                                    preferred_element_type=jnp.float32)
                        y = c if y is None else y + c
                        k += 1
            y = y + b_ref[...]                     # folded per-branch bias
            if lrelu:
                y = jnp.maximum(y, 0.2 * y)        # LeakyReLU(0.2): mul + max
            return y

        for b in range(B):
            a = x_ref[b]                           # (c0, HW) f32, lane-dense
            for li, (dils, lrelu) in enumerate(layer_cfgs):
                a = conv_layer(a, wb_refs[2 * li], wb_refs[2 * li + 1],
                               cin_list[li], dils, lrelu)
            o_ref[b, :, :] = a[0:c_out_final, :]   # lane-dense (1, HW) store

    return kernel


@jax.jit
def feat_discriminator(x, params):
    """x: (N, C, H, W) float32 (NCHW, like the PyTorch module). -> (N, 1, H, W)."""
    N, cin, H, W = x.shape
    HW = H * W

    layers = [
        (params["l1_w"], params["l1_b"], (6, 12), True),    # ASPP(d6)+ASPP(d12)+LReLU
        (params["l2_w"], params["l2_b"], (6, 12), True),    # ASPP(d6)+ASPP(d12)+LReLU
        ([params["l3_w"]], [params["l3_b"]], (1,), True),   # 3x3 pad=1 + LReLU
        ([params["l4_w"]], [params["l4_b"]], (1,), False),  # 3x3 pad=1
    ]

    packed, layer_cfgs, cin_list = [], [], []
    c_prev = _round_ch(cin)
    c0 = c_prev
    for ws, bs, dils, lrelu in layers:
        cin_list.append(c_prev)
        cout_p = _round_ch(ws[0].shape[-1])
        w_stack, b_vec = _pack_layer(ws, bs, c_prev, cout_p)
        packed.extend([w_stack, b_vec])
        layer_cfgs.append((dils, lrelu))
        c_prev = cout_p
    c_out_final = layers[-1][0][0].shape[-1]                 # = 1

    all_dils = sorted({d for _, _, dils, _ in layers for d in dils})
    masks_np, mask_rows = _build_masks(H, W, all_dils)
    masks = jnp.asarray(masks_np)

    # Flat halo width: worst-case |kh*W+kw|*d, rounded up to a lane multiple so
    # the centre slab (write + centre-column reads) stays 128-lane aligned.
    padf = max(all_dils) * (W + 1)
    padf = ((padf + 127) // 128) * 128
    c_max = max(cin_list)

    # Samples per grid step: 1 keeps >=2 grid steps at N=2 (megacore); raise it
    # to amortise the ~0.35us/step overhead when N is large at tiny resolutions.
    B = 1
    assert N % B == 0

    # Channel-pad + flatten input to (N, c0, H*W): H*W is the lane-dense last dim.
    x_p = jnp.zeros((N, c0, HW), jnp.float32)
    x_p = x_p.at[:, :cin, :].set(x.reshape(N, cin, HW).astype(jnp.float32))

    kernel = make_fused_kernel(H, W, padf, tuple(layer_cfgs), mask_rows,
                               tuple(cin_list), c_out_final, B)

    in_specs = [pl.BlockSpec((B, c0, HW), lambda n: (n, 0, 0)),
                _const_spec(masks)]
    in_specs += [_const_spec(arr) for arr in packed]

    out = pl.pallas_call(
        kernel,
        out_shape=jax.ShapeDtypeStruct((N, c_out_final, HW), jnp.float32),
        grid=(N // B,),
        in_specs=in_specs,
        out_specs=pl.BlockSpec((B, c_out_final, HW), lambda n: (n, 0, 0)),
        scratch_shapes=[
            pltpu.VMEM((c_max, HW + 2 * padf), jnp.float32),  # zero-halo buffer
        ],
        compiler_params=pltpu.CompilerParams(
            dimension_semantics=("parallel",),
            vmem_limit_bytes=32 * 1024 * 1024),
    )(x_p, masks, *packed)

    return out.reshape(N, c_out_final, H, W)


# ----------------------- synthetic params + plain-JAX reference -------------
def init_params(key, inplanes, ndf):
    ks = list(jax.random.split(key, 12))

    def w_init(k, cin, cout, std=0.01):
        return jax.random.normal(k, (3, 3, cin, cout), jnp.float32) * std

    def b_init(k, cout):
        return jax.random.normal(k, (cout,), jnp.float32) * 0.01

    p = {}
    # layer1: ASPP(inplanes -> ndf); only dilations 6 and 12 are ever used.
    p["l1_w"] = [w_init(ks[0], inplanes, ndf), w_init(ks[1], inplanes, ndf)]
    p["l1_b"] = [b_init(ks[2], ndf), b_init(ks[3], ndf)]
    # layer2: ASPP(ndf -> ndf//2)
    p["l2_w"] = [w_init(ks[4], ndf, ndf // 2), w_init(ks[5], ndf, ndf // 2)]
    p["l2_b"] = [b_init(ks[6], ndf // 2), b_init(ks[7], ndf // 2)]
    # layer3: Conv2d(ndf//2 -> ndf//4, k=3, pad=1)
    p["l3_w"] = w_init(ks[8], ndf // 2, ndf // 4, std=0.05)
    p["l3_b"] = b_init(ks[9], ndf // 4)
    # layer4: Conv2d(ndf//4 -> 1, k=3, pad=1)
    p["l4_w"] = w_init(ks[10], ndf // 4, 1, std=0.05)
    p["l4_b"] = b_init(ks[11], 1)
    return p


def _conv_ref(x, w, b, d):
    y = jax.lax.conv_general_dilated(
        x, w, window_strides=(1, 1), padding=[(d, d), (d, d)],
        rhs_dilation=(d, d), dimension_numbers=("NCHW", "HWIO", "NCHW"))
    return y + b[None, :, None, None]


def _forward_ref(x, p):
    lr = lambda v: jnp.where(v >= 0, v, 0.2 * v)
    x = lr(_conv_ref(x, p["l1_w"][0], p["l1_b"][0], 6)
           + _conv_ref(x, p["l1_w"][1], p["l1_b"][1], 12))
    x = lr(_conv_ref(x, p["l2_w"][0], p["l2_b"][0], 6)
           + _conv_ref(x, p["l2_w"][1], p["l2_b"][1], 12))
    x = lr(_conv_ref(x, p["l3_w"], p["l3_b"], 1))
    x = _conv_ref(x, p["l4_w"], p["l4_b"], 1)
    return x


if __name__ == "__main__":
    # Small shapes consistent with the module: inplanes=16, ndf=16, N=2, 16x16.
    N, H, W = 2, 16, 16
    inplanes, ndf = 16, 16

    key = jax.random.PRNGKey(0)
    kx, kp = jax.random.split(key)
    x = jax.random.normal(kx, (N, inplanes, H, W), jnp.float32)   # NCHW
    params = init_params(kp, inplanes, ndf)

    out = feat_discriminator(x, params)
    out = jax.block_until_ready(out)
    assert out.shape == (N, 1, H, W), out.shape

    ref = _forward_ref(x, params)
    err = float(jnp.max(jnp.abs(out - ref)))
    scale = float(jnp.max(jnp.abs(ref)))
    # bf16 weights/taps with f32 accumulation -> expect <~1% relative error.
    assert err <= 3e-2 * scale + 2e-4, (err, scale)

    print("KERNEL_OK")
</pallas_src>

<mosaic_0001>
module attributes {stable_mosaic.version = 11 : i64} {
  func.func @kernel(%arg0: i32, %arg1: memref<1x16x256xf32, #tpu.memory_space<vmem>>, %arg2: memref<18x256xf32, #tpu.memory_space<vmem>>, %arg3: memref<18x16x16xbf16, #tpu.memory_space<vmem>>, %arg4: memref<16x1xf32, #tpu.memory_space<vmem>>, %arg5: memref<18x16x16xbf16, #tpu.memory_space<vmem>>, %arg6: memref<16x1xf32, #tpu.memory_space<vmem>>, %arg7: memref<9x16x16xbf16, #tpu.memory_space<vmem>>, %arg8: memref<16x1xf32, #tpu.memory_space<vmem>>, %arg9: memref<9x16x16xbf16, #tpu.memory_space<vmem>>, %arg10: memref<16x1xf32, #tpu.memory_space<vmem>>, %arg11: memref<1x1x256xf32, #tpu.memory_space<vmem>>, %arg12: memref<16x768xf32, #tpu.memory_space<vmem>>) attributes {dimension_semantics = [#tpu.dimension_semantics<parallel>], iteration_bounds = array<i64: 2>, scalar_prefetch = 0 : i64, scratch_operands = 1 : i64, tpu.core_type = #tpu.core_type<tc>, window_params = [{transform_indices = @transform_0, window_bounds = array<i64: 1, 16, 256>}, {pipeline_mode = #tpu.pipeline_mode<synchronous>, transform_indices = @transform_1, window_bounds = array<i64: 18, 256>}, {pipeline_mode = #tpu.pipeline_mode<synchronous>, transform_indices = @transform_2, window_bounds = array<i64: 18, 16, 16>}, {pipeline_mode = #tpu.pipeline_mode<synchronous>, transform_indices = @transform_3, window_bounds = array<i64: 16, 1>}, {pipeline_mode = #tpu.pipeline_mode<synchronous>, transform_indices = @transform_4, window_bounds = array<i64: 18, 16, 16>}, {pipeline_mode = #tpu.pipeline_mode<synchronous>, transform_indices = @transform_5, window_bounds = array<i64: 16, 1>}, {pipeline_mode = #tpu.pipeline_mode<synchronous>, transform_indices = @transform_6, window_bounds = array<i64: 9, 16, 16>}, {pipeline_mode = #tpu.pipeline_mode<synchronous>, transform_indices = @transform_7, window_bounds = array<i64: 16, 1>}, {pipeline_mode = #tpu.pipeline_mode<synchronous>, transform_indices = @transform_8, window_bounds = array<i64: 9, 16, 16>}, {pipeline_mode = #tpu.pipeline_mode<synchronous>, transform_indices = @transform_9, window_bounds = array<i64: 16, 1>}, {transform_indices = @transform_10, window_bounds = array<i64: 1, 1, 256>}]} {
    %cst = arith.constant 0.000000e+00 : f32
    %0 = vector.broadcast %cst : f32 to vector<16x256xf32>
    %c0 = arith.constant 0 : index
    %c0_0 = arith.constant 0 : index
    %1 = vector.load %arg12[%c0, %c0_0] : memref<16x768xf32, #tpu.memory_space<vmem>>, vector<16x256xf32>
    tpu.vector_store %arg12[%c0, %c0_0], %0 {strides = array<i32>} : memref<16x768xf32, #tpu.memory_space<vmem>>, vector<16x256xf32>,
    %cst_1 = arith.constant 0.000000e+00 : f32
    %2 = vector.broadcast %cst_1 : f32 to vector<16x256xf32>
    %c0_2 = arith.constant 0 : index
    %c512 = arith.constant 512 : index
    %3 = vector.load %arg12[%c0_2, %c512] : memref<16x768xf32, #tpu.memory_space<vmem>>, vector<16x256xf32>
    tpu.vector_store %arg12[%c0_2, %c512], %2 {strides = array<i32>} : memref<16x768xf32, #tpu.memory_space<vmem>>, vector<16x256xf32>,
    %c0_3 = arith.constant 0 : index
    %c0_4 = arith.constant 0 : index
    %c0_5 = arith.constant 0 : index
    %4 = vector.load %arg1[%c0_3, %c0_4, %c0_5] : memref<1x16x256xf32, #tpu.memory_space<vmem>>, vector<1x16x256xf32>
    %5 = vector.shape_cast %4 : vector<1x16x256xf32> to vector<16x256xf32>
    %c0_6 = arith.constant 0 : index
    %c256 = arith.constant 256 : index
    %6 = vector.load %arg12[%c0_6, %c256] : memref<16x768xf32, #tpu.memory_space<vmem>>, vector<16x256xf32>
    tpu.vector_store %arg12[%c0_6, %c256], %5 {strides = array<i32>} : memref<16x768xf32, #tpu.memory_space<vmem>>, vector<16x256xf32>,
    %7 = arith.truncf %5 : vector<16x256xf32> to vector<16x256xbf16>
    %c0_7 = arith.constant 0 : index
    %c154 = arith.constant 154 : index
    %8 = vector.load %arg12[%c0_7, %c154] : memref<16x768xf32, #tpu.memory_space<vmem>>, vector<16x256xf32>
    %c6 = arith.constant 6 : index
    %c0_8 = arith.constant 0 : index
    %9 = vector.load %arg2[%c6, %c0_8] : memref<18x256xf32, #tpu.memory_space<vmem>>, vector<1x256xf32>
    %10 = vector.broadcast %9 : vector<1x256xf32> to vector<16x256xf32>
    %11 = arith.mulf %8, %10 : vector<16x256xf32>
    %12 = arith.truncf %11 : vector<16x256xf32> to vector<16x256xbf16>
    %c0_9 = arith.constant 0 : index
    %c0_10 = arith.constant 0 : index
    %c0_11 = arith.constant 0 : index
    %13 = vector.load %arg3[%c0_9, %c0_10, %c0_11] : memref<18x16x16xbf16, #tpu.memory_space<vmem>>, vector<1x16x16xbf16>
    %14 = vector.shape_cast %13 : vector<1x16x16xbf16> to vector<16x16xbf16>
    %cst_12 = arith.constant dense<0.000000e+00> : vector<16x256xf32>
    %15 = tpu.matmul %14, %12, %cst_12 {dimension_numbers = #tpu.dot_dimension_numbers<[1], [0], [0], [1], [0, 0, 1, 1], [], []>} : vector<16x16xbf16>, vector<16x256xbf16>, vector<16x256xf32> -> vector<16x256xf32>
    %c0_13 = arith.constant 0 : index
    %c160 = arith.constant 160 : index
    %16 = vector.load %arg12[%c0_13, %c160] : memref<16x768xf32, #tpu.memory_space<vmem>>, vector<16x256xf32>
    %17 = arith.truncf %16 : vector<16x256xf32> to vector<16x256xbf16>
    %c1 = arith.constant 1 : index
    %c0_14 = arith.constant 0 : index
    %c0_15 = arith.constant 0 : index
    %18 = vector.load %arg3[%c1, %c0_14, %c0_15] : memref<18x16x16xbf16, #tpu.memory_space<vmem>>, vector<1x16x16xbf16>
    %19 = vector.shape_cast %18 : vector<1x16x16xbf16> to vector<16x16xbf16>
    %cst_16 = arith.constant dense<0.000000e+00> : vector<16x256xf32>
    %20 = tpu.matmul %19, %17, %cst_16 {dimension_numbers = #tpu.dot_dimension_numbers<[1], [0], [0], [1], [0, 0, 1, 1], [], []>} : vector<16x16xbf16>, vector<16x256xbf16>, vector<16x256xf32> -> vector<16x256xf32>
    %21 = arith.addf %15, %20 : vector<16x256xf32>
    %c0_17 = arith.constant 0 : index
    %c166 = arith.constant 166 : index
    %22 = vector.load %arg12[%c0_17, %c166] : memref<16x768xf32, #tpu.memory_space<vmem>>, vector<16x256xf32>
    %c7 = arith.constant 7 : index
    %c0_18 = arith.constant 0 : index
    %23 = vector.load %arg2[%c7, %c0_18] : memref<18x256xf32, #tpu.memory_space<vmem>>, vector<1x256xf32>
    %24 = vector.broadcast %23 : vector<1x256xf32> to vector<16x256xf32>
    %25 = arith.mulf %22, %24 : vector<16x256xf32>
    %26 = arith.truncf %25 : vector<16x256xf32> to vector<16x256xbf16>
    %c2 = arith.constant 2 : index
    %c0_19 = arith.constant 0 : index
    %c0_20 = arith.constant 0 : index
    %27 = vector.load %arg3[%c2, %c0_19, %c0_20] : memref<18x16x16xbf16, #tpu.memory_space<vmem>>, vector<1x16x16xbf16>
    %28 = vector.shape_cast %27 : vector<1x16x16xbf16> to vector<16x16xbf16>
    %cst_21 = arith.constant dense<0.000000e+00> : vector<16x256xf32>
    %29 = tpu.matmul %28, %26, %cst_21 {dimension_numbers = #tpu.dot_dimension_numbers<[1], [0], [0], [1], [0, 0, 1, 1], [], []>} : vector<16x16xbf16>, vector<16x256xbf16>, vector<16x256xf32> -> vector<16x256xf32>
    %30 = arith.addf %21, %29 : vector<16x256xf32>
    %c0_22 = arith.constant 0 : index
    %c250 = arith.constant 250 : index
    %31 = vector.load %arg12[%c0_22, %c250] : memref<16x768xf32, #tpu.memory_space<vmem>>, vector<16x256xf32>
    %c8 = arith.constant 8 : index
    %c0_23 = arith.constant 0 : index
    %32 = vector.load %arg2[%c8, %c0_23] : memref<18x256xf32, #tpu.memory_space<vmem>>, vector<1x256xf32>
    %33 = vector.broadcast %32 : vector<1x256xf32> to vector<16x256xf32>
    %34 = arith.mulf %31, %33 : vector<16x256xf32>
    %35 = arith.truncf %34 : vector<16x256xf32> to vector<16x256xbf16>
    %c3 = arith.constant 3 : index
    %c0_24 = arith.constant 0 : index
    %c0_25 = arith.constant 0 : index
    %36 = vector.load %arg3[%c3, %c0_24, %c0_25] : memref<18x16x16xbf16, #tpu.memory_space<vmem>>, vector<1x16x16xbf16>
    %37 = vector.shape_cast %36 : vector<1x16x16xbf16> to vector<16x16xbf16>
    %cst_26 = arith.constant dense<0.000000e+00> : vector<16x256xf32>
    %38 = tpu.matmul %37, %35, %cst_26 {dimension_numbers = #tpu.dot_dimension_numbers<[1], [0], [0], [1], [0, 0, 1, 1], [], []>} : vector<16x16xbf16>, vector<16x256xbf16>, vector<16x256xf32> -> vector<16x256xf32>
    %39 = arith.addf %30, %38 : vector<16x256xf32>
    %c4 = arith.constant 4 : index
    %c0_27 = arith.constant 0 : index
    %c0_28 = arith.constant 0 : index
    %40 = vector.load %arg3[%c4, %c0_27, %c0_28] : memref<18x16x16xbf16, #tpu.memory_space<vmem>>, vector<1x16x16xbf16>
    %41 = vector.shape_cast %40 : vector<1x16x16xbf16> to vector<16x16xbf16>
    %cst_29 = arith.constant dense<0.000000e+00> : vector<16x256xf32>
    %42 = tpu.matmul %41, %7, %cst_29 {dimension_numbers = #tpu.dot_dimension_numbers<[1], [0], [0], [1], [0, 0, 1, 1], [], []>} : vector<16x16xbf16>, vector<16x256xbf16>, vector<16x256xf32> -> vector<16x256xf32>
    %43 = arith.addf %39, %42 : vector<16x256xf32>
    %c0_30 = arith.constant 0 : index
    %c262 = arith.constant 262 : index
    %44 = vector.load %arg12[%c0_30, %c262] : memref<16x768xf32, #tpu.memory_space<vmem>>, vector<16x256xf32>
    %c9 = arith.constant 9 : index
    %c0_31 = arith.constant 0 : index
    %45 = vector.load %arg2[%c9, %c0_31] : memref<18x256xf32, #tpu.memory_space<vmem>>, vector<1x256xf32>
    %46 = vector.broadcast %45 : vector<1x256xf32> to vector<16x256xf32>
    %47 = arith.mulf %44, %46 : vector<16x256xf32>
    %48 = arith.truncf %47 : vector<16x256xf32> to vector<16x256xbf16>
    %c5 = arith.constant 5 : index
    %c0_32 = arith.constant 0 : index
    %c0_33 = arith.constant 0 : index
    %49 = vector.load %arg3[%c5, %c0_32, %c0_33] : memref<18x16x16xbf16, #tpu.memory_space<vmem>>, vector<1x16x16xbf16>
    %50 = vector.shape_cast %49 : vector<1x16x16xbf16> to vector<16x16xbf16>
    %cst_34 = arith.constant dense<0.000000e+00> : vector<16x256xf32>
    %51 = tpu.matmul %50, %48, %cst_34 {dimension_numbers = #tpu.dot_dimension_numbers<[1], [0], [0], [1], [0, 0, 1, 1], [], []>} : vector<16x16xbf16>, vector<16x256xbf16>, vector<16x256xf32> -> vector<16x256xf32>
    %52 = arith.addf %43, %51 : vector<16x256xf32>
    %c0_35 = arith.constant 0 : index
    %c346 = arith.constant 346 : index
    %53 = vector.load %arg12[%c0_35, %c346] : memref<16x768xf32, #tpu.memory_space<vmem>>, vector<16x256xf32>
    %c10 = arith.constant 10 : index
    %c0_36 = arith.constant 0 : index
    %54 = vector.load %arg2[%c10, %c0_36] : memref<18x256xf32, #tpu.memory_space<vmem>>, vector<1x256xf32>
    %55 = vector.broadcast %54 : vector<1x256xf32> to vector<16x256xf32>
    %56 = arith.mulf %53, %55 : vector<16x256xf32>
    %57 = arith.truncf %56 : vector<16x256xf32> to vector<16x256xbf16>
    %c6_37 = arith.constant 6 : index
    %c0_38 = arith.constant 0 : index
    %c0_39 = arith.constant 0 : index
    %58 = vector.load %arg3[%c6_37, %c0_38, %c0_39] : memref<18x16x16xbf16, #tpu.memory_space<vmem>>, vector<1x16x16xbf16>
    %59 = vector.shape_cast %58 : vector<1x16x16xbf16> to vector<16x16xbf16>
    %cst_40 = arith.constant dense<0.000000e+00> : vector<16x256xf32>
    %60 = tpu.matmul %59, %57, %cst_40 {dimension_numbers = #tpu.dot_dimension_numbers<[1], [0], [0], [1], [0, 0, 1, 1], [], []>} : vector<16x16xbf16>, vector<16x256xbf16>, vector<16x256xf32> -> vector<16x256xf32>
    %61 = arith.addf %52, %60 : vector<16x256xf32>
    %c0_41 = arith.constant 0 : index
    %c352 = arith.constant 352 : index
    %62 = vector.load %arg12[%c0_41, %c352] : memref<16x768xf32, #tpu.memory_space<vmem>>, vector<16x256xf32>
    %63 = arith.truncf %62 : vector<16x256xf32> to vector<16x256xbf16>
    %c7_42 = arith.constant 7 : index
    %c0_43 = arith.constant 0 : index
    %c0_44 = arith.constant 0 : index
    %64 = vector.load %arg3[%c7_42, %c0_43, %c0_44] : memref<18x16x16xbf16, #tpu.memory_space<vmem>>, vector<1x16x16xbf16>
    %65 = vector.shape_cast %64 : vector<1x16x16xbf16> to vector<16x16xbf16>
    %cst_45 = arith.constant dense<0.000000e+00> : vector<16x256xf32>
    %66 = tpu.matmul %65, %63, %cst_45 {dimension_numbers = #tpu.dot_dimension_numbers<[1], [0], [0], [1], [0, 0, 1, 1], [], []>} : vector<16x16xbf16>, vector<16x256xbf16>, vector<16x256xf32> -> vector<16x256xf32>
    %67 = arith.addf %61, %66 : vector<16x256xf32>
    %c0_46 = arith.constant 0 : index
    %c358 = arith.constant 358 : index
    %68 = vector.load %arg12[%c0_46, %c358] : memref<16x768xf32, #tpu.memory_space<vmem>>, vector<16x256xf32>
    %c11 = arith.constant 11 : index
    %c0_47 = arith.constant 0 : index
    %69 = vector.load %arg2[%c11, %c0_47] : memref<18x256xf32, #tpu.memory_space<vmem>>, vector<1x256xf32>
    %70 = vector.broadcast %69 : vector<1x256xf32> to vector<16x256xf32>
    %71 = arith.mulf %68, %70 : vector<16x256xf32>
    %72 = arith.truncf %71 : vector<16x256xf32> to vector<16x256xbf16>
    %c8_48 = arith.constant 8 : index
    %c0_49 = arith.constant 0 : index
    %c0_50 = arith.constant 0 : index
    %73 = vector.load %arg3[%c8_48, %c0_49, %c0_50] : memref<18x16x16xbf16, #tpu.memory_space<vmem>>, vector<1x16x16xbf16>
    %74 = vector.shape_cast %73 : vector<1x16x16xbf16> to vector<16x16xbf16>
    %cst_51 = arith.constant dense<0.000000e+00> : vector<16x256xf32>
    %75 = tpu.matmul %74, %72, %cst_51 {dimension_numbers = #tpu.dot_dimension_numbers<[1], [0], [0], [1], [0, 0, 1, 1], [], []>} : vector<16x16xbf16>, vector<16x256xbf16>, vector<16x256xf32> -> vector<16x256xf32>
    %76 = arith.addf %67, %75 : vector<16x256xf32>
    %c0_52 = arith.constant 0 : index
    %c52 = arith.constant 52 : index
    %77 = vector.load %arg12[%c0_52, %c52] : memref<16x768xf32, #tpu.memory_space<vmem>>, vector<16x256xf32>
    %c12 = arith.constant 12 : index
    %c0_53 = arith.constant 0 : index
    %78 = vector.load %arg2[%c12, %c0_53] : memref<18x256xf32, #tpu.memory_space<vmem>>, vector<1x256xf32>
    %79 = vector.broadcast %78 : vector<1x256xf32> to vector<16x256xf32>
    %80 = arith.mulf %77, %79 : vector<16x256xf32>
    %81 = arith.truncf %80 : vector<16x256xf32> to vector<16x256xbf16>
    %c9_54 = arith.constant 9 : index
    %c0_55 = arith.constant 0 : index
    %c0_56 = arith.constant 0 : index
    %82 = vector.load %arg3[%c9_54, %c0_55, %c0_56] : memref<18x16x16xbf16, #tpu.memory_space<vmem>>, vector<1x16x16xbf16>
    %83 = vector.shape_cast %82 : vector<1x16x16xbf16> to vector<16x16xbf16>
    %cst_57 = arith.constant dense<0.000000e+00> : vector<16x256xf32>
    %84 = tpu.matmul %83, %81, %cst_57 {dimension_numbers = #tpu.dot_dimension_numbers<[1], [0], [0], [1], [0, 0, 1, 1], [], []>} : vector<16x16xbf16>, vector<16x256xbf16>, vector<16x256xf32> -> vector<16x256xf32>
    %85 = arith.addf %76, %84 : vector<16x256xf32>
    %c0_58 = arith.constant 0 : index
    %c64 = arith.constant 64 : index
    %86 = vector.load %arg12[%c0_58, %c64] : memref<16x768xf32, #tpu.memory_space<vmem>>, vector<16x256xf32>
    %87 = arith.truncf %86 : vector<16x256xf32> to vector<16x256xbf16>
    %c10_59 = arith.constant 10 : index
    %c0_60 = arith.constant 0 : index
    %c0_61 = arith.constant 0 : index
    %88 = vector.load %arg3[%c10_59, %c0_60, %c0_61] : memref<18x16x16xbf16, #tpu.memory_space<vmem>>, vector<1x16x16xbf16>
    %89 = vector.shape_cast %88 : vector<1x16x16xbf16> to vector<16x16xbf16>
    %cst_62 = arith.constant dense<0.000000e+00> : vector<16x256xf32>
    %90 = tpu.matmul %89, %87, %cst_62 {dimension_numbers = #tpu.dot_dimension_numbers<[1], [0], [0], [1], [0, 0, 1, 1], [], []>} : vector<16x16xbf16>, vector<16x256xbf16>, vector<16x256xf32> -> vector<16x256xf32>
    %91 = arith.addf %85, %90 : vector<16x256xf32>
    %c0_63 = arith.constant 0 : index
    %c76 = arith.constant 76 : index
    %92 = vector.load %arg12[%c0_63, %c76] : memref<16x768xf32, #tpu.memory_space<vmem>>, vector<16x256xf32>
    %c13 = arith.constant 13 : index
    %c0_64 = arith.constant 0 : index
    %93 = vector.load %arg2[%c13, %c0_64] : memref<18x256xf32, #tpu.memory_space<vmem>>, vector<1x256xf32>
    %94 = vector.broadcast %93 : vector<1x256xf32> to vector<16x256xf32>
    %95 = arith.mulf %92, %94 : vector<16x256xf32>
    %96 = arith.truncf %95 : vector<16x256xf32> to vector<16x256xbf16>
    %c11_65 = arith.constant 11 : index
    %c0_66 = arith.constant 0 : index
    %c0_67 = arith.constant 0 : index
    %97 = vector.load %arg3[%c11_65, %c0_66, %c0_67] : memref<18x16x16xbf16, #tpu.memory_space<vmem>>, vector<1x16x16xbf16>
    %98 = vector.shape_cast %97 : vector<1x16x16xbf16> to vector<16x16xbf16>
    %cst_68 = arith.constant dense<0.000000e+00> : vector<16x256xf32>
    %99 = tpu.matmul %98, %96, %cst_68 {dimension_numbers = #tpu.dot_dimension_numbers<[1], [0], [0], [1], [0, 0, 1, 1], [], []>} : vector<16x16xbf16>, vector<16x256xbf16>, vector<16x256xf32> -> vector<16x256xf32>
    %100 = arith.addf %91, %99 : vector<16x256xf32>
    %c0_69 = arith.constant 0 : index
    %c244 = arith.constant 244 : index
    %101 = vector.load %arg12[%c0_69, %c244] : memref<16x768xf32, #tpu.memory_space<vmem>>, vector<16x256xf32>
    %c14 = arith.constant 14 : index
    %c0_70 = arith.constant 0 : index
    %102 = vector.load %arg2[%c14, %c0_70] : memref<18x256xf32, #tpu.memory_space<vmem>>, vector<1x256xf32>
    %103 = vector.broadcast %102 : vector<1x256xf32> to vector<16x256xf32>
    %104 = arith.mulf %101, %103 : vector<16x256xf32>
    %105 = arith.truncf %104 : vector<16x256xf32> to vector<16x256xbf16>
    %c12_71 = arith.constant 12 : index
    %c0_72 = arith.constant 0 : index
    %c0_73 = arith.constant 0 : index
    %106 = vector.load %arg3[%c12_71, %c0_72, %c0_73] : memref<18x16x16xbf16, #tpu.memory_space<vmem>>, vector<1x16x16xbf16>
    %107 = vector.shape_cast %106 : vector<1x16x16xbf16> to vector<16x16xbf16>
    %cst_74 = arith.constant dense<0.000000e+00> : vector<16x256xf32>
    %108 = tpu.matmul %107, %105, %cst_74 {dimension_numbers = #tpu.dot_dimension_numbers<[1], [0], [0], [1], [0, 0, 1, 1], [], []>} : vector<16x16xbf16>, vector<16x256xbf16>, vector<16x256xf32> -> vector<16x256xf32>
    %109 = arith.addf %100, %108 : vector<16x256xf32>
    %c13_75 = arith.constant 13 : index
    %c0_76 = arith.constant 0 : index
    %c0_77 = arith.constant 0 : index
    %110 = vector.load %arg3[%c13_75, %c0_76, %c0_77] : memref<18x16x16xbf16, #tpu.memory_space<vmem>>, vector<1x16x16xbf16>
    %111 = vector.shape_cast %110 : vector<1x16x16xbf16> to vector<16x16xbf16>
    %cst_78 = arith.constant dense<0.000000e+00> : vector<16x256xf32>
    %112 = tpu.matmul %111, %7, %cst_78 {dimension_numbers = #tpu.dot_dimension_numbers<[1], [0], [0], [1], [0, 0, 1, 1], [], []>} : vector<16x16xbf16>, vector<16x256xbf16>, vector<16x256xf32> -> vector<16x256xf32>
    %113 = arith.addf %109, %112 : vector<16x256xf32>
    %c0_79 = arith.constant 0 : index
    %c268 = arith.constant 268 : index
    %114 = vector.load %arg12[%c0_79, %c268] : memref<16x768xf32, #tpu.memory_space<vmem>>, vector<16x256xf32>
    %c15 = arith.constant 15 : index
    %c0_80 = arith.constant 0 : index
    %115 = vector.load %arg2[%c15, %c0_80] : memref<18x256xf32, #tpu.memory_space<vmem>>, vector<1x256xf32>
    %116 = vector.broadcast %115 : vector<1x256xf32> to vector<16x256xf32>
    %117 = arith.mulf %114, %116 : vector<16x256xf32>
    %118 = arith.truncf %117 : vector<16x256xf32> to vector<16x256xbf16>
    %c14_81 = arith.constant 14 : index
    %c0_82 = arith.constant 0 : index
    %c0_83 = arith.constant 0 : index
    %119 = vector.load %arg3[%c14_81, %c0_82, %c0_83] : memref<18x16x16xbf16, #tpu.memory_space<vmem>>, vector<1x16x16xbf16>
    %120 = vector.shape_cast %119 : vector<1x16x16xbf16> to vector<16x16xbf16>
    %cst_84 = arith.constant dense<0.000000e+00> : vector<16x256xf32>
    %121 = tpu.matmul %120, %118, %cst_84 {dimension_numbers = #tpu.dot_dimension_numbers<[1], [0], [0], [1], [0, 0, 1, 1], [], []>} : vector<16x16xbf16>, vector<16x256xbf16>, vector<16x256xf32> -> vector<16x256xf32>
    %122 = arith.addf %113, %121 : vector<16x256xf32>
    %c0_85 = arith.constant 0 : index
    %c436 = arith.constant 436 : index
    %123 = vector.load %arg12[%c0_85, %c436] : memref<16x768xf32, #tpu.memory_space<vmem>>, vector<16x256xf32>
    %c16 = arith.constant 16 : index
    %c0_86 = arith.constant 0 : index
    %124 = vector.load %arg2[%c16, %c0_86] : memref<18x256xf32, #tpu.memory_space<vmem>>, vector<1x256xf32>
    %125 = vector.broadcast %124 : vector<1x256xf32> to vector<16x256xf32>
    %126 = arith.mulf %123, %125 : vector<16x256xf32>
    %127 = arith.truncf %126 : vector<16x256xf32> to vector<16x256xbf16>
    %c15_87 = arith.constant 15 : index
    %c0_88 = arith.constant 0 : index
    %c0_89 = arith.constant 0 : index
    %128 = vector.load %arg3[%c15_87, %c0_88, %c0_89] : memref<18x16x16xbf16, #tpu.memory_space<vmem>>, vector<1x16x16xbf16>
    %129 = vector.shape_cast %128 : vector<1x16x16xbf16> to vector<16x16xbf16>
    %cst_90 = arith.constant dense<0.000000e+00> : vector<16x256xf32>
    %130 = tpu.matmul %129, %127, %cst_90 {dimension_numbers = #tpu.dot_dimension_numbers<[1], [0], [0], [1], [0, 0, 1, 1], [], []>} : vector<16x16xbf16>, vector<16x256xbf16>, vector<16x256xf32> -> vector<16x256xf32>
    %131 = arith.addf %122, %130 : vector<16x256xf32>
    %c0_91 = arith.constant 0 : index
    %c448 = arith.constant 448 : index
    %132 = vector.load %arg12[%c0_91, %c448] : memref<16x768xf32, #tpu.memory_space<vmem>>, vector<16x256xf32>
    %133 = arith.truncf %132 : vector<16x256xf32> to vector<16x256xbf16>
    %c16_92 = arith.constant 16 : index
    %c0_93 = arith.constant 0 : index
    %c0_94 = arith.constant 0 : index
    %134 = vector.load %arg3[%c16_92, %c0_93, %c0_94] : memref<18x16x16xbf16, #tpu.memory_space<vmem>>, vector<1x16x16xbf16>
    %135 = vector.shape_cast %134 : vector<1x16x16xbf16> to vector<16x16xbf16>
    %cst_95 = arith.constant dense<0.000000e+00> : vector<16x256xf32>
    %136 = tpu.matmul %135, %133, %cst_95 {dimension_numbers = #tpu.dot_dimension_numbers<[1], [0], [0], [1], [0, 0, 1, 1], [], []>} : vector<16x16xbf16>, vector<16x256xbf16>, vector<16x256xf32> -> vector<16x256xf32>
    %137 = arith.addf %131, %136 : vector<16x256xf32>
    %c0_96 = arith.constant 0 : index
    %c460 = arith.constant 460 : index
    %138 = vector.load %arg12[%c0_96, %c460] : memref<16x768xf32, #tpu.memory_space<vmem>>, vector<16x256xf32>
    %c17 = arith.constant 17 : index
    %c0_97 = arith.constant 0 : index
    %139 = vector.load %arg2[%c17, %c0_97] : memref<18x256xf32, #tpu.memory_space<vmem>>, vector<1x256xf32>
    %140 = vector.broadcast %139 : vector<1x256xf32> to vector<16x256xf32>
    %141 = arith.mulf %138, %140 : vector<16x256xf32>
    %142 = arith.truncf %141 : vector<16x256xf32> to vector<16x256xbf16>
    %c17_98 = arith.constant 17 : index
    %c0_99 = arith.constant 0 : index
    %c0_100 = arith.constant 0 : index
    %143 = vector.load %arg3[%c17_98, %c0_99, %c0_100] : memref<18x16x16xbf16, #tpu.memory_space<vmem>>, vector<1x16x16xbf16>
    %144 = vector.shape_cast %143 : vector<1x16x16xbf16> to vector<16x16xbf16>
    %cst_101 = arith.constant dense<0.000000e+00> : vector<16x256xf32>
    %145 = tpu.matmul %144, %142, %cst_101 {dimension_numbers = #tpu.dot_dimension_numbers<[1], [0], [0], [1], [0, 0, 1, 1], [], []>} : vector<16x16xbf16>, vector<16x256xbf16>, vector<16x256xf32> -> vector<16x256xf32>
    %146 = arith.addf %137, %145 : vector<16x256xf32>
    %c0_102 = arith.constant 0 : index
    %c0_103 = arith.constant 0 : index
    %147 = vector.load %arg4[%c0_102, %c0_103] : memref<16x1xf32, #tpu.memory_space<vmem>>, vector<16x1xf32>
    %148 = vector.broadcast %147 : vector<16x1xf32> to vector<16x256xf32>
    %149 = arith.addf %146, %148 : vector<16x256xf32>
    %cst_104 = arith.constant 2.000000e-01 : f32
    %150 = vector.broadcast %cst_104 : f32 to vector<16x256xf32>
    %151 = arith.mulf %150, %149 : vector<16x256xf32>
    %152 = arith.maximumf %149, %151 : vector<16x256xf32>
    %c0_105 = arith.constant 0 : index
    %c256_106 = arith.constant 256 : index
    %153 = vector.load %arg12[%c0_105, %c256_106] : memref<16x768xf32, #tpu.memory_space<vmem>>, vector<16x256xf32>
    tpu.vector_store %arg12[%c0_105, %c256_106], %152 {strides = array<i32>} : memref<16x768xf32, #tpu.memory_space<vmem>>, vector<16x256xf32>,
    %154 = arith.truncf %152 : vector<16x256xf32> to vector<16x256xbf16>
    %c0_107 = arith.constant 0 : index
    %c154_108 = arith.constant 154 : index
    %155 = vector.load %arg12[%c0_107, %c154_108] : memref<16x768xf32, #tpu.memory_space<vmem>>, vector<16x256xf32>
    %c6_109 = arith.constant 6 : index
    %c0_110 = arith.constant 0 : index
    %156 = vector.load %arg2[%c6_109, %c0_110] : memref<18x256xf32, #tpu.memory_space<vmem>>, vector<1x256xf32>
    %157 = vector.broadcast %156 : vector<1x256xf32> to vector<16x256xf32>
    %158 = arith.mulf %155, %157 : vector<16x256xf32>
    %159 = arith.truncf %158 : vector<16x256xf32> to vector<16x256xbf16>
    %c0_111 = arith.constant 0 : index
    %c0_112 = arith.constant 0 : index
    %c0_113 = arith.constant 0 : index
    %160 = vector.load %arg5[%c0_111, %c0_112, %c0_113] : memref<18x16x16xbf16, #tpu.memory_space<vmem>>, vector<1x16x16xbf16>
    %161 = vector.shape_cast %160 : vector<1x16x16xbf16> to vector<16x16xbf16>
    %cst_114 = arith.constant dense<0.000000e+00> : vector<16x256xf32>
    %162 = tpu.matmul %161, %159, %cst_114 {dimension_numbers = #tpu.dot_dimension_numbers<[1], [0], [0], [1], [0, 0, 1, 1], [], []>} : vector<16x16xbf16>, vector<16x256xbf16>, vector<16x256xf32> -> vector<16x256xf32>
    %c0_115 = arith.constant 0 : index
    %c160_116 = arith.constant 160 : index
    %163 = vector.load %arg12[%c0_115, %c160_116] : memref<16x768xf32, #tpu.memory_space<vmem>>, vector<16x256xf32>
    %164 = arith.truncf %163 : vector<16x256xf32> to vector<16x256xbf16>
    %c1_117 = arith.constant 1 : index
    %c0_118 = arith.constant 0 : index
    %c0_119 = arith.constant 0 : index
    %165 = vector.load %arg5[%c1_117, %c0_118, %c0_119] : memref<18x16x16xbf16, #tpu.memory_space<vmem>>, vector<1x16x16xbf16>
    %166 = vector.shape_cast %165 : vector<1x16x16xbf16> to vector<16x16xbf16>
    %cst_120 = arith.constant dense<0.000000e+00> : vector<16x256xf32>
    %167 = tpu.matmul %166, %164, %cst_120 {dimension_numbers = #tpu.dot_dimension_numbers<[1], [0], [0], [1], [0, 0, 1, 1], [], []>} : vector<16x16xbf16>, vector<16x256xbf16>, vector<16x256xf32> -> vector<16x256xf32>
    %168 = arith.addf %162, %167 : vector<16x256xf32>
    %c0_121 = arith.constant 0 : index
    %c166_122 = arith.constant 166 : index
    %169 = vector.load %arg12[%c0_121, %c166_122] : memref<16x768xf32, #tpu.memory_space<vmem>>, vector<16x256xf32>
    %c7_123 = arith.constant 7 : index
    %c0_124 = arith.constant 0 : index
    %170 = vector.load %arg2[%c7_123, %c0_124] : memref<18x256xf32, #tpu.memory_space<vmem>>, vector<1x256xf32>
    %171 = vector.broadcast %170 : vector<1x256xf32> to vector<16x256xf32>
    %172 = arith.mulf %169, %171 : vector<16x256xf32>
    %173 = arith.truncf %172 : vector<16x256xf32> to vector<16x256xbf16>
    %c2_125 = arith.constant 2 : index
    %c0_126 = arith.constant 0 : index
    %c0_127 = arith.constant 0 : index
    %174 = vector.load %arg5[%c2_125, %c0_126, %c0_127] : memref<18x16x16xbf16, #tpu.memory_space<vmem>>, vector<1x16x16xbf16>
    %175 = vector.shape_cast %174 : vector<1x16x16xbf16> to vector<16x16xbf16>
    %cst_128 = arith.constant dense<0.000000e+00> : vector<16x256xf32>
    %176 = tpu.matmul %175, %173, %cst_128 {dimension_numbers = #tpu.dot_dimension_numbers<[1], [0], [0], [1], [0, 0, 1, 1], [], []>} : vector<16x16xbf16>, vector<16x256xbf16>, vector<16x256xf32> -> vector<16x256xf32>
    %177 = arith.addf %168, %176 : vector<16x256xf32>
    %c0_129 = arith.constant 0 : index
    %c250_130 = arith.constant 250 : index
    %178 = vector.load %arg12[%c0_129, %c250_130] : memref<16x768xf32, #tpu.memory_space<vmem>>, vector<16x256xf32>
    %c8_131 = arith.constant 8 : index
    %c0_132 = arith.constant 0 : index
    %179 = vector.load %arg2[%c8_131, %c0_132] : memref<18x256xf32, #tpu.memory_space<vmem>>, vector<1x256xf32>
    %180 = vector.broadcast %179 : vector<1x256xf32> to vector<16x256xf32>
    %181 = arith.mulf %178, %180 : vector<16x256xf32>
    %182 = arith.truncf %181 : vector<16x256xf32> to vector<16x256xbf16>
    %c3_133 = arith.constant 3 : index
    %c0_134 = arith.constant 0 : index
    %c0_135 = arith.constant 0 : index
    %183 = vector.load %arg5[%c3_133, %c0_134, %c0_135] : memref<18x16x16xbf16, #tpu.memory_space<vmem>>, vector<1x16x16xbf16>
    %184 = vector.shape_cast %183 : vector<1x16x16xbf16> to vector<16x16xbf16>
    %cst_136 = arith.constant dense<0.000000e+00> : vector<16x256xf32>
    %185 = tpu.matmul %184, %182, %cst_136 {dimension_numbers = #tpu.dot_dimension_numbers<[1], [0], [0], [1], [0, 0, 1, 1], [], []>} : vector<16x16xbf16>, vector<16x256xbf16>, vector<16x256xf32> -> vector<16x256xf32>
    %186 = arith.addf %177, %185 : vector<16x256xf32>
    %c4_137 = arith.constant 4 : index
    %c0_138 = arith.constant 0 : index
    %c0_139 = arith.constant 0 : index
    %187 = vector.load %arg5[%c4_137, %c0_138, %c0_139] : memref<18x16x16xbf16, #tpu.memory_space<vmem>>, vector<1x16x16xbf16>
    %188 = vector.shape_cast %187 : vector<1x16x16xbf16> to vector<16x16xbf16>
    %cst_140 = arith.constant dense<0.000000e+00> : vector<16x256xf32>
    %189 = tpu.matmul %188, %154, %cst_140 {dimension_numbers = #tpu.dot_dimension_numbers<[1], [0], [0], [1], [0, 0, 1, 1], [], []>} : vector<16x16xbf16>, vector<16x256xbf16>, vector<16x256xf32> -> vector<16x256xf32>
    %190 = arith.addf %186, %189 : vector<16x256xf32>
    %c0_141 = arith.constant 0 : index
    %c262_142 = arith.constant 262 : index
    %191 = vector.load %arg12[%c0_141, %c262_142] : memref<16x768xf32, #tpu.memory_space<vmem>>, vector<16x256xf32>
    %c9_143 = arith.constant 9 : index
    %c0_144 = arith.constant 0 : index
    %192 = vector.load %arg2[%c9_143, %c0_144] : memref<18x256xf32, #tpu.memory_space<vmem>>, vector<1x256xf32>
    %193 = vector.broadcast %192 : vector<1x256xf32> to vector<16x256xf32>
    %194 = arith.mulf %191, %193 : vector<16x256xf32>
    %195 = arith.truncf %194 : vector<16x256xf32> to vector<16x256xbf16>
    %c5_145 = arith.constant 5 : index
    %c0_146 = arith.constant 0 : index
    %c0_147 = arith.constant 0 : index
    %196 = vector.load %arg5[%c5_145, %c0_146, %c0_147] : memref<18x16x16xbf16, #tpu.memory_space<vmem>>, vector<1x16x16xbf16>
    %197 = vector.shape_cast %196 : vector<1x16x16xbf16> to vector<16x16xbf16>
    %cst_148 = arith.constant dense<0.000000e+00> : vector<16x256xf32>
    %198 = tpu.matmul %197, %195, %cst_148 {dimension_numbers = #tpu.dot_dimension_numbers<[1], [0], [0], [1], [0, 0, 1, 1], [], []>} : vector<16x16xbf16>, vector<16x256xbf16>, vector<16x256xf32> -> vector<16x256xf32>
    %199 = arith.addf %190, %198 : vector<16x256xf32>
    %c0_149 = arith.constant 0 : index
    %c346_150 = arith.constant 346 : index
    %200 = vector.load %arg12[%c0_149, %c346_150] : memref<16x768xf32, #tpu.memory_space<vmem>>, vector<16x256xf32>
    %c10_151 = arith.constant 10 : index
    %c0_152 = arith.constant 0 : index
    %201 = vector.load %arg2[%c10_151, %c0_152] : memref<18x256xf32, #tpu.memory_space<vmem>>, vector<1x256xf32>
    %202 = vector.broadcast %201 : vector<1x256xf32> to vector<16x256xf32>
    %203 = arith.mulf %200, %202 : vector<16x256xf32>
    %204 = arith.truncf %203 : vector<16x256xf32> to vector<16x256xbf16>
    %c6_153 = arith.constant 6 : index
    %c0_154 = arith.constant 0 : index
    %c0_155 = arith.constant 0 : index
    %205 = vector.load %arg5[%c6_153, %c0_154, %c0_155] : memref<18x16x16xbf16, #tpu.memory_space<vmem>>, vector<1x16x16xbf16>
    %206 = vector.shape_cast %205 : vector<1x16x16xbf16> to vector<16x16xbf16>
    %cst_156 = arith.constant dense<0.000000e+00> : vector<16x256xf32>
    %207 = tpu.matmul %206, %204, %cst_156 {dimension_numbers = #tpu.dot_dimension_numbers<[1], [0], [0], [1], [0, 0, 1, 1], [], []>} : vector<16x16xbf16>, vector<16x256xbf16>, vector<16x256xf32> -> vector<16x256xf32>
    %208 = arith.addf %199, %207 : vector<16x256xf32>
    %c0_157 = arith.constant 0 : index
    %c352_158 = arith.constant 352 : index
    %209 = vector.load %arg12[%c0_157, %c352_158] : memref<16x768xf32, #tpu.memory_space<vmem>>, vector<16x256xf32>
    %210 = arith.truncf %209 : vector<16x256xf32> to vector<16x256xbf16>
    %c7_159 = arith.constant 7 : index
    %c0_160 = arith.constant 0 : index
    %c0_161 = arith.constant 0 : index
    %211 = vector.load %arg5[%c7_159, %c0_160, %c0_161] : memref<18x16x16xbf16, #tpu.memory_space<vmem>>, vector<1x16x16xbf16>
    %212 = vector.shape_cast %211 : vector<1x16x16xbf16> to vector<16x16xbf16>
    %cst_162 = arith.constant dense<0.000000e+00> : vector<16x256xf32>
    %213 = tpu.matmul %212, %210, %cst_162 {dimension_numbers = #tpu.dot_dimension_numbers<[1], [0], [0], [1], [0, 0, 1, 1], [], []>} : vector<16x16xbf16>, vector<16x256xbf16>, vector<16x256xf32> -> vector<16x256xf32>
    %214 = arith.addf %208, %213 : vector<16x256xf32>
    %c0_163 = arith.constant 0 : index
    %c358_164 = arith.constant 358 : index
    %215 = vector.load %arg12[%c0_163, %c358_164] : memref<16x768xf32, #tpu.memory_space<vmem>>, vector<16x256xf32>
    %c11_165 = arith.constant 11 : index
    %c0_166 = arith.constant 0 : index
    %216 = vector.load %arg2[%c11_165, %c0_166] : memref<18x256xf32, #tpu.memory_space<vmem>>, vector<1x256xf32>
    %217 = vector.broadcast %216 : vector<1x256xf32> to vector<16x256xf32>
    %218 = arith.mulf %215, %217 : vector<16x256xf32>
    %219 = arith.truncf %218 : vector<16x256xf32> to vector<16x256xbf16>
    %c8_167 = arith.constant 8 : index
    %c0_168 = arith.constant 0 : index
    %c0_169 = arith.constant 0 : index
    %220 = vector.load %arg5[%c8_167, %c0_168, %c0_169] : memref<18x16x16xbf16, #tpu.memory_space<vmem>>, vector<1x16x16xbf16>
    %221 = vector.shape_cast %220 : vector<1x16x16xbf16> to vector<16x16xbf16>
    %cst_170 = arith.constant dense<0.000000e+00> : vector<16x256xf32>
    %222 = tpu.matmul %221, %219, %cst_170 {dimension_numbers = #tpu.dot_dimension_numbers<[1], [0], [0], [1], [0, 0, 1, 1], [], []>} : vector<16x16xbf16>, vector<16x256xbf16>, vector<16x256xf32> -> vector<16x256xf32>
    %223 = arith.addf %214, %222 : vector<16x256xf32>
    %c0_171 = arith.constant 0 : index
    %c52_172 = arith.constant 52 : index
    %224 = vector.load %arg12[%c0_171, %c52_172] : memref<16x768xf32, #tpu.memory_space<vmem>>, vector<16x256xf32>
    %c12_173 = arith.constant 12 : index
    %c0_174 = arith.constant 0 : index
    %225 = vector.load %arg2[%c12_173, %c0_174] : memref<18x256xf32, #tpu.memory_space<vmem>>, vector<1x256xf32>
    %226 = vector.broadcast %225 : vector<1x256xf32> to vector<16x256xf32>
    %227 = arith.mulf %224, %226 : vector<16x256xf32>
    %228 = arith.truncf %227 : vector<16x256xf32> to vector<16x256xbf16>
    %c9_175 = arith.constant 9 : index
    %c0_176 = arith.constant 0 : index
    %c0_177 = arith.constant 0 : index
    %229 = vector.load %arg5[%c9_175, %c0_176, %c0_177] : memref<18x16x16xbf16, #tpu.memory_space<vmem>>, vector<1x16x16xbf16>
    %230 = vector.shape_cast %229 : vector<1x16x16xbf16> to vector<16x16xbf16>
    %cst_178 = arith.constant dense<0.000000e+00> : vector<16x256xf32>
    %231 = tpu.matmul %230, %228, %cst_178 {dimension_numbers = #tpu.dot_dimension_numbers<[1], [0], [0], [1], [0, 0, 1, 1], [], []>} : vector<16x16xbf16>, vector<16x256xbf16>, vector<16x256xf32> -> vector<16x256xf32>
    %232 = arith.addf %223, %231 : vector<16x256xf32>
    %c0_179 = arith.constant 0 : index
    %c64_180 = arith.constant 64 : index
    %233 = vector.load %arg12[%c0_179, %c64_180] : memref<16x768xf32, #tpu.memory_space<vmem>>, vector<16x256xf32>
    %234 = arith.truncf %233 : vector<16x256xf32> to vector<16x256xbf16>
    %c10_181 = arith.constant 10 : index
    %c0_182 = arith.constant 0 : index
    %c0_183 = arith.constant 0 : index
    %235 = vector.load %arg5[%c10_181, %c0_182, %c0_183] : memref<18x16x16xbf16, #tpu.memory_space<vmem>>, vector<1x16x16xbf16>
    %236 = vector.shape_cast %235 : vector<1x16x16xbf16> to vector<16x16xbf16>
    %cst_184 = arith.constant dense<0.000000e+00> : vector<16x256xf32>
    %237 = tpu.matmul %236, %234, %cst_184 {dimension_numbers = #tpu.dot_dimension_numbers<[1], [0], [0], [1], [0, 0, 1, 1], [], []>} : vector<16x16xbf16>, vector<16x256xbf16>, vector<16x256xf32> -> vector<16x256xf32>
    %238 = arith.addf %232, %237 : vector<16x256xf32>
    %c0_185 = arith.constant 0 : index
    %c76_186 = arith.constant 76 : index
    %239 = vector.load %arg12[%c0_185, %c76_186] : memref<16x768xf32, #tpu.memory_space<vmem>>, vector<16x256xf32>
    %c13_187 = arith.constant 13 : index
    %c0_188 = arith.constant 0 : index
    %240 = vector.load %arg2[%c13_187, %c0_188] : memref<18x256xf32, #tpu.memory_space<vmem>>, vector<1x256xf32>
    %241 = vector.broadcast %240 : vector<1x256xf32> to vector<16x256xf32>
    %242 = arith.mulf %239, %241 : vector<16x256xf32>
    %243 = arith.truncf %242 : vector<16x256xf32> to vector<16x256xbf16>
    %c11_189 = arith.constant 11 : index
    %c0_190 = arith.constant 0 : index
    %c0_191 = arith.constant 0 : index
    %244 = vector.load %arg5[%c11_189, %c0_190, %c0_191] : memref<18x16x16xbf16, #tpu.memory_space<vmem>>, vector<1x16x16xbf16>
    %245 = vector.shape_cast %244 : vector<1x16x16xbf16> to vector<16x16xbf16>
    %cst_192 = arith.constant dense<0.000000e+00> : vector<16x256xf32>
    %246 = tpu.matmul %245, %243, %cst_192 {dimension_numbers = #tpu.dot_dimension_numbers<[1], [0], [0], [1], [0, 0, 1, 1], [], []>} : vector<16x16xbf16>, vector<16x256xbf16>, vector<16x256xf32> -> vector<16x256xf32>
    %247 = arith.addf %238, %246 : vector<16x256xf32>
    %c0_193 = arith.constant 0 : index
    %c244_194 = arith.constant 244 : index
    %248 = vector.load %arg12[%c0_193, %c244_194] : memref<16x768xf32, #tpu.memory_space<vmem>>, vector<16x256xf32>
    %c14_195 = arith.constant 14 : index
    %c0_196 = arith.constant 0 : index
    %249 = vector.load %arg2[%c14_195, %c0_196] : memref<18x256xf32, #tpu.memory_space<vmem>>, vector<1x256xf32>
    %250 = vector.broadcast %249 : vector<1x256xf32> to vector<16x256xf32>
    %251 = arith.mulf %248, %250 : vector<16x256xf32>
    %252 = arith.truncf %251 : vector<16x256xf32> to vector<16x256xbf16>
    %c12_197 = arith.constant 12 : index
    %c0_198 = arith.constant 0 : index
    %c0_199 = arith.constant 0 : index
    %253 = vector.load %arg5[%c12_197, %c0_198, %c0_199] : memref<18x16x16xbf16, #tpu.memory_space<vmem>>, vector<1x16x16xbf16>
    %254 = vector.shape_cast %253 : vector<1x16x16xbf16> to vector<16x16xbf16>
    %cst_200 = arith.constant dense<0.000000e+00> : vector<16x256xf32>
    %255 = tpu.matmul %254, %252, %cst_200 {dimension_numbers = #tpu.dot_dimension_numbers<[1], [0], [0], [1], [0, 0, 1, 1], [], []>} : vector<16x16xbf16>, vector<16x256xbf16>, vector<16x256xf32> -> vector<16x256xf32>
    %256 = arith.addf %247, %255 : vector<16x256xf32>
    %c13_201 = arith.constant 13 : index
    %c0_202 = arith.constant 0 : index
    %c0_203 = arith.constant 0 : index
    %257 = vector.load %arg5[%c13_201, %c0_202, %c0_203] : memref<18x16x16xbf16, #tpu.memory_space<vmem>>, vector<1x16x16xbf16>
    %258 = vector.shape_cast %257 : vector<1x16x16xbf16> to vector<16x16xbf16>
    %cst_204 = arith.constant dense<0.000000e+00> : vector<16x256xf32>
    %259 = tpu.matmul %258, %154, %cst_204 {dimension_numbers = #tpu.dot_dimension_numbers<[1], [0], [0], [1], [0, 0, 1, 1], [], []>} : vector<16x16xbf16>, vector<16x256xbf16>, vector<16x256xf32> -> vector<16x256xf32>
    %260 = arith.addf %256, %259 : vector<16x256xf32>
    %c0_205 = arith.constant 0 : index
    %c268_206 = arith.constant 268 : index
    %261 = vector.load %arg12[%c0_205, %c268_206] : memref<16x768xf32, #tpu.memory_space<vmem>>, vector<16x256xf32>
    %c15_207 = arith.constant 15 : index
    %c0_208 = arith.constant 0 : index
    %262 = vector.load %arg2[%c15_207, %c0_208] : memref<18x256xf32, #tpu.memory_space<vmem>>, vector<1x256xf32>
    %263 = vector.broadcast %262 : vector<1x256xf32> to vector<16x256xf32>
    %264 = arith.mulf %261, %263 : vector<16x256xf32>
    %265 = arith.truncf %264 : vector<16x256xf32> to vector<16x256xbf16>
    %c14_209 = arith.constant 14 : index
    %c0_210 = arith.constant 0 : index
    %c0_211 = arith.constant 0 : index
    %266 = vector.load %arg5[%c14_209, %c0_210, %c0_211] : memref<18x16x16xbf16, #tpu.memory_space<vmem>>, vector<1x16x16xbf16>
    %267 = vector.shape_cast %266 : vector<1x16x16xbf16> to vector<16x16xbf16>
    %cst_212 = arith.constant dense<0.000000e+00> : vector<16x256xf32>
    %268 = tpu.matmul %267, %265, %cst_212 {dimension_numbers = #tpu.dot_dimension_numbers<[1], [0], [0], [1], [0, 0, 1, 1], [], []>} : vector<16x16xbf16>, vector<16x256xbf16>, vector<16x256xf32> -> vector<16x256xf32>
    %269 = arith.addf %260, %268 : vector<16x256xf32>
    %c0_213 = arith.constant 0 : index
    %c436_214 = arith.constant 436 : index
    %270 = vector.load %arg12[%c0_213, %c436_214] : memref<16x768xf32, #tpu.memory_space<vmem>>, vector<16x256xf32>
    %c16_215 = arith.constant 16 : index
    %c0_216 = arith.constant 0 : index
    %271 = vector.load %arg2[%c16_215, %c0_216] : memref<18x256xf32, #tpu.memory_space<vmem>>, vector<1x256xf32>
    %272 = vector.broadcast %271 : vector<1x256xf32> to vector<16x256xf32>
    %273 = arith.mulf %270, %272 : vector<16x256xf32>
    %274 = arith.truncf %273 : vector<16x256xf32> to vector<16x256xbf16>
    %c15_217 = arith.constant 15 : index
    %c0_218 = arith.constant 0 : index
    %c0_219 = arith.constant 0 : index
    %275 = vector.load %arg5[%c15_217, %c0_218, %c0_219] : memref<18x16x16xbf16, #tpu.memory_space<vmem>>, vector<1x16x16xbf16>
    %276 = vector.shape_cast %275 : vector<1x16x16xbf16> to vector<16x16xbf16>
    %cst_220 = arith.constant dense<0.000000e+00> : vector<16x256xf32>
    %277 = tpu.matmul %276, %274, %cst_220 {dimension_numbers = #tpu.dot_dimension_numbers<[1], [0], [0], [1], [0, 0, 1, 1], [], []>} : vector<16x16xbf16>, vector<16x256xbf16>, vector<16x256xf32> -> vector<16x256xf32>
    %278 = arith.addf %269, %277 : vector<16x256xf32>
    %c0_221 = arith.constant 0 : index
    %c448_222 = arith.constant 448 : index
    %279 = vector.load %arg12[%c0_221, %c448_222] : memref<16x768xf32, #tpu.memory_space<vmem>>, vector<16x256xf32>
    %280 = arith.truncf %279 : vector<16x256xf32> to vector<16x256xbf16>
    %c16_223 = arith.constant 16 : index
    %c0_224 = arith.constant 0 : index
    %c0_225 = arith.constant 0 : index
    %281 = vector.load %arg5[%c16_223, %c0_224, %c0_225] : memref<18x16x16xbf16, #tpu.memory_space<vmem>>, vector<1x16x16xbf16>
    %282 = vector.shape_cast %281 : vector<1x16x16xbf16> to vector<16x16xbf16>
    %cst_226 = arith.constant dense<0.000000e+00> : vector<16x256xf32>
    %283 = tpu.matmul %282, %280, %cst_226 {dimension_numbers = #tpu.dot_dimension_numbers<[1], [0], [0], [1], [0, 0, 1, 1], [], []>} : vector<16x16xbf16>, vector<16x256xbf16>, vector<16x256xf32> -> vector<16x256xf32>
    %284 = arith.addf %278, %283 : vector<16x256xf32>
    %c0_227 = arith.constant 0 : index
    %c460_228 = arith.constant 460 : index
    %285 = vector.load %arg12[%c0_227, %c460_228] : memref<16x768xf32, #tpu.memory_space<vmem>>, vector<16x256xf32>
    %c17_229 = arith.constant 17 : index
    %c0_230 = arith.constant 0 : index
    %286 = vector.load %arg2[%c17_229, %c0_230] : memref<18x256xf32, #tpu.memory_space<vmem>>, vector<1x256xf32>
    %287 = vector.broadcast %286 : vector<1x256xf32> to vector<16x256xf32>
    %288 = arith.mulf %285, %287 : vector<16x256xf32>
    %289 = arith.truncf %288 : vector<16x256xf32> to vector<16x256xbf16>
    %c17_231 = arith.constant 17 : index
    %c0_232 = arith.constant 0 : index
    %c0_233 = arith.constant 0 : index
    %290 = vector.load %arg5[%c17_231, %c0_232, %c0_233] : memref<18x16x16xbf16, #tpu.memory_space<vmem>>, vector<1x16x16xbf16>
    %291 = vector.shape_cast %290 : vector<1x16x16xbf16> to vector<16x16xbf16>
    %cst_234 = arith.constant dense<0.000000e+00> : vector<16x256xf32>
    %292 = tpu.matmul %291, %289, %cst_234 {dimension_numbers = #tpu.dot_dimension_numbers<[1], [0], [0], [1], [0, 0, 1, 1], [], []>} : vector<16x16xbf16>, vector<16x256xbf16>, vector<16x256xf32> -> vector<16x256xf32>
    %293 = arith.addf %284, %292 : vector<16x256xf32>
    %c0_235 = arith.constant 0 : index
    %c0_236 = arith.constant 0 : index
    %294 = vector.load %arg6[%c0_235, %c0_236] : memref<16x1xf32, #tpu.memory_space<vmem>>, vector<16x1xf32>
    %295 = vector.broadcast %294 : vector<16x1xf32> to vector<16x256xf32>
    %296 = arith.addf %293, %295 : vector<16x256xf32>
    %cst_237 = arith.constant 2.000000e-01 : f32
    %297 = vector.broadcast %cst_237 : f32 to vector<16x256xf32>
    %298 = arith.mulf %297, %296 : vector<16x256xf32>
    %299 = arith.maximumf %296, %298 : vector<16x256xf32>
    %c0_238 = arith.constant 0 : index
    %c256_239 = arith.constant 256 : index
    %300 = vector.load %arg12[%c0_238, %c256_239] : memref<16x768xf32, #tpu.memory_space<vmem>>, vector<16x256xf32>
    tpu.vector_store %arg12[%c0_238, %c256_239], %299 {strides = array<i32>} : memref<16x768xf32, #tpu.memory_space<vmem>>, vector<16x256xf32>,
    %301 = arith.truncf %299 : vector<16x256xf32> to vector<16x256xbf16>
    %c0_240 = arith.constant 0 : index
    %c239 = arith.constant 239 : index
    %302 = vector.load %arg12[%c0_240, %c239] : memref<16x768xf32, #tpu.memory_space<vmem>>, vector<16x256xf32>
    %c0_241 = arith.constant 0 : index
    %c0_242 = arith.constant 0 : index
    %303 = vector.load %arg2[%c0_241, %c0_242] : memref<18x256xf32, #tpu.memory_space<vmem>>, vector<1x256xf32>
    %304 = vector.broadcast %303 : vector<1x256xf32> to vector<16x256xf32>
    %305 = arith.mulf %302, %304 : vector<16x256xf32>
    %306 = arith.truncf %305 : vector<16x256xf32> to vector<16x256xbf16>
    %c0_243 = arith.constant 0 : index
    %c0_244 = arith.constant 0 : index
    %c0_245 = arith.constant 0 : index
    %307 = vector.load %arg7[%c0_243, %c0_244, %c0_245] : memref<9x16x16xbf16, #tpu.memory_space<vmem>>, vector<1x16x16xbf16>
    %308 = vector.shape_cast %307 : vector<1x16x16xbf16> to vector<16x16xbf16>
    %cst_246 = arith.constant dense<0.000000e+00> : vector<16x256xf32>
    %309 = tpu.matmul %308, %306, %cst_246 {dimension_numbers = #tpu.dot_dimension_numbers<[1], [0], [0], [1], [0, 0, 1, 1], [], []>} : vector<16x16xbf16>, vector<16x256xbf16>, vector<16x256xf32> -> vector<16x256xf32>
    %c0_247 = arith.constant 0 : index
    %c240 = arith.constant 240 : index
    %310 = vector.load %arg12[%c0_247, %c240] : memref<16x768xf32, #tpu.memory_space<vmem>>, vector<16x256xf32>
    %311 = arith.truncf %310 : vector<16x256xf32> to vector<16x256xbf16>
    %c1_248 = arith.constant 1 : index
    %c0_249 = arith.constant 0 : index
    %c0_250 = arith.constant 0 : index
    %312 = vector.load %arg7[%c1_248, %c0_249, %c0_250] : memref<9x16x16xbf16, #tpu.memory_space<vmem>>, vector<1x16x16xbf16>
    %313 = vector.shape_cast %312 : vector<1x16x16xbf16> to vector<16x16xbf16>
    %cst_251 = arith.constant dense<0.000000e+00> : vector<16x256xf32>
    %314 = tpu.matmul %313, %311, %cst_251 {dimension_numbers = #tpu.dot_dimension_numbers<[1], [0], [0], [1], [0, 0, 1, 1], [], []>} : vector<16x16xbf16>, vector<16x256xbf16>, vector<16x256xf32> -> vector<16x256xf32>
    %315 = arith.addf %309, %314 : vector<16x256xf32>
    %c0_252 = arith.constant 0 : index
    %c241 = arith.constant 241 : index
    %316 = vector.load %arg12[%c0_252, %c241] : memref<16x768xf32, #tpu.memory_space<vmem>>, vector<16x256xf32>
    %c1_253 = arith.constant 1 : index
    %c0_254 = arith.constant 0 : index
    %317 = vector.load %arg2[%c1_253, %c0_254] : memref<18x256xf32, #tpu.memory_space<vmem>>, vector<1x256xf32>
    %318 = vector.broadcast %317 : vector<1x256xf32> to vector<16x256xf32>
    %319 = arith.mulf %316, %318 : vector<16x256xf32>
    %320 = arith.truncf %319 : vector<16x256xf32> to vector<16x256xbf16>
    %c2_255 = arith.constant 2 : index
    %c0_256 = arith.constant 0 : index
    %c0_257 = arith.constant 0 : index
    %321 = vector.load %arg7[%c2_255, %c0_256, %c0_257] : memref<9x16x16xbf16, #tpu.memory_space<vmem>>, vector<1x16x16xbf16>
    %322 = vector.shape_cast %321 : vector<1x16x16xbf16> to vector<16x16xbf16>
    %cst_258 = arith.constant dense<0.000000e+00> : vector<16x256xf32>
    %323 = tpu.matmul %322, %320, %cst_258 {dimension_numbers = #tpu.dot_dimension_numbers<[1], [0], [0], [1], [0, 0, 1, 1], [], []>} : vector<16x16xbf16>, vector<16x256xbf16>, vector<16x256xf32> -> vector<16x256xf32>
    %324 = arith.addf %315, %323 : vector<16x256xf32>
    %c0_259 = arith.constant 0 : index
    %c255 = arith.constant 255 : index
    %325 = vector.load %arg12[%c0_259, %c255] : memref<16x768xf32, #tpu.memory_space<vmem>>, vector<16x256xf32>
    %c2_260 = arith.constant 2 : index
    %c0_261 = arith.constant 0 : index
    %326 = vector.load %arg2[%c2_260, %c0_261] : memref<18x256xf32, #tpu.memory_space<vmem>>, vector<1x256xf32>
    %327 = vector.broadcast %326 : vector<1x256xf32> to vector<16x256xf32>
    %328 = arith.mulf %325, %327 : vector<16x256xf32>
    %329 = arith.truncf %328 : vector<16x256xf32> to vector<16x256xbf16>
    %c3_262 = arith.constant 3 : index
    %c0_263 = arith.constant 0 : index
    %c0_264 = arith.constant 0 : index
    %330 = vector.load %arg7[%c3_262, %c0_263, %c0_264] : memref<9x16x16xbf16, #tpu.memory_space<vmem>>, vector<1x16x16xbf16>
    %331 = vector.shape_cast %330 : vector<1x16x16xbf16> to vector<16x16xbf16>
    %cst_265 = arith.constant dense<0.000000e+00> : vector<16x256xf32>
    %332 = tpu.matmul %331, %329, %cst_265 {dimension_numbers = #tpu.dot_dimension_numbers<[1], [0], [0], [1], [0, 0, 1, 1], [], []>} : vector<16x16xbf16>, vector<16x256xbf16>, vector<16x256xf32> -> vector<16x256xf32>
    %333 = arith.addf %324, %332 : vector<16x256xf32>
    %c4_266 = arith.constant 4 : index
    %c0_267 = arith.constant 0 : index
    %c0_268 = arith.constant 0 : index
    %334 = vector.load %arg7[%c4_266, %c0_267, %c0_268] : memref<9x16x16xbf16, #tpu.memory_space<vmem>>, vector<1x16x16xbf16>
    %335 = vector.shape_cast %334 : vector<1x16x16xbf16> to vector<16x16xbf16>
    %cst_269 = arith.constant dense<0.000000e+00> : vector<16x256xf32>
    %336 = tpu.matmul %335, %301, %cst_269 {dimension_numbers = #tpu.dot_dimension_numbers<[1], [0], [0], [1], [0, 0, 1, 1], [], []>} : vector<16x16xbf16>, vector<16x256xbf16>, vector<16x256xf32> -> vector<16x256xf32>
    %337 = arith.addf %333, %336 : vector<16x256xf32>
    %c0_270 = arith.constant 0 : index
    %c257 = arith.constant 257 : index
    %338 = vector.load %arg12[%c0_270, %c257] : memref<16x768xf32, #tpu.memory_space<vmem>>, vector<16x256xf32>
    %c3_271 = arith.constant 3 : index
    %c0_272 = arith.constant 0 : index
    %339 = vector.load %arg2[%c3_271, %c0_272] : memref<18x256xf32, #tpu.memory_space<vmem>>, vector<1x256xf32>
    %340 = vector.broadcast %339 : vector<1x256xf32> to vector<16x256xf32>
    %341 = arith.mulf %338, %340 : vector<16x256xf32>
    %342 = arith.truncf %341 : vector<16x256xf32> to vector<16x256xbf16>
    %c5_273 = arith.constant 5 : index
    %c0_274 = arith.constant 0 : index
    %c0_275 = arith.constant 0 : index
    %343 = vector.load %arg7[%c5_273, %c0_274, %c0_275] : memref<9x16x16xbf16, #tpu.memory_space<vmem>>, vector<1x16x16xbf16>
    %344 = vector.shape_cast %343 : vector<1x16x16xbf16> to vector<16x16xbf16>
    %cst_276 = arith.constant dense<0.000000e+00> : vector<16x256xf32>
    %345 = tpu.matmul %344, %342, %cst_276 {dimension_numbers = #tpu.dot_dimension_numbers<[1], [0], [0], [1], [0, 0, 1, 1], [], []>} : vector<16x16xbf16>, vector<16x256xbf16>, vector<16x256xf32> -> vector<16x256xf32>
    %346 = arith.addf %337, %345 : vector<16x256xf32>
    %c0_277 = arith.constant 0 : index
    %c271 = arith.constant 271 : index
    %347 = vector.load %arg12[%c0_277, %c271] : memref<16x768xf32, #tpu.memory_space<vmem>>, vector<16x256xf32>
    %c4_278 = arith.constant 4 : index
    %c0_279 = arith.constant 0 : index
    %348 = vector.load %arg2[%c4_278, %c0_279] : memref<18x256xf32, #tpu.memory_space<vmem>>, vector<1x256xf32>
    %349 = vector.broadcast %348 : vector<1x256xf32> to vector<16x256xf32>
    %350 = arith.mulf %347, %349 : vector<16x256xf32>
    %351 = arith.truncf %350 : vector<16x256xf32> to vector<16x256xbf16>
    %c6_280 = arith.constant 6 : index
    %c0_281 = arith.constant 0 : index
    %c0_282 = arith.constant 0 : index
    %352 = vector.load %arg7[%c6_280, %c0_281, %c0_282] : memref<9x16x16xbf16, #tpu.memory_space<vmem>>, vector<1x16x16xbf16>
    %353 = vector.shape_cast %352 : vector<1x16x16xbf16> to vector<16x16xbf16>
    %cst_283 = arith.constant dense<0.000000e+00> : vector<16x256xf32>
    %354 = tpu.matmul %353, %351, %cst_283 {dimension_numbers = #tpu.dot_dimension_numbers<[1], [0], [0], [1], [0, 0, 1, 1], [], []>} : vector<16x16xbf16>, vector<16x256xbf16>, vector<16x256xf32> -> vector<16x256xf32>
    %355 = arith.addf %346, %354 : vector<16x256xf32>
    %c0_284 = arith.constant 0 : index
    %c272 = arith.constant 272 : index
    %356 = vector.load %arg12[%c0_284, %c272] : memref<16x768xf32, #tpu.memory_space<vmem>>, vector<16x256xf32>
    %357 = arith.truncf %356 : vector<16x256xf32> to vector<16x256xbf16>
    %c7_285 = arith.constant 7 : index
    %c0_286 = arith.constant 0 : index
    %c0_287 = arith.constant 0 : index
    %358 = vector.load %arg7[%c7_285, %c0_286, %c0_287] : memref<9x16x16xbf16, #tpu.memory_space<vmem>>, vector<1x16x16xbf16>
    %359 = vector.shape_cast %358 : vector<1x16x16xbf16> to vector<16x16xbf16>
    %cst_288 = arith.constant dense<0.000000e+00> : vector<16x256xf32>
    %360 = tpu.matmul %359, %357, %cst_288 {dimension_numbers = #tpu.dot_dimension_numbers<[1], [0], [0], [1], [0, 0, 1, 1], [], []>} : vector<16x16xbf16>, vector<16x256xbf16>, vector<16x256xf32> -> vector<16x256xf32>
    %361 = arith.addf %355, %360 : vector<16x256xf32>
    %c0_289 = arith.constant 0 : index
    %c273 = arith.constant 273 : index
    %362 = vector.load %arg12[%c0_289, %c273] : memref<16x768xf32, #tpu.memory_space<vmem>>, vector<16x256xf32>
    %c5_290 = arith.constant 5 : index
    %c0_291 = arith.constant 0 : index
    %363 = vector.load %arg2[%c5_290, %c0_291] : memref<18x256xf32, #tpu.memory_space<vmem>>, vector<1x256xf32>
    %364 = vector.broadcast %363 : vector<1x256xf32> to vector<16x256xf32>
    %365 = arith.mulf %362, %364 : vector<16x256xf32>
    %366 = arith.truncf %365 : vector<16x256xf32> to vector<16x256xbf16>
    %c8_292 = arith.constant 8 : index
    %c0_293 = arith.constant 0 : index
    %c0_294 = arith.constant 0 : index
    %367 = vector.load %arg7[%c8_292, %c0_293, %c0_294] : memref<9x16x16xbf16, #tpu.memory_space<vmem>>, vector<1x16x16xbf16>
    %368 = vector.shape_cast %367 : vector<1x16x16xbf16> to vector<16x16xbf16>
    %cst_295 = arith.constant dense<0.000000e+00> : vector<16x256xf32>
    %369 = tpu.matmul %368, %366, %cst_295 {dimension_numbers = #tpu.dot_dimension_numbers<[1], [0], [0], [1], [0, 0, 1, 1], [], []>} : vector<16x16xbf16>, vector<16x256xbf16>, vector<16x256xf32> -> vector<16x256xf32>
    %370 = arith.addf %361, %369 : vector<16x256xf32>
    %c0_296 = arith.constant 0 : index
    %c0_297 = arith.constant 0 : index
    %371 = vector.load %arg8[%c0_296, %c0_297] : memref<16x1xf32, #tpu.memory_space<vmem>>, vector<16x1xf32>
    %372 = vector.broadcast %371 : vector<16x1xf32> to vector<16x256xf32>
    %373 = arith.addf %370, %372 : vector<16x256xf32>
    %cst_298 = arith.constant 2.000000e-01 : f32
    %374 = vector.broadcast %cst_298 : f32 to vector<16x256xf32>
    %375 = arith.mulf %374, %373 : vector<16x256xf32>
    %376 = arith.maximumf %373, %375 : vector<16x256xf32>
    %c0_299 = arith.constant 0 : index
    %c256_300 = arith.constant 256 : index
    %377 = vector.load %arg12[%c0_299, %c256_300] : memref<16x768xf32, #tpu.memory_space<vmem>>, vector<16x256xf32>
    tpu.vector_store %arg12[%c0_299, %c256_300], %376 {strides = array<i32>} : memref<16x768xf32, #tpu.memory_space<vmem>>, vector<16x256xf32>,
    %378 = arith.truncf %376 : vector<16x256xf32> to vector<16x256xbf16>
    %c0_301 = arith.constant 0 : index
    %c239_302 = arith.constant 239 : index
    %379 = vector.load %arg12[%c0_301, %c239_302] : memref<16x768xf32, #tpu.memory_space<vmem>>, vector<16x256xf32>
    %c0_303 = arith.constant 0 : index
    %c0_304 = arith.constant 0 : index
    %380 = vector.load %arg2[%c0_303, %c0_304] : memref<18x256xf32, #tpu.memory_space<vmem>>, vector<1x256xf32>
    %381 = vector.broadcast %380 : vector<1x256xf32> to vector<16x256xf32>
    %382 = arith.mulf %379, %381 : vector<16x256xf32>
    %383 = arith.truncf %382 : vector<16x256xf32> to vector<16x256xbf16>
    %c0_305 = arith.constant 0 : index
    %c0_306 = arith.constant 0 : index
    %c0_307 = arith.constant 0 : index
    %384 = vector.load %arg9[%c0_305, %c0_306, %c0_307] : memref<9x16x16xbf16, #tpu.memory_space<vmem>>, vector<1x16x16xbf16>
    %385 = vector.shape_cast %384 : vector<1x16x16xbf16> to vector<16x16xbf16>
    %cst_308 = arith.constant dense<0.000000e+00> : vector<16x256xf32>
    %386 = tpu.matmul %385, %383, %cst_308 {dimension_numbers = #tpu.dot_dimension_numbers<[1], [0], [0], [1], [0, 0, 1, 1], [], []>} : vector<16x16xbf16>, vector<16x256xbf16>, vector<16x256xf32> -> vector<16x256xf32>
    %c0_309 = arith.constant 0 : index
    %c240_310 = arith.constant 240 : index
    %387 = vector.load %arg12[%c0_309, %c240_310] : memref<16x768xf32, #tpu.memory_space<vmem>>, vector<16x256xf32>
    %388 = arith.truncf %387 : vector<16x256xf32> to vector<16x256xbf16>
    %c1_311 = arith.constant 1 : index
    %c0_312 = arith.constant 0 : index
    %c0_313 = arith.constant 0 : index
    %389 = vector.load %arg9[%c1_311, %c0_312, %c0_313] : memref<9x16x16xbf16, #tpu.memory_space<vmem>>, vector<1x16x16xbf16>
    %390 = vector.shape_cast %389 : vector<1x16x16xbf16> to vector<16x16xbf16>
    %cst_314 = arith.constant dense<0.000000e+00> : vector<16x256xf32>
    %391 = tpu.matmul %390, %388, %cst_314 {dimension_numbers = #tpu.dot_dimension_numbers<[1], [0], [0], [1], [0, 0, 1, 1], [], []>} : vector<16x16xbf16>, vector<16x256xbf16>, vector<16x256xf32> -> vector<16x256xf32>
    %392 = arith.addf %386, %391 : vector<16x256xf32>
    %c0_315 = arith.constant 0 : index
    %c241_316 = arith.constant 241 : index
    %393 = vector.load %arg12[%c0_315, %c241_316] : memref<16x768xf32, #tpu.memory_space<vmem>>, vector<16x256xf32>
    %c1_317 = arith.constant 1 : index
    %c0_318 = arith.constant 0 : index
    %394 = vector.load %arg2[%c1_317, %c0_318] : memref<18x256xf32, #tpu.memory_space<vmem>>, vector<1x256xf32>
    %395 = vector.broadcast %394 : vector<1x256xf32> to vector<16x256xf32>
    %396 = arith.mulf %393, %395 : vector<16x256xf32>
    %397 = arith.truncf %396 : vector<16x256xf32> to vector<16x256xbf16>
    %c2_319 = arith.constant 2 : index
    %c0_320 = arith.constant 0 : index
    %c0_321 = arith.constant 0 : index
    %398 = vector.load %arg9[%c2_319, %c0_320, %c0_321] : memref<9x16x16xbf16, #tpu.memory_space<vmem>>, vector<1x16x16xbf16>
    %399 = vector.shape_cast %398 : vector<1x16x16xbf16> to vector<16x16xbf16>
    %cst_322 = arith.constant dense<0.000000e+00> : vector<16x256xf32>
    %400 = tpu.matmul %399, %397, %cst_322 {dimension_numbers = #tpu.dot_dimension_numbers<[1], [0], [0], [1], [0, 0, 1, 1], [], []>} : vector<16x16xbf16>, vector<16x256xbf16>, vector<16x256xf32> -> vector<16x256xf32>
    %401 = arith.addf %392, %400 : vector<16x256xf32>
    %c0_323 = arith.constant 0 : index
    %c255_324 = arith.constant 255 : index
    %402 = vector.load %arg12[%c0_323, %c255_324] : memref<16x768xf32, #tpu.memory_space<vmem>>, vector<16x256xf32>
    %c2_325 = arith.constant 2 : index
    %c0_326 = arith.constant 0 : index
    %403 = vector.load %arg2[%c2_325, %c0_326] : memref<18x256xf32, #tpu.memory_space<vmem>>, vector<1x256xf32>
    %404 = vector.broadcast %403 : vector<1x256xf32> to vector<16x256xf32>
    %405 = arith.mulf %402, %404 : vector<16x256xf32>
    %406 = arith.truncf %405 : vector<16x256xf32> to vector<16x256xbf16>
    %c3_327 = arith.constant 3 : index
    %c0_328 = arith.constant 0 : index
    %c0_329 = arith.constant 0 : index
    %407 = vector.load %arg9[%c3_327, %c0_328, %c0_329] : memref<9x16x16xbf16, #tpu.memory_space<vmem>>, vector<1x16x16xbf16>
    %408 = vector.shape_cast %407 : vector<1x16x16xbf16> to vector<16x16xbf16>
    %cst_330 = arith.constant dense<0.000000e+00> : vector<16x256xf32>
    %409 = tpu.matmul %408, %406, %cst_330 {dimension_numbers = #tpu.dot_dimension_numbers<[1], [0], [0], [1], [0, 0, 1, 1], [], []>} : vector<16x16xbf16>, vector<16x256xbf16>, vector<16x256xf32> -> vector<16x256xf32>
    %410 = arith.addf %401, %409 : vector<16x256xf32>
    %c4_331 = arith.constant 4 : index
    %c0_332 = arith.constant 0 : index
    %c0_333 = arith.constant 0 : index
    %411 = vector.load %arg9[%c4_331, %c0_332, %c0_333] : memref<9x16x16xbf16, #tpu.memory_space<vmem>>, vector<1x16x16xbf16>
    %412 = vector.shape_cast %411 : vector<1x16x16xbf16> to vector<16x16xbf16>
    %cst_334 = arith.constant dense<0.000000e+00> : vector<16x256xf32>
    %413 = tpu.matmul %412, %378, %cst_334 {dimension_numbers = #tpu.dot_dimension_numbers<[1], [0], [0], [1], [0, 0, 1, 1], [], []>} : vector<16x16xbf16>, vector<16x256xbf16>, vector<16x256xf32> -> vector<16x256xf32>
    %414 = arith.addf %410, %413 : vector<16x256xf32>
    %c0_335 = arith.constant 0 : index
    %c257_336 = arith.constant 257 : index
    %415 = vector.load %arg12[%c0_335, %c257_336] : memref<16x768xf32, #tpu.memory_space<vmem>>, vector<16x256xf32>
    %c3_337 = arith.constant 3 : index
    %c0_338 = arith.constant 0 : index
    %416 = vector.load %arg2[%c3_337, %c0_338] : memref<18x256xf32, #tpu.memory_space<vmem>>, vector<1x256xf32>
    %417 = vector.broadcast %416 : vector<1x256xf32> to vector<16x256xf32>
    %418 = arith.mulf %415, %417 : vector<16x256xf32>
    %419 = arith.truncf %418 : vector<16x256xf32> to vector<16x256xbf16>
    %c5_339 = arith.constant 5 : index
    %c0_340 = arith.constant 0 : index
    %c0_341 = arith.constant 0 : index
    %420 = vector.load %arg9[%c5_339, %c0_340, %c0_341] : memref<9x16x16xbf16, #tpu.memory_space<vmem>>, vector<1x16x16xbf16>
    %421 = vector.shape_cast %420 : vector<1x16x16xbf16> to vector<16x16xbf16>
    %cst_342 = arith.constant dense<0.000000e+00> : vector<16x256xf32>
    %422 = tpu.matmul %421, %419, %cst_342 {dimension_numbers = #tpu.dot_dimension_numbers<[1], [0], [0], [1], [0, 0, 1, 1], [], []>} : vector<16x16xbf16>, vector<16x256xbf16>, vector<16x256xf32> -> vector<16x256xf32>
    %423 = arith.addf %414, %422 : vector<16x256xf32>
    %c0_343 = arith.constant 0 : index
    %c271_344 = arith.constant 271 : index
    %424 = vector.load %arg12[%c0_343, %c271_344] : memref<16x768xf32, #tpu.memory_space<vmem>>, vector<16x256xf32>
    %c4_345 = arith.constant 4 : index
    %c0_346 = arith.constant 0 : index
    %425 = vector.load %arg2[%c4_345, %c0_346] : memref<18x256xf32, #tpu.memory_space<vmem>>, vector<1x256xf32>
    %426 = vector.broadcast %425 : vector<1x256xf32> to vector<16x256xf32>
    %427 = arith.mulf %424, %426 : vector<16x256xf32>
    %428 = arith.truncf %427 : vector<16x256xf32> to vector<16x256xbf16>
    %c6_347 = arith.constant 6 : index
    %c0_348 = arith.constant 0 : index
    %c0_349 = arith.constant 0 : index
    %429 = vector.load %arg9[%c6_347, %c0_348, %c0_349] : memref<9x16x16xbf16, #tpu.memory_space<vmem>>, vector<1x16x16xbf16>
    %430 = vector.shape_cast %429 : vector<1x16x16xbf16> to vector<16x16xbf16>
    %cst_350 = arith.constant dense<0.000000e+00> : vector<16x256xf32>
    %431 = tpu.matmul %430, %428, %cst_350 {dimension_numbers = #tpu.dot_dimension_numbers<[1], [0], [0], [1], [0, 0, 1, 1], [], []>} : vector<16x16xbf16>, vector<16x256xbf16>, vector<16x256xf32> -> vector<16x256xf32>
    %432 = arith.addf %423, %431 : vector<16x256xf32>
    %c0_351 = arith.constant 0 : index
    %c272_352 = arith.constant 272 : index
    %433 = vector.load %arg12[%c0_351, %c272_352] : memref<16x768xf32, #tpu.memory_space<vmem>>, vector<16x256xf32>
    %434 = arith.truncf %433 : vector<16x256xf32> to vector<16x256xbf16>
    %c7_353 = arith.constant 7 : index
    %c0_354 = arith.constant 0 : index
    %c0_355 = arith.constant 0 : index
    %435 = vector.load %arg9[%c7_353, %c0_354, %c0_355] : memref<9x16x16xbf16, #tpu.memory_space<vmem>>, vector<1x16x16xbf16>
    %436 = vector.shape_cast %435 : vector<1x16x16xbf16> to vector<16x16xbf16>
    %cst_356 = arith.constant dense<0.000000e+00> : vector<16x256xf32>
    %437 = tpu.matmul %436, %434, %cst_356 {dimension_numbers = #tpu.dot_dimension_numbers<[1], [0], [0], [1], [0, 0, 1, 1], [], []>} : vector<16x16xbf16>, vector<16x256xbf16>, vector<16x256xf32> -> vector<16x256xf32>
    %438 = arith.addf %432, %437 : vector<16x256xf32>
    %c0_357 = arith.constant 0 : index
    %c273_358 = arith.constant 273 : index
    %439 = vector.load %arg12[%c0_357, %c273_358] : memref<16x768xf32, #tpu.memory_space<vmem>>, vector<16x256xf32>
    %c5_359 = arith.constant 5 : index
    %c0_360 = arith.constant 0 : index
    %440 = vector.load %arg2[%c5_359, %c0_360] : memref<18x256xf32, #tpu.memory_space<vmem>>, vector<1x256xf32>
    %441 = vector.broadcast %440 : vector<1x256xf32> to vector<16x256xf32>
    %442 = arith.mulf %439, %441 : vector<16x256xf32>
    %443 = arith.truncf %442 : vector<16x256xf32> to vector<16x256xbf16>
    %c8_361 = arith.constant 8 : index
    %c0_362 = arith.constant 0 : index
    %c0_363 = arith.constant 0 : index
    %444 = vector.load %arg9[%c8_361, %c0_362, %c0_363] : memref<9x16x16xbf16, #tpu.memory_space<vmem>>, vector<1x16x16xbf16>
    %445 = vector.shape_cast %444 : vector<1x16x16xbf16> to vector<16x16xbf16>
    %cst_364 = arith.constant dense<0.000000e+00> : vector<16x256xf32>
    %446 = tpu.matmul %445, %443, %cst_364 {dimension_numbers = #tpu.dot_dimension_numbers<[1], [0], [0], [1], [0, 0, 1, 1], [], []>} : vector<16x16xbf16>, vector<16x256xbf16>, vector<16x256xf32> -> vector<16x256xf32>
    %447 = arith.addf %438, %446 : vector<16x256xf32>
    %c0_365 = arith.constant 0 : index
    %c0_366 = arith.constant 0 : index
    %448 = vector.load %arg10[%c0_365, %c0_366] : memref<16x1xf32, #tpu.memory_space<vmem>>, vector<16x1xf32>
    %449 = vector.broadcast %448 : vector<16x1xf32> to vector<16x256xf32>
    %450 = arith.addf %447, %449 : vector<16x256xf32>
    %451 = vector.extract_strided_slice %450 {offsets = [0, 0], sizes = [1, 256], strides = [1, 1]} : vector<16x256xf32> to vector<1x256xf32>
    %c0_367 = arith.constant 0 : index
    %c0_368 = arith.constant 0 : index
    %c0_369 = arith.constant 0 : index
    %452 = vector.load %arg11[%c0_367, %c0_368, %c0_369] : memref<1x1x256xf32, #tpu.memory_space<vmem>>, vector<1x1x256xf32>
    %453 = vector.shape_cast %452 : vector<1x1x256xf32> to vector<1x256xf32>
    %454 = vector.shape_cast %451 : vector<1x256xf32> to vector<1x1x256xf32>
    tpu.vector_store %arg11[%c0_367, %c0_368, %c0_369], %454 {strides = array<i32>} : memref<1x1x256xf32, #tpu.memory_space<vmem>>, vector<1x1x256xf32>,
    return
  }
  func.func @transform_0(%arg0: i32) -> (i32, i32, i32) {
    %c0_i32 = arith.constant 0 : i32
    %c0_i32_0 = arith.constant 0 : i32
    %c0_i32_1 = arith.constant 0 : i32
    return %arg0, %c0_i32, %c0_i32_0 : i32, i32, i32
  }
  func.func @transform_1(%arg0: i32) -> (i32, i32) {
    %c0_i32 = arith.constant 0 : i32
    %c0_i32_0 = arith.constant 0 : i32
    %c0_i32_1 = arith.constant 0 : i32
    return %c0_i32, %c0_i32_0 : i32, i32
  }
  func.func @transform_2(%arg0: i32) -> (i32, i32, i32) {
    %c0_i32 = arith.constant 0 : i32
    %c0_i32_0 = arith.constant 0 : i32
    %c0_i32_1 = arith.constant 0 : i32
    %c0_i32_2 = arith.constant 0 : i32
    return %c0_i32, %c0_i32_0, %c0_i32_1 : i32, i32, i32
  }
  func.func @transform_3(%arg0: i32) -> (i32, i32) {
    %c0_i32 = arith.constant 0 : i32
    %c0_i32_0 = arith.constant 0 : i32
    %c0_i32_1 = arith.constant 0 : i32
    return %c0_i32, %c0_i32_0 : i32, i32
  }
  func.func @transform_4(%arg0: i32) -> (i32, i32, i32) {
    %c0_i32 = arith.constant 0 : i32
    %c0_i32_0 = arith.constant 0 : i32
    %c0_i32_1 = arith.constant 0 : i32
    %c0_i32_2 = arith.constant 0 : i32
    return %c0_i32, %c0_i32_0, %c0_i32_1 : i32, i32, i32
  }
  func.func @transform_5(%arg0: i32) -> (i32, i32) {
    %c0_i32 = arith.constant 0 : i32
    %c0_i32_0 = arith.constant 0 : i32
    %c0_i32_1 = arith.constant 0 : i32
    return %c0_i32, %c0_i32_0 : i32, i32
  }
  func.func @transform_6(%arg0: i32) -> (i32, i32, i32) {
    %c0_i32 = arith.constant 0 : i32
    %c0_i32_0 = arith.constant 0 : i32
    %c0_i32_1 = arith.constant 0 : i32
    %c0_i32_2 = arith.constant 0 : i32
    return %c0_i32, %c0_i32_0, %c0_i32_1 : i32, i32, i32
  }
  func.func @transform_7(%arg0: i32) -> (i32, i32) {
    %c0_i32 = arith.constant 0 : i32
    %c0_i32_0 = arith.constant 0 : i32
    %c0_i32_1 = arith.constant 0 : i32
    return %c0_i32, %c0_i32_0 : i32, i32
  }
  func.func @transform_8(%arg0: i32) -> (i32, i32, i32) {
    %c0_i32 = arith.constant 0 : i32
    %c0_i32_0 = arith.constant 0 : i32
    %c0_i32_1 = arith.constant 0 : i32
    %c0_i32_2 = arith.constant 0 : i32
    return %c0_i32, %c0_i32_0, %c0_i32_1 : i32, i32, i32
  }
  func.func @transform_9(%arg0: i32) -> (i32, i32) {
    %c0_i32 = arith.constant 0 : i32
    %c0_i32_0 = arith.constant 0 : i32
    %c0_i32_1 = arith.constant 0 : i32
    return %c0_i32, %c0_i32_0 : i32, i32
  }
  func.func @transform_10(%arg0: i32) -> (i32, i32, i32) {
    %c0_i32 = arith.constant 0 : i32
    %c0_i32_0 = arith.constant 0 : i32
    %c0_i32_1 = arith.constant 0 : i32
    return %arg0, %c0_i32, %c0_i32_0 : i32, i32, i32
  }
}

</mosaic_0001>

<bundles_post_ra>
// kernel: feat_discriminator.1
= control target key start
LH: loop header
LB: loop body
LE: loop exit
PB: predicated region body
PF: predicated region fallthrough
CT: control target
= control target key end

     0   :  { %s5802_s13 = smov 0   ;;  %s7124_s0 = inlined_call_operand.vmem [shape: f32[2,16,256], index: 0, kind: input, shape index: {}]   ;;  %s7125_s1 = inlined_call_operand.vmem [shape: f32[18,256], index: 1, kind: input, shape index: {}]   ;;  %s7126_s2 = inlined_call_operand.vmem [shape: bf16[18,16,16], index: 2, kind: input, shape index: {}]   ;;  %s7127_s3 = inlined_call_operand.vmem [shape: f32[16,1], index: 3, kind: input, shape index: {}]   ;;  %s7128_s4 = inlined_call_operand.vmem [shape: bf16[18,16,16], index: 4, kind: input, shape index: {}]   ;;  %s7129_s5 = inlined_call_operand.vmem [shape: f32[16,1], index: 5, kind: input, shape index: {}]   ;;  %s7130_s6 = inlined_call_operand.vmem [shape: bf16[9,16,16], index: 6, kind: input, shape index: {}]   ;;  %s7131_s7 = inlined_call_operand.vmem [shape: f32[16,1], index: 7, kind: input, shape index: {}]   ;;  %s7132_s8 = inlined_call_operand.vmem [shape: bf16[9,16,16], index: 8, kind: input, shape index: {}]   ;;  %s7133_s9 = inlined_call_operand.vmem [shape: f32[16,1], index: 9, kind: input, shape index: {}]   ;;  %s7134_s10 = inlined_call_operand.vmem [shape: f32[2,1,256], index: 10, kind: output, shape index: {}]  }
   0x1 LB: > { %s5374_s14 = sadd.s32 4294967295, %s5721_s13   ;;  %p5378_p0 = scmp.ge.s32.totalorder %s5721_s13, 1  ;;  %s5721_s13 = sphi %s5802_s13, %s20_s13  }
   0x2   : > { %p312_p1 = scmp.lt.s32.totalorder %s5721_s13, 3 }
   0x4   : > { %p313_p2 = pnand %p5378_p0, %p312_p1 }
   0x5   : > { %s5723_s19 = smov (!%p313_p2), 38   ;;  %s5724_s20 = smov (!%p313_p2), 26  }
   0x6   : > { %316 = sbr.rel (%p313_p2) target bundleno = 1694 (0x69e), region = 60  ;;  %s5725_s27 = smov (!%p313_p2), 122  }
   0x7   : > { %s5726_s30 = smov (!%p313_p2), 6   ;;  %s5727_s15 = smov (!%p313_p2), 90  }
   0x8   : > { %s5728_s18 = smov (!%p313_p2), 102   ;;  %p349_p3 = scmp.lt.s32.totalorder (!%p313_p2), %s5374_s14, 1 }
   0x9   : > { %s5729_s23 = smov (!%p313_p2), 52   ;;  %s5730_s26 = smov (!%p313_p2), 76  }
   0xa   : > { %s5731_s12 = smov (!%p313_p2), 116   ;;  %s5732_s22 = smov (!%p313_p2), 12  }
   0xb   : > { %v386_v0 = vlaneseq  ;;  %v5389_v2 = vld [vmem:[%s7125_s1 + $0x7] ss:$8 sm:$0x3]  ;;  %v5382_v3 = vld [vmem:[%s7125_s1 + $0x6] ss:$8 sm:$0x3] }
   0xc   : > { %v5394_v10 = vld [vmem:[%s7125_s1 + $0x10] ss:$8 sm:$0x3]  ;;  %v5403_v13 = vld [vmem:[%s7125_s1 + $0x11] ss:$8 sm:$0x3] }
   0xd   : > { %v5811_v1 = vshrl.u32 %v386_v0, 7  ;;  %v5408_v14 = vld [vmem:[%s7125_s1 + $0x12] ss:$8 sm:$0x3]  ;;  %s7145_s14 = smov (!%p349_p3, %s5374_s14), 1  ;;  %v5734_v45 = vmov 0.0|0.0  }
   0xe   : > { %v5417_v17 = vld [vmem:[%s7125_s1 + $0x13] ss:$8 sm:$0x3]  ;;  %v5422_v20 = vld [vmem:[%s7125_s1 + $0x14] ss:$8 sm:$0x3] }
   0xf   : > { %v5820_v4 = vsub.s32 0, %v5811_v1  ;;  %v5823_v5 = vsub.s32 1, %v5811_v1  ;;  %v5431_v23 = vld [vmem:[%s7125_s1 + $0x15] ss:$8 sm:$0x3]  ;;  %s5626_s28 = sshll.u32 %s7145_s14, 5 }
  0x10   : > { %v5436_v26 = vld [vmem:[%s7125_s1 + $0x16] ss:$8 sm:$0x3]  ;;  %v5445_v29 = vld [vmem:[%s7125_s1 + $0x17] ss:$8 sm:$0x3]  ;;  %s353_s21 = scalar_lea.vmem %s7124_s0, %s5626_s28 }
  0x11   : > { %v557_v6 = vrot.slane %v5389_v2, %v5820_v4  ;;  %v389_v7 = vrot.slane %v5382_v3, %v5820_v4  ;;  %v561_v8 = vrot.slane %v5389_v2, %v5823_v5  ;;  %v393_v9 = vrot.slane %v5382_v3, %v5823_v5  ;;  %v5450_v32 = vld [vmem:[%s7125_s1 + $0x20] ss:$8 sm:$0x3]  ;;  %v5902_v36 = vld [vmem:[%s353_s21 + $0x10] sm:$0xff]  ;;  %v5906_v38 = vld [vmem:[%s353_s21 + $0x18] sm:$0xff]  ;;  %s7139_s28 = smov 96  }
  0x12   : > { %v662_v11 = vrot.slane %v5394_v10, %v5823_v5  ;;  %v658_v12 = vrot.slane %v5394_v10, %v5820_v4  ;;  %v827_v15 = vrot.slane %v5403_v13, %v5823_v5  ;;  %v823_v16 = vrot.slane %v5403_v13, %v5820_v4  ;;  %v5900_v35 = vld [vmem:[%s353_s21] sm:$0xff]  ;;  %v5904_v37 = vld [vmem:[%s353_s21 + $0x8] sm:$0xff]  ;;  %s7137_s29 = smov 32   ;;  %s7135_s11 = smov 64  }
  0x13   : > { %562 = vrot.lane.b32.xlu1 %v557_v6, %s5723_s19  ;;  %394 = vrot.lane.b32.xlu0 %v389_v7, %s5724_s20  ;;  %v928_v18 = vrot.slane %v5408_v14, %v5823_v5  ;;  %v924_v19 = vrot.slane %v5408_v14, %v5820_v4  ;;  %v1104_v21 = vrot.slane %v5417_v17, %v5823_v5  ;;  %v5459_v41 = vld [vmem:[%s7125_s1 + $0x21] ss:$8 sm:$0x3]  ;;  %v5736_v63 = vmov 0   ;;  %s7141_s16 = smov 96   ;;  %s5739_s25 = smov 113  }
  0x14   : > { %v1100_v22 = vrot.slane %v5417_v17, %v5820_v4  ;;  %v1211_v24 = vrot.slane %v5422_v20, %v5823_v5  ;;  %v1207_v25 = vrot.slane %v5422_v20, %v5820_v4  ;;  %v1383_v27 = vrot.slane %v5431_v23, %v5820_v4  ;;  %475 = vmatprep.mubr.bf16.mxu0 %v5736_v63  ;;  %s5740_s21 = smov 127  }
  0x15   : > { %v1387_v28 = vrot.slane %v5431_v23, %v5823_v5  ;;  %v1488_v30 = vrot.slane %v5436_v26, %v5823_v5  ;;  %v1484_v31 = vrot.slane %v5436_v26, %v5820_v4  ;;  %v1643_v33 = vrot.slane %v5445_v29, %v5820_v4  ;;  %540 = vmatprep.mubr.bf16.mxu1 %v5736_v63 }
  0x16   : > { %v1647_v34 = vrot.slane %v5445_v29, %v5823_v5  ;;  %v1750_v39 = vrot.slane %v5450_v32, %v5820_v4  ;;  %v1754_v40 = vrot.slane %v5450_v32, %v5823_v5  ;;  %v5919_v42 = vpack.c.bf16 %v5902_v36, %v5900_v35  ;;  %5660 = vset.pattern.permute.xlu1 %v5736_v63 }
  0x17   : > { %564 = vrot.lane.b32.xlu1 %v561_v8, %s5723_s19  ;;  %396 = vrot.lane.b32.xlu0 %v393_v9, %s5724_s20  ;;  %v5923_v43 = vpack.c.bf16 %v5906_v38, %v5904_v37  ;;  %v1927_v44 = vrot.slane %v5459_v41, %v5823_v5  ;;  %v1923_v46 = vrot.slane %v5459_v41, %v5820_v4  ;;  %vm398_vm0 = vcmask 211968  }
  0x18   : > { %5659 = vset.pattern.permute.xlu0 %v5736_v63  ;;  %vm566_vm1 = vcmask 310272   ;;  %vm667_vm2 = vcmask 998400   ;;  %vm698_vm3 = vcmask 48128   ;;  %vm597_vm4 = vcmask 736256  }
  0x19   : > { %vm434_vm5 = vcmask 785408   ;;  %vm500_vm6 = vcmask 834560   ;;  %vm1216_vm7 = vcmask 424960   ;;  %vm439_vm8 = vcmask 130048  }
  0x1a   : > { %vm1247_vm9 = vcmask 621568   ;;  %vm1493_vm10 = vcmask 949248   ;;  %vm1524_vm11 = vcmask 97280   ;;  %vm1039_vm12 = vcmask 261120  }
  0x1b   : > { %665 = vrot.lane.b32.xlu1 %v662_v11, %s5725_s27  ;;  %663 = vrot.lane.b32.xlu0 %v658_v12, %s5725_s27  ;;  %vm1322_vm13 = vcmask 523264   ;;  %vm3866_vm14 = vcmask 924672   ;;  %vm3699_vm15 = vcmask 908288  }
  0x1f   : > { %830 = vrot.lane.b32.xlu1 %v827_v15, %s5726_s30  ;;  %828 = vrot.lane.b32.xlu0 %v823_v16, %s5726_s30 }
  0x23   : > { %931 = vrot.lane.b32.xlu1 %v928_v18, %s5727_s15  ;;  %929 = vrot.lane.b32.xlu0 %v924_v19, %s5727_s15 }
  0x27   : > { %1107 = vrot.lane.b32.xlu1 %v1104_v21, %s5728_s18  ;;  %1105 = vrot.lane.b32.xlu0 %v1100_v22, %s5728_s18 }
  0x2b   : > { %1214 = vrot.lane.b32.xlu1 %v1211_v24, %s5729_s23  ;;  %1212 = vrot.lane.b32.xlu0 %v1207_v25, %s5729_s23 }
  0x2f   : > { %1388 = vrot.lane.b32.xlu0 %v1383_v27, %s5730_s26  ;;  %1390 = vrot.lane.b32.xlu1 %v1387_v28, %s5730_s26 }
  0x33   : > { %1491 = vrot.lane.b32.xlu1 %v1488_v30, %s5731_s12  ;;  %1489 = vrot.lane.b32.xlu0 %v1484_v31, %s5731_s12 }
  0x37   : > { %1648 = vrot.lane.b32.xlu0 %v1643_v33, %s5732_s22  ;;  %1650 = vrot.lane.b32.xlu1 %v1647_v34, %s5732_s22 }
  0x3b   : > { %1755 = vrot.lane.b32.xlu0 %v1750_v39, %s5729_s23  ;;  %1757 = vrot.lane.b32.xlu1 %v1754_v40, %s5729_s23 }
  0x3f   : > { %430 = vrot.lane.b32.xlu0 %v5919_v42, %s7139_s28  ;;  %432 = vrot.lane.b32.xlu1 %v5923_v43, %s7139_s28 }
  0x43   : > { %428 = vrot.lane.b32.xlu0 %v5734_v45, %s7139_s28  ;;  %1930 = vrot.lane.b32.xlu1 %v1927_v44, %s5730_s26 }
  0x47   : > { %1928 = vrot.lane.b32.xlu0 %v1923_v46, %s5730_s26 }
  0x4b   : > { %1035 = vrot.lane.b32.xlu0 %v5923_v43, %s7137_s29 }
  0x85   : > { %v563_v47 = vpop.permute.xlu1 %562  ;;  %v395_v48 = vpop.permute.xlu0 %394 }
  0x86   : > { %v403_v49 = vmul.f32 0.0, %v395_v48  ;;  %v571_v58 = vmul.f32 0.0, %v563_v47 }
  0x88   : > { %v409_v50 = vpack.c.bf16 %v403_v49, %v403_v49  ;;  %v577_v9 = vpack.c.bf16 %v571_v58, %v571_v58 }
  0x89   : > { %v565_v51 = vpop.permute.xlu1 %564  ;;  %v397_v52 = vpop.permute.xlu0 %396 }
  0x8a   : > { %v573_v53 = vmul.f32 %v565_v51, %v5904_v37  ;;  %v576_v54 = vmul.f32 %v565_v51, %v5906_v38  ;;  %494 = vrot.lane.b32.xlu1 %v409_v50, %s5728_s18  ;;  %v405_v55 = vmul.f32 %v397_v52, %v5904_v37  ;;  %v408_v56 = vmul.f32 %v397_v52, %v5906_v38 }
  0x8b   : > { %v399_v12 = vsel %vm398_vm0, %v395_v48, %v397_v52  ;;  %v567_v27 = vsel %vm566_vm1, %v563_v47, %v565_v51 }
  0x8c   : > { %v579_v57 = vpack.c.bf16 %v576_v54, %v573_v53  ;;  %v411_v61 = vpack.c.bf16 %v408_v56, %v405_v55  ;;  %v404_v22 = vmul.f32 %v399_v12, %v5900_v35  ;;  %v407_v23 = vmul.f32 %v399_v12, %v5902_v36 }
  0x8d   : > { %v666_v59 = vpop.permute.xlu1 %665  ;;  %v664_v60 = vpop.permute.xlu0 %663  ;;  %v572_v31 = vmul.f32 %v567_v27, %v5900_v35  ;;  %v575_v32 = vmul.f32 %v567_v27, %v5902_v36 }
  0x8e   : > { %v672_v62 = vmul.f32 0.0, %v664_v60  ;;  %595 = vrot.lane.b32.xlu1 %v579_v57, %s5727_s15  ;;  %498 = vrot.lane.b32.xlu0 %v411_v61, %s5728_s18  ;;  %v674_v3 = vmul.f32 %v666_v59, %v5904_v37  ;;  %v677_v6 = vmul.f32 %v666_v59, %v5906_v38  ;;  %v410_v29 = vpack.c.bf16 %v407_v23, %v404_v22 }
  0x8f   : > { %v668_v30 = vsel %vm667_vm2, %v664_v60, %v666_v59  ;;  %v578_v41 = vpack.c.bf16 %v575_v32, %v572_v31 }
  0x90   : > { %v678_v2 = vpack.c.bf16 %v672_v62, %v672_v62  ;;  %v680_v17 = vpack.c.bf16 %v677_v6, %v674_v3  ;;  %v673_v39 = vmul.f32 %v668_v30, %v5900_v35  ;;  %v676_v40 = vmul.f32 %v668_v30, %v5902_v36 }
  0x91   : > { %v831_v7 = vpop.permute.xlu1 %830  ;;  %v829_v8 = vpop.permute.xlu0 %828 }
  0x92   : > { %v839_v10 = vmul.f32 0.0, %v831_v7  ;;  %692 = vrot.lane.b32.xlu1 %v678_v2, %s5726_s30  ;;  %591 = vrot.lane.b32.xlu0 %v577_v9, %s5727_s15  ;;  %v837_v13 = vmul.f32 %v829_v8, %v5900_v35  ;;  %v840_v14 = vmul.f32 %v829_v8, %v5902_v36  ;;  %v679_v50 = vpack.c.bf16 %v676_v40, %v673_v39 }
  0x93   : > { %v833_v53 = vsel %vm698_vm3, %v829_v8, %v831_v7 }
  0x94   : > { %v845_v11 = vpack.c.bf16 %v839_v10, %v839_v10  ;;  %v843_v24 = vpack.c.bf16 %v840_v14, %v837_v13  ;;  %v838_v58 = vmul.f32 %v833_v53, %v5904_v37  ;;  %v841_v59 = vmul.f32 %v833_v53, %v5906_v38 }
  0x95   : > { %v932_v15 = vpop.permute.xlu1 %931  ;;  %v930_v16 = vpop.permute.xlu0 %929 }
  0x96   : > { %v938_v18 = vmul.f32 %v930_v16, %v5900_v35  ;;  %v941_v19 = vmul.f32 %v930_v16, %v5902_v36  ;;  %861 = vrot.lane.b32.xlu1 %v845_v11, %s5725_s27  ;;  %v940_v20 = vmul.f32 0.0, %v932_v15  ;;  %696 = vrot.lane.b32.xlu0 %v680_v17, %s5726_s30  ;;  %v934_v3 = vsel %vm597_vm4, %v930_v16, %v932_v15 }
  0x97   : > { %v844_v6 = vpack.c.bf16 %v841_v59, %v838_v58  ;;  %v939_v10 = vmul.f32 %v934_v3, %v5904_v37  ;;  %v942_v11 = vmul.f32 %v934_v3, %v5906_v38 }
  0x98   : > { %v944_v21 = vpack.c.bf16 %v941_v19, %v938_v18  ;;  %v946_v28 = vpack.c.bf16 %v940_v20, %v940_v20 }
  0x99   : > { %v5961_v25 = vpop.permute.xlu1 %1107  ;;  %v5963_v26 = vpop.permute.xlu0 %1105  ;;  %v945_v16 = vpack.c.bf16 %v942_v11, %v939_v10 }
  0x9a   : > { %958 = vrot.lane.b32.xlu1 %v944_v21, %s5723_s19  ;;  %857 = vrot.lane.b32.xlu0 %v843_v24, %s5725_s27  ;;  %v1114_v47 = vmul.f32 %v5963_v26, %v5900_v35  ;;  %v1117_v48 = vmul.f32 %v5963_v26, %v5902_v36  ;;  %v1116_v49 = vmul.f32 0.0, %v5961_v25  ;;  %v1110_v17 = vsel %vm500_vm6, %v5963_v26, %v5961_v25  ;;  %v5661_v21 = vld [vmem:[%s7126_s2 + $0x8] sm:$0xff]  }
  0x9b   : > { %v1115_v23 = vmul.f32 %v1110_v17, %v5904_v37  ;;  %v1118_v24 = vmul.f32 %v1110_v17, %v5906_v38  ;;  %v5464_v17 = vld [vmem:[%s7125_s1 + $0x6] ss:$8 sm:$0x3] }
  0x9c   : > { %v1120_v56 = vpack.c.bf16 %v1117_v48, %v1114_v47  ;;  %v1122_v57 = vpack.c.bf16 %v1116_v49, %v1116_v49 }
  0x9d   : > { %v1215_v33 = vpop.permute.xlu1 %1214  ;;  %v1213_v34 = vpop.permute.xlu0 %1212  ;;  %v1121_v30 = vpack.c.bf16 %v1118_v24, %v1115_v23 }
  0x9e   : > { %496 = vrot.lane.b32.xlu1 %v410_v29, %s5728_s18  ;;  %962 = vrot.lane.b32.xlu0 %v946_v28, %s5723_s19  ;;  %v1223_v54 = vmul.f32 %v1215_v33, %v5900_v35  ;;  %v1226_v55 = vmul.f32 %v1215_v33, %v5902_v36  ;;  %v1221_v2 = vmul.f32 0.0, %v1213_v34  ;;  %v1217_v19 = vsel %vm1216_vm7, %v1213_v34, %v1215_v33 }
  0x9f   : > { %v1222_v25 = vmul.f32 0.0, %v1217_v19  ;;  %v5471_v19 = vld [vmem:[%s7125_s1 + $0x7] ss:$8 sm:$0x3] }
  0xa0   : > { %v1229_v62 = vpack.c.bf16 %v1226_v55, %v1223_v54  ;;  %v1227_v9 = vpack.c.bf16 %v1221_v2, %v1221_v2 }
  0xa1   : > { %v5975_v44 = vpop.permute.xlu0 %1388  ;;  %v5977_v46 = vpop.permute.xlu1 %1390  ;;  %v1228_v31 = vpack.c.bf16 %v1222_v25, %v1222_v25  ;;  %v5485_v25 = vld [vmem:[%s7125_s1 + $0x11] ss:$8 sm:$0x3] }
  0xa2   : > { %1037 = vrot.lane.b32.xlu1 %v5734_v45, %s7137_s29  ;;  %593 = vrot.lane.b32.xlu0 %v578_v41, %s5727_s15  ;;  %v1397_v15 = vmul.f32 0.0, %v5975_v44  ;;  %v1399_v26 = vmul.f32 %v5977_v46, %v5900_v35  ;;  %v1402_v27 = vmul.f32 %v5977_v46, %v5902_v36  ;;  %v1393_v34 = vsel %vm1247_vm9, %v5975_v44, %v5977_v46 }
  0xa3   : > { %v1398_v40 = vmul.f32 0.0, %v1393_v34  ;;  %v5504_v34 = vld [vmem:[%s7125_s1 + $0x14] ss:$8 sm:$0x3] }
  0xa4   : > { %v1403_v22 = vpack.c.bf16 %v1397_v15, %v1397_v15  ;;  %v1405_v33 = vpack.c.bf16 %v1402_v27, %v1399_v26  ;;  %v2484_v26 = vrot.slane %v5485_v25, %v5823_v5  ;;  %v2480_v27 = vrot.slane %v5485_v25, %v5820_v4 }
  0xa5   : > { %v5987_v51 = vpop.permute.xlu1 %1491  ;;  %v5989_v52 = vpop.permute.xlu0 %1489  ;;  %v1404_v46 = vpack.c.bf16 %v1398_v40, %v1398_v40  ;;  %v2858_v40 = vrot.slane %v5504_v34, %v5823_v5 }
  0xa6   : > { %694 = vrot.lane.b32.xlu1 %v679_v50, %s5726_s30  ;;  %1033 = vrot.lane.b32.xlu0 %v5919_v42, %s7137_s29  ;;  %v1500_v28 = vmul.f32 %v5987_v51, %v5904_v37  ;;  %v1503_v29 = vmul.f32 %v5987_v51, %v5906_v38  ;;  %v1498_v32 = vmul.f32 0.0, %v5989_v52  ;;  %v1494_v44 = vsel %vm1493_vm10, %v5989_v52, %v5987_v51  ;;  %s7142_s29 = smov 32  }
  0xa7   : > { %v1499_v55 = vmul.f32 %v1494_v44, %v5900_v35 }
  0xa8   : > { %v1506_v39 = vpack.c.bf16 %v1503_v29, %v1500_v28  ;;  %v1504_v47 = vpack.c.bf16 %v1498_v32, %v1498_v32  ;;  %v5490_v28 = vld [vmem:[%s7125_s1 + $0x12] ss:$8 sm:$0x3] }
  0xa9   : > { %v5999_v60 = vpop.permute.xlu0 %1648  ;;  %v6001_v61 = vpop.permute.xlu1 %1650  ;;  %v2582_v29 = vrot.slane %v5490_v28, %v5823_v5 }
  0xaa   : > { %1134 = vrot.lane.b32.xlu1 %v1120_v56, %s5724_s20  ;;  %1138 = vrot.lane.b32.xlu0 %v1122_v57, %s5724_s20  ;;  %v1659_v41 = vmul.f32 0.0, %v6001_v61  ;;  %v1657_v48 = vmul.f32 %v5999_v60, %v5900_v35  ;;  %v1660_v49 = vmul.f32 %v5999_v60, %v5902_v36  ;;  %v1502_v56 = vmul.f32 %v1494_v44, %v5902_v36 }
  0xab   : > { %v1653_v57 = vsel %vm1524_vm11, %v5999_v60, %v6001_v61 }
  0xac   : > { %v1665_v50 = vpack.c.bf16 %v1659_v41, %v1659_v41  ;;  %v1663_v54 = vpack.c.bf16 %v1660_v49, %v1657_v48  ;;  %v1505_v59 = vpack.c.bf16 %v1502_v56, %v1499_v55  ;;  %v1658_v35 = vmul.f32 %v1653_v57, %v5904_v37  ;;  %v5513_v48 = vld [vmem:[%s7125_s1 + $0x15] ss:$8 sm:$0x3] }
  0xad   : > { %v6006_v7 = vpop.permute.xlu0 %1755  ;;  %v6008_v8 = vpop.permute.xlu1 %1757  ;;  %v1661_v36 = vmul.f32 %v1653_v57, %v5906_v38  ;;  %v3030_v49 = vrot.slane %v5513_v48, %v5823_v5 }
  0xae   : > { %1245 = vrot.lane.b32.xlu1 %v1229_v62, %s5730_s26  ;;  %859 = vrot.lane.b32.xlu0 %v844_v6, %s5725_s27  ;;  %v1765_v53 = vmul.f32 0.0, %v6008_v8  ;;  %v1763_v51 = vmul.f32 %v6006_v7, %v5904_v37  ;;  %v1766_v52 = vmul.f32 %v6006_v7, %v5906_v38  ;;  %v1759_v60 = vsel %vm1216_vm7, %v6006_v7, %v6008_v8 }
  0xaf   : > { %v1764_v62 = vmul.f32 0.0, %v1759_v60  ;;  %v1664_v6 = vpack.c.bf16 %v1661_v36, %v1658_v35  ;;  %v6176_v36 = vld [vmem:[%s7125_s1 + $0x20] ss:$8 sm:$0x3] }
  0xb0   : > { %v1771_v58 = vpack.c.bf16 %v1765_v53, %v1765_v53  ;;  %v1769_v61 = vpack.c.bf16 %v1766_v52, %v1763_v51  ;;  %v5518_v53 = vld [vmem:[%s7125_s1 + $0x16] ss:$8 sm:$0x3]  ;;  %v5527_v51 = vld [vmem:[%s7125_s1 + $0x17] ss:$8 sm:$0x3] }
  0xb1   : > { %v431_v12 = vpop.permute.xlu0 %430  ;;  %v433_v13 = vpop.permute.xlu1 %432  ;;  %v1770_v10 = vpack.c.bf16 %v1764_v62, %v1764_v62  ;;  %v3124_v57 = vrot.slane %v5518_v53, %v5820_v4  ;;  %v3284_v52 = vrot.slane %v5527_v51, %v5823_v5  ;;  %v3280_v35 = vrot.slane %v5527_v51, %v5820_v4 }
  0xb2   : > { %1318 = vrot.lane.b32.xlu1 %v5734_v45, %s7135_s11  ;;  %v436_v14 = vsel %vm434_vm5, %v431_v12, %v433_v13  ;;  %1241 = vrot.lane.b32.xlu0 %v1227_v9, %s5730_s26  ;;  %v3384_v62 = vrot.slane %v6176_v36, %v5820_v4 }
  0xb3   : > { %457 = vmatprep.subr.bf16.mxu0 %v436_v14 }
  0xb5   : > { %v429_v18 = vpop.permute.xlu0 %428  ;;  %v1931_v2 = vpop.permute.xlu1 %1930 }
  0xb6   : > { %960 = vrot.lane.b32.xlu1 %v945_v16, %s5723_s19  ;;  %v435_v20 = vsel %vm434_vm5, %v429_v18, %v431_v12  ;;  %1320 = vrot.lane.b32.xlu0 %v5919_v42, %s7135_s11  ;;  %v1938_v7 = vmul.f32 0.0, %v1931_v2  ;;  %v2016_v16 = vld [vmem:[%s7127_s3] sm:$0xff]  ;;  %v2057_v18 = vrot.slane %v5464_v17, %v5820_v4 }
  0xb7   : > { %458 = vmatpush1.bf16.msra.mxu0 %v435_v20  ;;  %v2224_v20 = vrot.slane %v5471_v19, %v5823_v5 }
  0xb8   : > { %v1944_v12 = vpack.c.bf16 %v1938_v7, %v1938_v7 }
  0xb9   : > { %v1929_v3 = vpop.permute.xlu0 %1928 }
  0xba   : > { %1316 = vrot.lane.b32.xlu1 %v5734_v45, %s7135_s11  ;;  %5386 = vmatmul.mubr.msk.bf16.vlgmr.msra.gmra.mxu0 %vm439_vm8, %v5661_v21  ;;  %v1932_v9 = vsel %vm1247_vm9, %v1929_v3, %v1931_v2  ;;  %v1936_v13 = vmul.f32 %v1929_v3, %v5904_v37  ;;  %v1939_v14 = vmul.f32 %v1929_v3, %v5906_v38  ;;  %v2017_v37 = vld [vmem:[%s7127_s3 + $0x8] sm:$0xff] }
  0xbb   : > { %1417 = vrot.lane.b32.xlu0 %v1403_v22, %s5729_s23  ;;  %637 = vmatprep.mubr.bf16.mxu0 %v5736_v63  ;;  %v1937_v11 = vmul.f32 0.0, %v1932_v9  ;;  %v2061_v38 = vrot.slane %v5464_v17, %v5823_v5  ;;  %v2220_v21 = vrot.slane %v5471_v19, %v5820_v4  ;;  %v5476_v22 = vld [vmem:[%s7125_s1 + $0x10] ss:$8 sm:$0x3] }
  0xbc   : > { %v1942_v15 = vpack.c.bf16 %v1939_v14, %v1936_v13  ;;  %v2322_v23 = vrot.slane %v5476_v22, %v5823_v5  ;;  %v2318_v24 = vrot.slane %v5476_v22, %v5820_v4 }
  0xbd   : > { %v1943_v8 = vpack.c.bf16 %v1937_v11, %v1937_v11  ;;  %v6193_v11 = vld [vmem:[%s7125_s1 + $0x21] ss:$8 sm:$0x3] }
  0xbe   : > { %1136 = vrot.lane.b32.xlu1 %v1121_v30, %s5724_s20  ;;  %v2578_v30 = vrot.slane %v5490_v28, %v5820_v4  ;;  %v3556_v14 = vrot.slane %v6193_v11, %v5820_v4 }
  0xbf   : > { %1243 = vrot.lane.b32.xlu0 %v1228_v31, %s5730_s26  ;;  %v5499_v31 = vld [vmem:[%s7125_s1 + $0x13] ss:$8 sm:$0x3] }
  0xc0   : > { %v2754_v32 = vrot.slane %v5499_v31, %v5823_v5 }
  0xc2   : > { %1421 = vrot.lane.b32.xlu1 %v1405_v33, %s5729_s23  ;;  %v2750_v33 = vrot.slane %v5499_v31, %v5820_v4 }
  0xc3   : > { %1522 = vrot.lane.b32.xlu0 %v1506_v39, %s5732_s22  ;;  %v6146_v39 = vpop.permute.xlu0 %1035 }
  0xc6   : > { %1518 = vrot.lane.b32.xlu1 %v1504_v47, %s5732_s22  ;;  %v2854_v47 = vrot.slane %v5504_v34, %v5820_v4 }
  0xc7   : > { %1419 = vrot.lane.b32.xlu0 %v1404_v46, %s5729_s23 }
  0xca   : > { %1681 = vrot.lane.b32.xlu1 %v1665_v50, %s5731_s12  ;;  %v3026_v50 = vrot.slane %v5513_v48, %v5820_v4 }
  0xcb   : > { %1677 = vrot.lane.b32.xlu0 %v1663_v54, %s5731_s12  ;;  %v3128_v54 = vrot.slane %v5518_v53, %v5823_v5 }
  0xce   : > { %1520 = vrot.lane.b32.xlu1 %v1505_v59, %s5732_s22 }
  0xcf   : > { %1787 = vrot.lane.b32.xlu0 %v1771_v58, %s5730_s26 }
  0xd2   : > { %1783 = vrot.lane.b32.xlu1 %v1769_v61, %s5730_s26 }
  0xd3   : > { %1679 = vrot.lane.b32.xlu0 %v1664_v6, %s5731_s12 }
  0xd6   : > { %1785 = vrot.lane.b32.xlu1 %v1770_v10, %s5730_s26  ;;  %v5662_v10 = vld [vmem:[%s7126_s2] sm:$0xff]  }
  0xd7   : > { %1859 = vrot.lane.b32.xlu0 %v5734_v45, %s7135_s11 }
  0xda   : > { %1861 = vrot.lane.b32.xlu1 %v5734_v45, %s7135_s11 }
  0xdb   : > { %1857 = vrot.lane.b32.xlu0 %v5923_v43, %s7135_s11 }
  0xde   : > { %1958 = vrot.lane.b32.xlu1 %v1943_v8, %s5729_s23 }
  0xdf   : > { %1960 = vrot.lane.b32.xlu0 %v1944_v12, %s5729_s23 }
  0xe2   : > { %1956 = vrot.lane.b32.xlu1 %v1942_v15, %s5729_s23  ;;  %v5663_v15 = vld [vmem:[%s7126_s2 + $0x10] sm:$0xff]  }
  0xe3   : > { %2020 = vperm.xlu0 %5659, %v2016_v16  }
  0xe6   : > { %2025 = vperm.xlu1 %5660, %v2017_v37  }
  0xe7   : > { %2064 = vrot.lane.b32.xlu0 %v2061_v38, %s5724_s20 }
  0xea   : > { %2062 = vrot.lane.b32.xlu1 %v2057_v18, %s5724_s20  ;;  %v5664_v18 = vld [vmem:[%s7126_s2 + $0x18] sm:$0xff]  }
  0xeb   : > { %2227 = vrot.lane.b32.xlu0 %v2224_v20, %s5723_s19 }
  0xee   : > { %2225 = vrot.lane.b32.xlu1 %v2220_v21, %s5723_s19  ;;  %v5665_v21 = vld [vmem:[%s7126_s2 + $0x20] sm:$0xff]  }
  0xef   : > { %2325 = vrot.lane.b32.xlu0 %v2322_v23, %s5725_s27 }
  0xf2   : > { %2323 = vrot.lane.b32.xlu1 %v2318_v24, %s5725_s27 }
  0xf3   : > { %2487 = vrot.lane.b32.xlu0 %v2484_v26, %s5726_s30  ;;  %v5666_v26 = vld [vmem:[%s7126_s2 + $0x28] sm:$0xff]  }
  0xf6   : > { %2485 = vrot.lane.b32.xlu1 %v2480_v27, %s5726_s30 }
  0xf7   : > { %2585 = vrot.lane.b32.xlu0 %v2582_v29, %s5727_s15 }
  0xfa   : > { %2583 = vrot.lane.b32.xlu1 %v2578_v30, %s5727_s15 }
  0xfb   : > { %2757 = vrot.lane.b32.xlu0 %v2754_v32, %s5728_s18 }
  0xfc   : > { %v495_v41 = vpop.permute.xlu1 %494 }
  0xfe   : > { %2755 = vrot.lane.b32.xlu1 %v2750_v33, %s5728_s18 }
  0xff   : > { %2861 = vrot.lane.b32.xlu0 %v2858_v40, %s5729_s23  ;;  %v5667_v40 = vld [vmem:[%s7126_s2 + $0x30] sm:$0xff]  }
 0x100   : > { %v596_v44 = vpop.permute.xlu1 %595  ;;  %v499_v46 = vpop.permute.xlu0 %498 }
 0x102   : > { %2859 = vrot.lane.b32.xlu1 %v2854_v47, %s5729_s23 }
 0x103   : > { %3033 = vrot.lane.b32.xlu0 %v3030_v49, %s5730_s26 }
 0x104   : > { %v693_v55 = vpop.permute.xlu1 %692  ;;  %v592_v56 = vpop.permute.xlu0 %591 }
 0x106   : > { %3031 = vrot.lane.b32.xlu1 %v3026_v50, %s5730_s26 }
 0x107   : > { %3131 = vrot.lane.b32.xlu0 %v3128_v54, %s5731_s12  ;;  %v5669_v54 = vld [vmem:[%s7126_s2 + $0x40] sm:$0xff]  }
 0x108   : > { %v862_v58 = vpop.permute.xlu1 %861  ;;  %v697_v59 = vpop.permute.xlu0 %696 }
 0x10a   : > { %3129 = vrot.lane.b32.xlu1 %v3124_v57, %s5731_s12 }
 0x10b   : > { %3287 = vrot.lane.b32.xlu0 %v3284_v52, %s5732_s22 }
 0x10c   : > { %v6179_v60 = vpop.permute.xlu1 %958  ;;  %v858_v61 = vpop.permute.xlu0 %857 }
 0x10e   : > { %3285 = vrot.lane.b32.xlu1 %v3280_v35, %s5732_s22 }
 0x110   : > { %v497_v2 = vpop.permute.xlu1 %496  ;;  %v963_v3 = vpop.permute.xlu0 %962 }
 0x111   : > { %v502_v6 = vsel %vm500_vm6, %v497_v2, %v499_v46  ;;  %v501_v9 = vsel %vm500_vm6, %v495_v41, %v497_v2 }
 0x112   : > { %522 = vmatprep.subr.bf16.mxu1 %v502_v6  ;;  %3389 = vrot.lane.b32.xlu1 %v3384_v62, %s5729_s23  ;;  %v5672_v62 = vld [vmem:[%s7126_s2 + $0x58] sm:$0xff]  }
 0x113   : > { %523 = vmatpush1.bf16.msra.mxu1 %v501_v9 }
 0x114   : > { %v1038_v7 = vpop.permute.xlu1 %1037  ;;  %v594_v8 = vpop.permute.xlu0 %593 }
 0x115   : > { %v599_v12 = vsel %vm597_vm4, %v594_v8, %v596_v44  ;;  %v598_v13 = vsel %vm597_vm4, %v592_v56, %v594_v8  ;;  %v1041_v28 = vsel %vm1039_vm12, %v6146_v39, %v1038_v7  ;;  %v5670_v56 = vld [vmem:[%s7126_s2 + $0x48] sm:$0xff]  }
 0x116   : > { %5388 = vmatmul.mubr.msk.bf16.vlgmr.msra.gmra.mxu1 %vm439_vm8, %v5662_v10  ;;  %2095 = vrot.lane.b32.xlu1 %v5734_v45, %s7141_s16  ;;  %v5674_v8 = vld [vmem:[%s7126_s2 + $0x68] sm:$0xff]  }
 0x117   : > { %619 = vmatprep.subr.bf16.mxu0 %v599_v12  ;;  %738 = vmatprep.mubr.bf16.mxu1 %v5736_v63 }
 0x118   : > { %620 = vmatpush1.bf16.msra.mxu0 %v598_v13  ;;  %v695_v16 = vpop.permute.xlu1 %694  ;;  %v1034_v17 = vpop.permute.xlu0 %1033 }
 0x119   : > { %v700_v37 = vsel %vm698_vm3, %v695_v16, %v697_v59  ;;  %v699_v38 = vsel %vm698_vm3, %v693_v55, %v695_v16  ;;  %778 = vmatprep.subr.bf16.mxu0 %v5923_v43  ;;  %v1040_v30 = vsel %vm1039_vm12, %v1034_v17, %v6146_v39  ;;  %v5668_v39 = vld [vmem:[%s7126_s2 + $0x38] sm:$0xff]  }
 0x11a   : > { %720 = vmatprep.subr.bf16.mxu1 %v700_v37  ;;  %3561 = vrot.lane.b32.xlu1 %v3556_v14, %s5730_s26 }
 0x11b   : > { %5393 = vmatmul.mubr.msk.bf16.vlgmr.msra.gmra.mxu0 %vm439_vm8, %v5663_v15  ;;  %721 = vmatpush1.bf16.msra.mxu1 %v699_v38  ;;  %v5675_v38 = vld [vmem:[%s7126_s2 + $0x70] sm:$0xff]  }
 0x11c   : > { %v1135_v19 = vpop.permute.xlu1 %1134  ;;  %779 = vmatpush1.bf16.msra.mxu0 %v5919_v42  ;;  %796 = vmatprep.mubr.bf16.mxu0 %v5736_v63  ;;  %v1139_v20 = vpop.permute.xlu0 %1138 }
 0x11e   : > { %5398 = vmatmul.mubr.msk.bf16.vlgmr.msra.gmra.mxu1 %vm439_vm8, %v5664_v18  ;;  %v5676_v18 = vld [vmem:[%s7126_s2 + $0x78] sm:$0xff]  }
 0x11f   : > { %903 = vmatprep.mubr.bf16.mxu1 %v5736_v63 }
 0x120   : > { %v1246_v22 = vpop.permute.xlu1 %1245  ;;  %v860_v23 = vpop.permute.xlu0 %859 }
 0x121   : > { %v865_v24 = vsel %vm667_vm2, %v860_v23, %v862_v58  ;;  %v864_v25 = vsel %vm667_vm2, %v858_v61, %v860_v23  ;;  %v5671_v61 = vld [vmem:[%s7126_s2 + $0x50] sm:$0xff]  }
 0x122   : > { %885 = vmatprep.subr.bf16.mxu1 %v865_v24 }
 0x123   : > { %5402 = vmatmul.mubr.msk.bf16.vlgmr.msra.gmra.mxu0 %vm439_vm8, %v5665_v21  ;;  %886 = vmatpush1.bf16.msra.mxu1 %v864_v25 }
 0x124   : > { %v1319_v27 = vpop.permute.xlu1 %1318  ;;  %1004 = vmatprep.mubr.bf16.mxu0 %v5736_v63  ;;  %1061 = vmatprep.subr.bf16.mxu1 %v1041_v28  ;;  %v1242_v29 = vpop.permute.xlu0 %1241 }
 0x126   : > { %5407 = vmatmul.mubr.msk.bf16.vlgmr.msra.gmra.mxu1 %vm439_vm8, %v5666_v26  ;;  %v5677_v26 = vld [vmem:[%s7126_s2 + $0x80] sm:$0xff]  }
 0x127   : > { %1062 = vmatpush1.bf16.msra.mxu1 %v1040_v30  ;;  %1079 = vmatprep.mubr.bf16.mxu1 %v5736_v63 }
 0x128   : > { %v961_v31 = vpop.permute.xlu1 %960  ;;  %v1321_v32 = vpop.permute.xlu0 %1320 }
 0x129   : > { %v966_v33 = vsel %vm566_vm1, %v961_v31, %v963_v3  ;;  %v965_v34 = vsel %vm566_vm1, %v6179_v60, %v961_v31  ;;  %v1324_v55 = vsel %vm1322_vm13, %v1319_v27, %v1321_v32  ;;  %v3388_v31 = vrot.slane %v6176_v36, %v5823_v5 }
 0x12a   : > { %986 = vmatprep.subr.bf16.mxu0 %v966_v33 }
 0x12b   : > { %987 = vmatpush1.bf16.msra.mxu0 %v965_v34  ;;  %3391 = vrot.lane.b32.xlu0 %v3388_v31, %s5729_s23 }
 0x12c   : > { %v1317_v41 = vpop.permute.xlu1 %1316 }
 0x12d   : > { %v1418_v47 = vpop.permute.xlu0 %1417  ;;  %v1323_v52 = vsel %vm1322_vm13, %v1317_v41, %v1319_v27 }
 0x12e   : > { %5412 = vmatmul.mubr.msk.bf16.vlgmr.msra.gmra.mxu0 %vm439_vm8, %v5667_v40  ;;  %5416 = vmatmul.mubr.msk.bf16.vlgmr.msra.gmra.mxu1 %vm439_vm8, %v5668_v39 }
 0x12f   : > { %1180 = vmatprep.mubr.bf16.mxu0 %v5736_v63  ;;  %1287 = vmatprep.mubr.bf16.mxu1 %v5736_v63 }
 0x130   : > { %v1137_v48 = vpop.permute.xlu1 %1136 }
 0x131   : > { %v1244_v49 = vpop.permute.xlu0 %1243  ;;  %v1142_v44 = vsel %vm398_vm0, %v1137_v48, %v1139_v20  ;;  %v1141_v46 = vsel %vm398_vm0, %v1135_v19, %v1137_v48 }
 0x132   : > { %1162 = vmatprep.subr.bf16.mxu0 %v1142_v44  ;;  %v1249_v50 = vsel %vm1247_vm9, %v1244_v49, %v1246_v22  ;;  %v1248_v53 = vsel %vm1247_vm9, %v1242_v29, %v1244_v49  ;;  %v5678_v29 = vld [vmem:[%s7126_s2 + $0x88] sm:$0xff]  }
 0x133   : > { %1269 = vmatprep.subr.bf16.mxu1 %v1249_v50  ;;  %1163 = vmatpush1.bf16.msra.mxu0 %v1141_v46 }
 0x134   : > { %1270 = vmatpush1.bf16.msra.mxu1 %v1248_v53  ;;  %v1422_v57 = vpop.permute.xlu1 %1421  ;;  %1344 = vmatprep.subr.bf16.mxu0 %v1324_v55 }
 0x135   : > { %v1523_v51 = vpop.permute.xlu0 %1522 }
 0x136   : > { %5421 = vmatmul.mubr.msk.bf16.vlgmr.msra.gmra.mxu0 %vm439_vm8, %v5669_v54 }
 0x137   : > { %5426 = vmatmul.mubr.msk.bf16.vlgmr.msra.gmra.mxu1 %vm439_vm8, %v5670_v56  ;;  %1345 = vmatpush1.bf16.msra.mxu0 %v1323_v52 }
 0x138   : > { %v1519_v58 = vpop.permute.xlu1 %1518  ;;  %1362 = vmatprep.mubr.bf16.mxu0 %v5736_v63  ;;  %1463 = vmatprep.mubr.bf16.mxu1 %v5736_v63 }
 0x139   : > { %v1420_v59 = vpop.permute.xlu0 %1419 }
 0x13a   : > { %v1425_v35 = vsel %vm1216_vm7, %v1420_v59, %v1422_v57  ;;  %v1424_v60 = vsel %vm1216_vm7, %v1418_v47, %v1420_v59  ;;  %v3560_v47 = vrot.slane %v6193_v11, %v5823_v5 }
 0x13b   : > { %1445 = vmatprep.subr.bf16.mxu1 %v1425_v35 }
 0x13c   : > { %1446 = vmatpush1.bf16.msra.mxu1 %v1424_v60  ;;  %v1682_v2 = vpop.permute.xlu1 %1681 }
 0x13d   : > { %v1678_v3 = vpop.permute.xlu0 %1677  ;;  %1604 = vmatprep.subr.bf16.mxu1 %v5923_v43  ;;  %v5673_v43 = vld [vmem:[%s7126_s2 + $0x60] sm:$0xff]  }
 0x13e   : > { %5430 = vmatmul.mubr.msk.bf16.vlgmr.msra.gmra.mxu0 %vm439_vm8, %v5671_v61 }
 0x13f   : > { %5435 = vmatmul.mubr.msk.bf16.vlgmr.msra.gmra.mxu1 %vm439_vm8, %v5672_v62  ;;  %1564 = vmatprep.mubr.bf16.mxu0 %v5736_v63 }
 0x140   : > { %v1521_v6 = vpop.permute.xlu1 %1520  ;;  %1605 = vmatpush1.bf16.msra.mxu1 %v5919_v42  ;;  %1622 = vmatprep.mubr.bf16.mxu1 %v5736_v63 }
 0x141   : > { %v1788_v9 = vpop.permute.xlu0 %1787  ;;  %v1526_v10 = vsel %vm1524_vm11, %v1521_v6, %v1523_v51  ;;  %v1525_v7 = vsel %vm1524_vm11, %v1519_v58, %v1521_v6 }
 0x142   : > { %1546 = vmatprep.subr.bf16.mxu0 %v1526_v10 }
 0x143   : > { %1547 = vmatpush1.bf16.msra.mxu0 %v1525_v7 }
 0x144   : > { %v1784_v12 = vpop.permute.xlu1 %1783 }
 0x145   : > { %v1680_v13 = vpop.permute.xlu0 %1679 }
 0x146   : > { %5440 = vmatmul.mubr.msk.bf16.vlgmr.msra.gmra.mxu0 %vm439_vm8, %v5673_v43  ;;  %v1685_v42 = vsel %vm1493_vm10, %v1680_v13, %v1682_v2  ;;  %v1684_v14 = vsel %vm1493_vm10, %v1678_v3, %v1680_v13 }
 0x147   : > { %5444 = vmatmul.mubr.msk.bf16.vlgmr.msra.gmra.mxu1 %vm439_vm8, %v5674_v8  ;;  %1705 = vmatprep.subr.bf16.mxu0 %v1685_v42 }
 0x148   : > { %1706 = vmatpush1.bf16.msra.mxu0 %v1684_v14  ;;  %v1786_v15 = vpop.permute.xlu1 %1785  ;;  %1723 = vmatprep.mubr.bf16.mxu0 %v5736_v63 }
 0x149   : > { %v1860_v16 = vpop.permute.xlu0 %1859  ;;  %v1790_v17 = vsel %vm1247_vm9, %v1786_v15, %v1788_v9  ;;  %v1789_v37 = vsel %vm1247_vm9, %v1784_v12, %v1786_v15  ;;  %1828 = vmatprep.mubr.bf16.mxu1 %v5736_v63 }
 0x14a   : > { %1810 = vmatprep.subr.bf16.mxu1 %v1790_v17 }
 0x14b   : > { %1811 = vmatpush1.bf16.msra.mxu1 %v1789_v37 }
 0x14c   : > { %v1862_v19 = vpop.permute.xlu1 %1861 }
 0x14d   : > { %v1858_v20 = vpop.permute.xlu0 %1857  ;;  %v1864_v21 = vsel %vm1322_vm13, %v1860_v16, %v1862_v19 }
 0x14e   : > { %v1863_v22 = vsel %vm1322_vm13, %v1858_v20, %v1860_v16  ;;  %5449 = vmatmul.mubr.msk.bf16.vlgmr.msra.gmra.mxu0 %vm439_vm8, %v5675_v38  ;;  %1884 = vmatprep.subr.bf16.mxu0 %v1864_v21 }
 0x14f   : > { %5454 = vmatmul.mubr.msk.bf16.vlgmr.msra.gmra.mxu1 %vm439_vm8, %v5676_v18  ;;  %1885 = vmatpush1.bf16.msra.mxu0 %v1863_v22 }
 0x150   : > { %v1959_v23 = vpop.permute.xlu1 %1958  ;;  %1902 = vmatprep.mubr.bf16.mxu0 %v5736_v63  ;;  %2001 = vmatprep.mubr.bf16.mxu1 %v5736_v63 }
 0x151   : > { %v1961_v24 = vpop.permute.xlu0 %1960 }
 0x152   : > { %v1963_v25 = vsel %vm1216_vm7, %v1959_v23, %v1961_v24 }
 0x153   : > { %1983 = vmatprep.subr.bf16.mxu1 %v1963_v25 }
 0x154   : > { %v1957_v27 = vpop.permute.xlu1 %1956 }
 0x155   : > { %v1962_v28 = vsel %vm1216_vm7, %v1957_v27, %v1959_v23 }
 0x156   : > { %5458 = vmatmul.mubr.msk.bf16.vlgmr.msra.gmra.mxu0 %vm439_vm8, %v5677_v26  ;;  %1984 = vmatpush1.bf16.msra.mxu1 %v1962_v28 }
 0x157   : > { %2140 = vmatprep.mubr.bf16.mxu0 %v5736_v63 }
 0x159   : > { %5463 = vmatmul.mubr.msk.bf16.vlgmr.msra.gmra.mxu1 %vm439_vm8, %v5678_v29 }
 0x15a   : > { %2204 = vmatprep.mubr.bf16.mxu1 %v5736_v63 }
 0x15e   : > { %v6328_v39 = vpop.permute.xlu0 %2020 }
 0x161   : > { %v6317_v30 = vpop.permute.xlu1 %2025 }
 0x162   : > { %v6338_v44 = vpop.permute.xlu0 %2064 }
 0x165   : > { %v6322_v32 = vpop.permute.xlu1 %2062 }
 0x166   : > { %v2070_v33 = vmul.f32 0.0, %v6322_v32  ;;  %v6341_v50 = vpop.permute.xlu0 %2227 }
 0x168   : > { %v2076_v34 = vpack.c.bf16 %v2070_v33, %v2070_v33 }
 0x169   : > { %v6326_v40 = vpop.permute.xlu1 %2225 }
 0x16a   : > { %2159 = vrot.lane.b32.xlu0 %v2076_v34, %s5728_s18  ;;  %v2233_v41 = vmul.f32 0.0, %v6326_v40  ;;  %v6343_v53 = vpop.permute.xlu0 %2325 }
 0x16c   : > { %v2239_v48 = vpack.c.bf16 %v2233_v41, %v2233_v41 }
 0x16d   : > { %v6334_v36 = vpop.permute.xlu1 %2323 }
 0x16e   : > { %3563 = vrot.lane.b32.xlu0 %v3560_v47, %s5730_s26  ;;  %v2331_v49 = vmul.f32 0.0, %v6334_v36  ;;  %2253 = vrot.lane.b32.xlu1 %v2239_v48, %s5727_s15  ;;  %v6345_v54 = vpop.permute.xlu0 %2487 }
 0x16f   : > { %v2495_v11 = vmul.f32 0.0, %v6345_v54 }
 0x170   : > { %v2337_v46 = vpack.c.bf16 %v2331_v49, %v2331_v49 }
 0x171   : > { %v2501_v55 = vpack.c.bf16 %v2495_v11, %v2495_v11 }
 0x172   : > { %2351 = vrot.lane.b32.xlu0 %v2337_v46, %s5726_s30  ;;  %v6348_v56 = vpop.permute.xlu0 %2585 }
 0x173   : > { %v2593_v57 = vmul.f32 0.0, %v6348_v56 }
 0x175   : > { %v2599_v51 = vpack.c.bf16 %v2593_v57, %v2593_v57 }
 0x176   : > { %2517 = vrot.lane.b32.xlu0 %v2501_v55, %s5725_s27 }
 0x177   : > { %2615 = vrot.lane.b32.xlu1 %v2599_v51, %s5723_s19 }
 0x17a   : > { %2689 = vrot.lane.b32.xlu0 %v5734_v45, %s7142_s29  ;;  %v477_v52 = vpop.f32.mrf.mxu0 }
 0x17c   : > { %v479_v58 = vpop.f32.mrf.mxu0 }
 0x17e   : > { %v481_v59 = vpop.f32.mrf.mxu0 }
 0x180   : > { %v483_v60 = vpop.f32.mrf.mxu0 }
 0x1d6   : > { %v542_v35 = vpop.f32.mrf.mxu1 }
 0x1d7   : > { %v543_v38 = vadd.f32 %v542_v35, %v477_v52  ;;  %v6355_v52 = vpop.permute.xlu1 %2485 }
 0x1d8   : > { %v544_v61 = vpop.f32.mrf.mxu1 }
 0x1d9   : > { %v545_v22 = vadd.f32 %v544_v61, %v479_v58 }
 0x1da   : > { %v546_v62 = vpop.f32.mrf.mxu1 }
 0x1db   : > { %v639_v2 = vpop.f32.mrf.mxu0  ;;  %v547_v26 = vadd.f32 %v546_v62, %v481_v59 }
 0x1dc   : > { %v548_v3 = vpop.f32.mrf.mxu1  ;;  %v648_v23 = vadd.f32 %v639_v2, %v543_v38 }
 0x1dd   : > { %v641_v6 = vpop.f32.mrf.mxu0  ;;  %v549_v33 = vadd.f32 %v548_v3, %v483_v60 }
 0x1de   : > { %v740_v9 = vpop.f32.mrf.mxu1  ;;  %v649_v27 = vadd.f32 %v641_v6, %v545_v22 }
 0x1df   : > { %v643_v10 = vpop.f32.mrf.mxu0  ;;  %v749_v28 = vadd.f32 %v740_v9, %v648_v23 }
 0x1e0   : > { %v742_v7 = vpop.f32.mrf.mxu1  ;;  %v650_v34 = vadd.f32 %v643_v10, %v547_v26 }
 0x1e1   : > { %v645_v43 = vpop.f32.mrf.mxu0  ;;  %v750_v41 = vadd.f32 %v742_v7, %v649_v27 }
 0x1e2   : > { %v744_v8 = vpop.f32.mrf.mxu1  ;;  %v651_v46 = vadd.f32 %v645_v43, %v549_v33 }
 0x1e3   : > { %v798_v12 = vpop.f32.mrf.mxu0  ;;  %v751_v11 = vadd.f32 %v744_v8, %v650_v34 }
 0x1e4   : > { %v746_v13 = vpop.f32.mrf.mxu1  ;;  %v807_v47 = vadd.f32 %v798_v12, %v749_v28 }
 0x1e5   : > { %v800_v42 = vpop.f32.mrf.mxu0  ;;  %v752_v35 = vadd.f32 %v746_v13, %v651_v46 }
 0x1e6   : > { %v905_v14 = vpop.f32.mrf.mxu1  ;;  %v808_v55 = vadd.f32 %v800_v42, %v750_v41 }
 0x1e7   : > { %v802_v15 = vpop.f32.mrf.mxu0  ;;  %v914_v57 = vadd.f32 %v905_v14, %v807_v47  ;;  %v6357_v14 = vpop.permute.xlu1 %2583 }
 0x1e8   : > { %v907_v16 = vpop.f32.mrf.mxu1  ;;  %v809_v59 = vadd.f32 %v802_v15, %v751_v11 }
 0x1e9   : > { %v804_v37 = vpop.f32.mrf.mxu0  ;;  %v915_v61 = vadd.f32 %v907_v16, %v808_v55 }
 0x1ea   : > { %v909_v17 = vpop.f32.mrf.mxu1  ;;  %v810_v60 = vadd.f32 %v804_v37, %v752_v35 }
 0x1eb   : > { %v916_v3 = vadd.f32 %v909_v17, %v809_v59 }
 0x1ec   : > { %v911_v18 = vpop.f32.mrf.mxu1 }
 0x1ed   : > { %v917_v12 = vadd.f32 %v911_v18, %v810_v60  ;;  %v6359_v18 = vpop.permute.xlu1 %2755 }
 0x1ee   : > { %v1006_v19 = vpop.f32.mrf.mxu0  ;;  %v1081_v20 = vpop.f32.mrf.mxu1 }
 0x1ef   : > { %v1015_v62 = vadd.f32 %v1006_v19, %v914_v57 }
 0x1f0   : > { %v1008_v21 = vpop.f32.mrf.mxu0  ;;  %v1083_v24 = vpop.f32.mrf.mxu1 }
 0x1f1   : > { %v1016_v9 = vadd.f32 %v1008_v21, %v915_v61  ;;  %v1090_v43 = vadd.f32 %v1081_v20, %v1015_v62 }
 0x1f2   : > { %v1010_v25 = vpop.f32.mrf.mxu0  ;;  %v1085_v29 = vpop.f32.mrf.mxu1 }
 0x1f3   : > { %v1017_v8 = vadd.f32 %v1010_v25, %v916_v3  ;;  %v1091_v22 = vadd.f32 %v1083_v24, %v1016_v9 }
 0x1f4   : > { %v1012_v31 = vpop.f32.mrf.mxu0  ;;  %v1087_v48 = vpop.f32.mrf.mxu1 }
 0x1f5   : > { %v1018_v23 = vadd.f32 %v1012_v31, %v917_v12  ;;  %v1092_v19 = vadd.f32 %v1085_v29, %v1017_v8 }
 0x1f6   : > { %v1182_v49 = vpop.f32.mrf.mxu0 }
 0x1f7   : > { %v1289_v51 = vpop.f32.mrf.mxu1  ;;  %v1191_v13 = vadd.f32 %v1182_v49, %v1090_v43  ;;  %v1093_v17 = vadd.f32 %v1087_v48, %v1018_v23  ;;  %v6361_v48 = vpop.permute.xlu1 %2859 }
 0x1f8   : > { %v1184_v58 = vpop.f32.mrf.mxu0 }
 0x1f9   : > { %v1291_v2 = vpop.f32.mrf.mxu1  ;;  %v1192_v26 = vadd.f32 %v1184_v58, %v1091_v22  ;;  %v1298_v21 = vadd.f32 %v1289_v51, %v1191_v13 }
 0x1fa   : > { %v1186_v6 = vpop.f32.mrf.mxu0 }
 0x1fb   : > { %v1293_v10 = vpop.f32.mrf.mxu1  ;;  %v1193_v28 = vadd.f32 %v1186_v6, %v1092_v19  ;;  %v1299_v25 = vadd.f32 %v1291_v2, %v1192_v26  ;;  %v6363_v2 = vpop.permute.xlu0 %2757 }
 0x1fc   : > { %v1188_v7 = vpop.f32.mrf.mxu0 }
 0x1fd   : > { %v1295_v42 = vpop.f32.mrf.mxu1  ;;  %v1194_v34 = vadd.f32 %v1188_v7, %v1093_v17  ;;  %v1300_v31 = vadd.f32 %v1293_v10, %v1193_v28 }
 0x1fe   : > { %v1364_v38 = vpop.f32.mrf.mxu0 }
 0x1ff   : > { %v1465_v15 = vpop.f32.mrf.mxu1  ;;  %v1373_v41 = vadd.f32 %v1364_v38, %v1298_v21  ;;  %v1301_v29 = vadd.f32 %v1295_v42, %v1194_v34  ;;  %v6365_v42 = vpop.permute.xlu1 %3031 }
 0x200   : > { %v1366_v16 = vpop.f32.mrf.mxu0 }
 0x201   : > { %v1467_v27 = vpop.f32.mrf.mxu1  ;;  %v1374_v49 = vadd.f32 %v1366_v16, %v1299_v25  ;;  %v1474_v55 = vadd.f32 %v1465_v15, %v1373_v41  ;;  %v6367_v16 = vpop.permute.xlu0 %2861 }
 0x202   : > { %v1368_v37 = vpop.f32.mrf.mxu0 }
 0x203   : > { %v1469_v33 = vpop.f32.mrf.mxu1  ;;  %v1375_v57 = vadd.f32 %v1368_v37, %v1300_v31  ;;  %v1475_v35 = vadd.f32 %v1467_v27, %v1374_v49 }
 0x204   : > { %v1370_v20 = vpop.f32.mrf.mxu0 }
 0x205   : > { %v1471_v47 = vpop.f32.mrf.mxu1  ;;  %v1376_v59 = vadd.f32 %v1370_v20, %v1301_v29  ;;  %v1476_v60 = vadd.f32 %v1469_v33, %v1375_v57  ;;  %v6369_v20 = vpop.permute.xlu1 %3129 }
 0x206   : > { %v1566_v24 = vpop.f32.mrf.mxu0  ;;  %v6371_v31 = vpop.permute.xlu0 %3033 }
 0x207   : > { %v1624_v46 = vpop.f32.mrf.mxu1  ;;  %v1575_v61 = vadd.f32 %v1566_v24, %v1474_v55  ;;  %v1477_v7 = vadd.f32 %v1471_v47, %v1376_v59 }
 0x208   : > { %v1568_v11 = vpop.f32.mrf.mxu0 }
 0x209   : > { %v1626_v58 = vpop.f32.mrf.mxu1  ;;  %v1576_v3 = vadd.f32 %v1568_v11, %v1475_v35  ;;  %v1633_v12 = vadd.f32 %v1624_v46, %v1575_v61 }
 0x20a   : > { %v1570_v51 = vpop.f32.mrf.mxu0 }
 0x20b   : > { %v1628_v62 = vpop.f32.mrf.mxu1  ;;  %v1577_v43 = vadd.f32 %v1570_v51, %v1476_v60  ;;  %v1634_v22 = vadd.f32 %v1626_v58, %v1576_v3  ;;  %v6373_v51 = vpop.permute.xlu1 %3285 }
 0x20c   : > { %v1572_v6 = vpop.f32.mrf.mxu0 }
 0x20d   : > { %v1630_v9 = vpop.f32.mrf.mxu1  ;;  %v1578_v23 = vadd.f32 %v1572_v6, %v1477_v7  ;;  %v1635_v26 = vadd.f32 %v1628_v62, %v1577_v43 }
 0x20e   : > { %v1725_v10 = vpop.f32.mrf.mxu0 }
 0x20f   : > { %v1830_v8 = vpop.f32.mrf.mxu1  ;;  %v1734_v13 = vadd.f32 %v1725_v10, %v1633_v12  ;;  %v1636_v21 = vadd.f32 %v1630_v9, %v1578_v23  ;;  %v6376_v9 = vpop.permute.xlu0 %3131 }
 0x210   : > { %v1727_v38 = vpop.f32.mrf.mxu0 }
 0x211   : > { %v1832_v15 = vpop.f32.mrf.mxu1  ;;  %v1735_v27 = vadd.f32 %v1727_v38, %v1634_v22  ;;  %v1839_v28 = vadd.f32 %v1830_v8, %v1734_v13  ;;  %v6380_v22 = vpop.permute.xlu1 %3389 }
 0x212   : > { %v1729_v19 = vpop.f32.mrf.mxu0 }
 0x213   : > { %v1834_v37 = vpop.f32.mrf.mxu1  ;;  %v1736_v33 = vadd.f32 %v1729_v19, %v1635_v26  ;;  %v1840_v34 = vadd.f32 %v1832_v15, %v1735_v27  ;;  %v6383_v19 = vpop.permute.xlu0 %3287 }
 0x214   : > { %v1731_v17 = vpop.f32.mrf.mxu0 }
 0x215   : > { %v1737_v41 = vadd.f32 %v1731_v17, %v1636_v21  ;;  %v1836_v47 = vpop.f32.mrf.mxu1  ;;  %v1841_v46 = vadd.f32 %v1834_v37, %v1736_v33  ;;  %v3289_v21 = vsel %vm1524_vm11, %v6373_v51, %v6383_v19  ;;  %v6402_v33 = vpop.permute.xlu1 %2095 }
 0x216   : > { %v1904_v25 = vpop.f32.mrf.mxu0 }
 0x217   : > { %v1913_v24 = vadd.f32 %v1904_v25, %v1839_v28  ;;  %v1842_v58 = vadd.f32 %v1836_v47, %v1737_v41 }
 0x218   : > { %v1906_v49 = vpop.f32.mrf.mxu0 }
 0x219   : > { %v1914_v11 = vadd.f32 %v1906_v49, %v1840_v34  ;;  %v2003_v29 = vpop.f32.mrf.mxu1 }
 0x21a   : > { %v2012_v55 = vadd.f32 %v2003_v29, %v1913_v24  ;;  %v1908_v57 = vpop.f32.mrf.mxu0 }
 0x21b   : > { %v1915_v35 = vadd.f32 %v1908_v57, %v1841_v46  ;;  %v2005_v59 = vpop.f32.mrf.mxu1 }
 0x21c   : > { %v2028_v61 = vadd.f32 %v6328_v39, %v2012_v55  ;;  %v2013_v62 = vadd.f32 %v2005_v59, %v1914_v11  ;;  %v1910_v6 = vpop.f32.mrf.mxu0  ;;  %v2327_v55 = vsel %vm667_vm2, %v6334_v36, %v6343_v53 }
 0x21d   : > { %v1916_v60 = vadd.f32 %v1910_v6, %v1842_v58  ;;  %v2007_v3 = vpop.f32.mrf.mxu1  ;;  %v6436_v58 = vpop.permute.xlu1 %3561 }
 0x21e   : > { %v2029_v10 = vadd.f32 %v6328_v39, %v2013_v62  ;;  %v2014_v7 = vadd.f32 %v2007_v3, %v1915_v35  ;;  %v2032_v43 = vmul.f32 0.2, %v2028_v61  ;;  %v2229_v39 = vsel %vm566_vm1, %v6326_v40, %v6341_v50 }
 0x21f   : > { %v2009_v12 = vpop.f32.mrf.mxu1  ;;  %v2066_v40 = vsel %vm398_vm0, %v6322_v32, %v6338_v44 }
 0x220   : > { %v2030_v8 = vadd.f32 %v6317_v30, %v2014_v7  ;;  %v2015_v38 = vadd.f32 %v2009_v12, %v1916_v60  ;;  %v2033_v23 = vmul.f32 0.2, %v2029_v10  ;;  %v6385_v26 = vmax.f32 %v2028_v61, %v2032_v43 }
 0x222   : > { %v2034_v13 = vmul.f32 0.2, %v2030_v8  ;;  %v2031_v15 = vadd.f32 %v6317_v30, %v2015_v38  ;;  %v6392_v37 = vmax.f32 %v2029_v10, %v2033_v23  ;;  %v2234_v34 = vmul.f32 %v2229_v39, %v6385_v26 }
 0x223   : > { %v2071_v29 = vmul.f32 %v2066_v40, %v6385_v26  ;;  %v2493_v57 = vmul.f32 %v6355_v52, %v6385_v26  ;;  %v2332_v6 = vmul.f32 %v2327_v55, %v6385_v26 }
 0x224   : > { %v6387_v27 = vmax.f32 %v2030_v8, %v2034_v13  ;;  %v2035_v17 = vmul.f32 0.2, %v2031_v15  ;;  %v6413_v41 = vmul.f32 %v3289_v21, %v6392_v37  ;;  %v6447_v36 = vmul.f32 %v6436_v58, %v6392_v37 }
 0x225   : > { %v6454_v10 = vmul.f32 %v6380_v22, %v6392_v37  ;;  %v2591_v8 = vmul.f32 %v6357_v14, %v6385_v26  ;;  %v2072_v23 = vmul.f32 %v6338_v44, %v6392_v37 }
 0x226   : > { %v6399_v30 = vpack.c.bf16 %v6387_v27, %v6385_v26  ;;  %v2237_v28 = vmul.f32 %v2229_v39, %v6387_v27  ;;  %v6404_v25 = vmax.f32 %v2031_v15, %v2035_v17  ;;  %v2074_v49 = vmul.f32 %v2066_v40, %v6387_v27 }
 0x227   : > { %v2496_v32 = vmul.f32 %v6355_v52, %v6387_v27  ;;  %v2335_v59 = vmul.f32 %v2327_v55, %v6387_v27  ;;  %v2594_v3 = vmul.f32 %v6357_v14, %v6387_v27  ;;  %v2235_v17 = vmul.f32 %v6341_v50, %v6392_v37 }
 0x228   : > { %2097 = vrot.lane.b32.xlu1 %v6399_v30, %s7141_s16  ;;  %v6416_v47 = vmul.f32 %v3289_v21, %v6404_v25  ;;  %v6420_v24 = vpack.c.bf16 %v6404_v25, %v6392_v37  ;;  %v2240_v46 = vpack.c.bf16 %v2237_v28, %v2234_v34  ;;  %v2077_v35 = vpack.c.bf16 %v2074_v49, %v2071_v29 }
 0x229   : > { %v6441_v61 = vmul.f32 %v6436_v58, %v6404_v25  ;;  %v2499_v62 = vpack.c.bf16 %v2496_v32, %v2493_v57  ;;  %v2338_v60 = vpack.c.bf16 %v2335_v59, %v2332_v6  ;;  %v6458_v7 = vmul.f32 %v6380_v22, %v6404_v25 }
 0x22a   : > { %v3300_v11 = vpack.c.bf16 %v6416_v47, %v6413_v41  ;;  %2099 = vrot.lane.b32.xlu0 %v6420_v24, %s7141_s16  ;;  %v2075_v12 = vmul.f32 %v6338_v44, %v6404_v25  ;;  %v2597_v13 = vpack.c.bf16 %v2594_v3, %v2591_v8  ;;  %v2238_v15 = vmul.f32 %v6341_v50, %v6404_v25  ;;  %v3650_v41 = vld [vmem:[%s7129_s5 + $0x8] sm:$0xff] }
 0x22b   : > { %v3575_v43 = vpack.c.bf16 %v6441_v61, %v6447_v36  ;;  %v3403_v38 = vpack.c.bf16 %v6458_v7, %v6454_v10  ;;  %v2766_v28 = vmul.f32 %v6359_v18, %v6387_v27  ;;  %v2336_v40 = vmul.f32 %v6343_v53, %v6404_v25  ;;  %v3685_v47 = vld [vmem:[%s7125_s1] ss:$8 sm:$0x3]  ;;  %v5552_v36 = vld [vmem:[%s7125_s1 + $0x1] ss:$8 sm:$0x3] }
 0x22c   : > { %2255 = vrot.lane.b32.xlu1 %v2240_v46, %s5727_s15  ;;  %v2078_v39 = vpack.c.bf16 %v2075_v12, %v2072_v23  ;;  %v2241_v21 = vpack.c.bf16 %v2238_v15, %v2235_v17  ;;  %v2763_v44 = vmul.f32 %v6359_v18, %v6385_v26  ;;  %v2333_v50 = vmul.f32 %v6343_v53, %v6392_v37 }
 0x22d   : > { %v2872_v49 = vmul.f32 %v6367_v16, %v6387_v27  ;;  %v2765_v46 = vmul.f32 0.0, %v6363_v2  ;;  %v2869_v29 = vmul.f32 %v6367_v16, %v6385_v26  ;;  %v2489_v55 = vsel %vm698_vm3, %v6355_v52, %v6345_v54 }
 0x22e   : > { %2161 = vrot.lane.b32.xlu0 %v2077_v35, %s5728_s18  ;;  %v2769_v34 = vpack.c.bf16 %v2766_v28, %v2763_v44  ;;  %v2339_v32 = vpack.c.bf16 %v2336_v40, %v2333_v50  ;;  %v2497_v35 = vmul.f32 %v2489_v55, %v6404_v25  ;;  %v2863_v59 = vsel %vm1216_vm7, %v6361_v48, %v6367_v16 }
 0x22f   : > { %v2875_v57 = vpack.c.bf16 %v2872_v49, %v2869_v29  ;;  %v2771_v53 = vpack.c.bf16 %v2765_v46, %v2765_v46  ;;  %v2494_v6 = vmul.f32 %v2489_v55, %v6392_v37  ;;  %v2868_v52 = vmul.f32 0.0, %v2863_v59  ;;  %v3392_v49 = vpop.permute.xlu0 %3391 }
 0x230   : > { %2513 = vrot.lane.b32.xlu1 %v2499_v62, %s5725_s27  ;;  %v2587_v62 = vsel %vm597_vm4, %v6357_v14, %v6348_v56  ;;  %v2867_v12 = vmul.f32 0.0, %v6361_v48  ;;  %v2759_v56 = vsel %vm500_vm6, %v6359_v18, %v6363_v2  ;;  %v3035_v14 = vsel %vm1247_vm9, %v6365_v42, %v6371_v31 }
 0x231   : > { %v2595_v54 = vmul.f32 %v2587_v62, %v6404_v25  ;;  %v2592_v3 = vmul.f32 %v2587_v62, %v6392_v37  ;;  %v2874_v8 = vpack.c.bf16 %v2868_v52, %v2868_v52  ;;  %v2767_v23 = vmul.f32 %v2759_v56, %v6404_v25 }
 0x232   : > { %2353 = vrot.lane.b32.xlu0 %v2338_v60, %s5726_s30  ;;  %v2500_v60 = vpack.c.bf16 %v2497_v35, %v2494_v6  ;;  %v2764_v48 = vmul.f32 %v2759_v56, %v6392_v37  ;;  %v3040_v15 = vmul.f32 0.0, %v3035_v14  ;;  %v3044_v18 = vmul.f32 %v6371_v31, %v6387_v27 }
 0x233   : > { %v2598_v16 = vpack.c.bf16 %v2595_v54, %v2592_v3  ;;  %v3041_v2 = vmul.f32 %v6371_v31, %v6385_v26  ;;  %v3039_v44 = vmul.f32 0.0, %v6365_v42  ;;  %v3137_v31 = vmul.f32 0.0, %v6369_v20  ;;  %v5566_v3 = vld [vmem:[%s7125_s1 + $0x3] ss:$8 sm:$0x3] }
 0x234   : > { %2687 = vrot.lane.b32.xlu1 %v6420_v24, %s7142_s29  ;;  %v3046_v17 = vpack.c.bf16 %v3040_v15, %v3040_v15  ;;  %v3295_v29 = vmul.f32 0.0, %v6383_v19  ;;  %v3293_v42 = vmul.f32 %v6373_v51, %v6385_v26  ;;  %v3393_v55 = vsel %vm1216_vm7, %v6380_v22, %v3392_v49  ;;  %v6557_v19 = vpop.permute.xlu0 %2159  ;;  %v2254_v15 = vpop.permute.xlu1 %2253 }
 0x235   : > { %v3047_v40 = vpack.c.bf16 %v3044_v18, %v3041_v2  ;;  %v3045_v46 = vpack.c.bf16 %v3039_v44, %v3039_v44  ;;  %v3139_v59 = vmul.f32 %v6376_v9, %v6392_v37  ;;  %v3694_v10 = vrot.slane %v3685_v47, %v5823_v5 }
 0x236   : > { %2611 = vrot.lane.b32.xlu0 %v2597_v13, %s5723_s19  ;;  %v2873_v13 = vpack.c.bf16 %v2867_v12, %v2867_v12  ;;  %v3301_v35 = vpack.c.bf16 %v3295_v29, %v3295_v29  ;;  %v3690_v61 = vrot.slane %v3685_v47, %v5820_v4  ;;  %v3861_v7 = vrot.slane %v5552_v36, %v5823_v5  ;;  %v5684_v47 = vld [vmem:[%s7128_s4 + $0x28] sm:$0xff]  }
 0x237   : > { %v4123_v12 = vrot.slane %v5566_v3, %v5820_v4 }
 0x238   : > { %2163 = vrot.lane.b32.xlu1 %v2078_v39, %s5728_s18  ;;  %v2770_v39 = vpack.c.bf16 %v2767_v23, %v2764_v48  ;;  %v5580_v23 = vld [vmem:[%s7125_s1 + $0x5] ss:$8 sm:$0x3]  ;;  %v2616_v2 = vpop.permute.xlu1 %2615  ;;  %s5744_s18 = smov 16  }
 0x239   : > { %v4404_v48 = vrot.slane %v5580_v23, %v5823_v5 }
 0x23a   : > { %2257 = vrot.lane.b32.xlu0 %v2241_v21, %s5727_s15  ;;  %v3133_v21 = vsel %vm1493_vm10, %v6369_v20, %v6376_v9  ;;  %s5743_s15 = smov 17  }
 0x23b   : > { %v3141_v28 = vmul.f32 %v3133_v21, %v6387_v27  ;;  %v3138_v50 = vmul.f32 %v3133_v21, %v6385_v26 }
 0x23c   : > { %2685 = vrot.lane.b32.xlu1 %v6399_v30, %s7142_s29 }
 0x23e   : > { %2783 = vrot.lane.b32.xlu0 %v2769_v34, %s5724_s20  ;;  %v3144_v34 = vpack.c.bf16 %v3141_v28, %v3138_v50 }
 0x240   : > { %2355 = vrot.lane.b32.xlu1 %v2339_v32, %s5726_s30  ;;  %s7143_s30 = smov 64   ;;  %v3296_v32 = vmul.f32 %v6373_v51, %v6387_v27  ;;  %v3398_v27 = vmul.f32 0.0, %v3393_v55  ;;  %v3399_v51 = vmul.f32 0.0, %v3392_v49 }
 0x242   : > { %2891 = vrot.lane.b32.xlu0 %v2875_v57, %s5730_s26  ;;  %v3143_v57 = vpack.c.bf16 %v3137_v31, %v3137_v31  ;;  %v3299_v20 = vpack.c.bf16 %v3296_v32, %v3293_v42  ;;  %v3404_v62 = vpack.c.bf16 %v3398_v27, %v3398_v27  ;;  %v3405_v22 = vpack.c.bf16 %v3399_v51, %v3399_v51  ;;  %v5679_v31 = vld [vmem:[%s7128_s4 + $0x8] sm:$0xff]  }
 0x244   : > { %2787 = vrot.lane.b32.xlu1 %v2771_v53, %s5724_s20  ;;  %v3142_v53 = vmul.f32 %v6376_v9, %v6404_v25  ;;  %v3564_v25 = vpop.permute.xlu0 %3563 }
 0x245   : > { %v3565_v6 = vsel %vm1247_vm9, %v6436_v58, %v3564_v25  ;;  %v3571_v54 = vmul.f32 0.0, %v3564_v25 }
 0x246   : > { %2963 = vrot.lane.b32.xlu0 %v5734_v45, %s7143_s30  ;;  %v3145_v26 = vpack.c.bf16 %v3142_v53, %v3139_v59  ;;  %v3570_v9 = vmul.f32 0.0, %v3565_v6  ;;  %v5681_v59 = vld [vmem:[%s7128_s4 + $0x10] sm:$0xff]  }
 0x247   : > { %v3577_v58 = vpack.c.bf16 %v3571_v54, %v3571_v54 }
 0x248   : > { %2515 = vrot.lane.b32.xlu1 %v2500_v60, %s5725_s27  ;;  %v3576_v37 = vpack.c.bf16 %v3570_v9, %v3570_v9  ;;  %s5742_s27 = smov 15   ;;  %v5683_v9 = vld [vmem:[%s7128_s4 + $0x20] sm:$0xff]  }
 0x24a   : > { %2613 = vrot.lane.b32.xlu0 %v2598_v16, %s5723_s19  ;;  %v4127_v16 = vrot.slane %v5566_v3, %v5823_v5 }
 0x24c   : > { %2889 = vrot.lane.b32.xlu1 %v2874_v8, %s5730_s26  ;;  %v5571_v8 = vld [vmem:[%s7125_s1 + $0x4] ss:$8 sm:$0x3] }
 0x24d   : > { %v4228_v56 = vrot.slane %v5571_v8, %v5823_v5  ;;  %v4224_v14 = vrot.slane %v5571_v8, %v5820_v4 }
 0x24e   : > { %2961 = vrot.lane.b32.xlu0 %v5734_v45, %s7143_s30 }
 0x250   : > { %2887 = vrot.lane.b32.xlu1 %v2873_v13, %s5730_s26  ;;  %v2352_v13 = vpop.permute.xlu0 %2351 }
 0x252   : > { %2785 = vrot.lane.b32.xlu0 %v2770_v39, %s5724_s20  ;;  %v4400_v39 = vrot.slane %v5580_v23, %v5820_v4 }
 0x254   : > { %2965 = vrot.lane.b32.xlu1 %v6399_v30, %s7143_s30  ;;  %v2518_v18 = vpop.permute.xlu0 %2517 }
 0x256   : > { %3063 = vrot.lane.b32.xlu0 %v3047_v40, %s5729_s23 }
 0x258   : > { %3061 = vrot.lane.b32.xlu1 %v3046_v17, %s5729_s23  ;;  %v2690_v17 = vpop.permute.xlu0 %2689 }
 0x25a   : > { %3159 = vrot.lane.b32.xlu0 %v3144_v34, %s5732_s22 }
 0x25c   : > { %3059 = vrot.lane.b32.xlu1 %v3045_v46, %s5729_s23 }
 0x25e   : > { %3157 = vrot.lane.b32.xlu0 %v3143_v57, %s5732_s22  ;;  %v5680_v57 = vld [vmem:[%s7128_s4] sm:$0xff]  }
 0x260   : > { %3313 = vrot.lane.b32.xlu1 %v3299_v20, %s5731_s12 }
 0x262   : > { %3317 = vrot.lane.b32.xlu0 %v3301_v35, %s5731_s12 }
 0x264   : > { %3161 = vrot.lane.b32.xlu1 %v3145_v26, %s5732_s22  ;;  %s5738_s22 = smov 111  }
 0x266   : > { %3419 = vrot.lane.b32.xlu0 %v3404_v62, %s5730_s26 }
 0x268   : > { %3421 = vrot.lane.b32.xlu1 %v3405_v22, %s5730_s26  ;;  %v5682_v22 = vld [vmem:[%s7128_s4 + $0x18] sm:$0xff]  }
 0x26a   : > { %3495 = vrot.lane.b32.xlu0 %v5734_v45, %s7143_s30 }
 0x26c   : > { %3315 = vrot.lane.b32.xlu1 %v3300_v11, %s5731_s12  ;;  %v3649_v11 = vld [vmem:[%s7129_s5] sm:$0xff] }
 0x26e   : > { %3417 = vrot.lane.b32.xlu0 %v3403_v38, %s5730_s26  ;;  %v5557_v38 = vld [vmem:[%s7125_s1 + $0x2] ss:$8 sm:$0x3]  ;;  %s5745_s26 = smov 112  }
 0x26f   : > { %v3962_v52 = vrot.slane %v5557_v38, %v5823_v5  ;;  %v3958_v60 = vrot.slane %v5557_v38, %v5820_v4 }
 0x270   : > { %3493 = vrot.lane.b32.xlu1 %v5734_v45, %s7143_s30 }
 0x272   : > { %3591 = vrot.lane.b32.xlu0 %v3576_v37, %s5729_s23 }
 0x274   : > { %3491 = vrot.lane.b32.xlu1 %v6420_v24, %s7143_s30  ;;  %s5741_s30 = smov 1  }
 0x276   : > { %3589 = vrot.lane.b32.xlu0 %v3575_v43, %s5729_s23  ;;  %v3857_v43 = vrot.slane %v5552_v36, %v5820_v4 }
 0x278   : > { %3593 = vrot.lane.b32.xlu1 %v3577_v58, %s5729_s23 }
 0x27a   : > { %3658 = vperm.xlu0 %5659, %v3650_v41  }
 0x27c   : > { %3653 = vperm.xlu1 %5660, %v3649_v11  }
 0x27e   : > { %3697 = vrot.lane.b32.xlu0 %v3694_v10, %s5738_s22 }
 0x280   : > { %3695 = vrot.lane.b32.xlu1 %v3690_v61, %s5738_s22 }
 0x282   : > { %3864 = vrot.lane.b32.xlu0 %v3861_v7, %s5739_s25 }
 0x284   : > { %3862 = vrot.lane.b32.xlu1 %v3857_v43, %s5739_s25  ;;  %v5685_v43 = vld [vmem:[%s7128_s4 + $0x30] sm:$0xff]  }
 0x286   : > { %3965 = vrot.lane.b32.xlu0 %v3962_v52, %s5740_s21 }
 0x288   : > { %3963 = vrot.lane.b32.xlu1 %v3958_v60, %s5740_s21 }
 0x28a   : > { %4130 = vrot.lane.b32.xlu0 %v4127_v16, %s5741_s30  ;;  %v5686_v16 = vld [vmem:[%s7128_s4 + $0x38] sm:$0xff]  }
 0x28c   : > { %4128 = vrot.lane.b32.xlu1 %v4123_v12, %s5741_s30 }
 0x28e   : > { %4231 = vrot.lane.b32.xlu0 %v4228_v56, %s5742_s27 }
 0x290   : > { %4229 = vrot.lane.b32.xlu1 %v4224_v14, %s5742_s27 }
 0x292   : > { %4407 = vrot.lane.b32.xlu0 %v4404_v48, %s5743_s15 }
 0x294   : > { %4405 = vrot.lane.b32.xlu1 %v4400_v39, %s5743_s15 }
 0x298   : > { %3729 = vrot.lane.b32.xlu1 %v5734_v45, %s5744_s18 }
 0x29a   : > { %v2098_v21 = vpop.permute.xlu1 %2097 }
 0x29b   : > { %v2101_v50 = vsel %vm434_vm5, %v6402_v33, %v2098_v21 }
 0x29c   : > { %v2100_v28 = vpop.permute.xlu0 %2099 }
 0x29d   : > { %v2102_v44 = vsel %vm434_vm5, %v2098_v21, %v2100_v28  ;;  %vm5318_vm5 = vcmp.lt.s32.totalorder %v386_v0, 256 }
 0x29e   : > { %v2256_v40 = vpop.permute.xlu1 %2255  ;;  %2122 = vmatprep.subr.bf16.mxu0 %v2102_v44  ;;  %v5689_v44 = vld [vmem:[%s7128_s4 + $0x50] sm:$0xff]  }
 0x29f   : > { %2123 = vmatpush1.bf16.msra.mxu0 %v2101_v50  ;;  %v2259_v27 = vsel %vm597_vm4, %v2254_v15, %v2256_v40 }
 0x2a0   : > { %v2162_v34 = vpop.permute.xlu0 %2161 }
 0x2a1   : > { %v2165_v33 = vsel %vm500_vm6, %v6557_v19, %v2162_v34 }
 0x2a2   : > { %v2514_v49 = vpop.permute.xlu1 %2513  ;;  %5468 = vmatmul.mubr.msk.bf16.vlgmr.msra.gmra.mxu0 %vm439_vm8, %v5679_v31 }
 0x2a3   : > { %2298 = vmatprep.mubr.bf16.mxu0 %v5736_v63 }
 0x2a4   : > { %v2354_v46 = vpop.permute.xlu0 %2353 }
 0x2a5   : > { %v2357_v62 = vsel %vm698_vm3, %v2352_v13, %v2354_v46  ;;  %v5687_v13 = vld [vmem:[%s7128_s4 + $0x40] sm:$0xff]  }
 0x2a6   : > { %v2688_v32 = vpop.permute.xlu1 %2687 }
 0x2a7   : > { %v2692_v10 = vsel %vm1039_vm12, %v2688_v32, %v2690_v17  ;;  %v5688_v17 = vld [vmem:[%s7128_s4 + $0x48] sm:$0xff]  }
 0x2a8   : > { %v2612_v29 = vpop.permute.xlu0 %2611 }
 0x2aa   : > { %v2164_v42 = vpop.permute.xlu1 %2163 }
 0x2ab   : > { %v2166_v55 = vsel %vm500_vm6, %v2162_v34, %v2164_v42  ;;  %v5690_v34 = vld [vmem:[%s7128_s4 + $0x58] sm:$0xff]  }
 0x2ac   : > { %2186 = vmatprep.subr.bf16.mxu1 %v2166_v55  ;;  %v2258_v20 = vpop.permute.xlu0 %2257 }
 0x2ad   : > { %2187 = vmatpush1.bf16.msra.mxu1 %v2165_v33  ;;  %v2260_v35 = vsel %vm597_vm4, %v2256_v40, %v2258_v20  ;;  %vm4339_vm4 = vcmask 916480  }
 0x2ae   : > { %v2686_v53 = vpop.permute.xlu1 %2685  ;;  %2280 = vmatprep.subr.bf16.mxu0 %v2260_v35 }
 0x2af   : > { %2281 = vmatpush1.bf16.msra.mxu0 %v2259_v27  ;;  %v2691_v38 = vsel %vm1039_vm12, %v2686_v53, %v2688_v32  ;;  %v5693_v27 = vld [vmem:[%s7128_s4 + $0x70] sm:$0xff]  }
 0x2b0   : > { %5470 = vmatmul.mubr.msk.bf16.vlgmr.msra.gmra.mxu1 %vm439_vm8, %v5680_v57  ;;  %2436 = vmatprep.subr.bf16.mxu0 %v6420_v24  ;;  %v2784_v19 = vpop.permute.xlu0 %2783  ;;  %v5692_v57 = vld [vmem:[%s7128_s4 + $0x68] sm:$0xff]  }
 0x2b1   : > { %2396 = vmatprep.mubr.bf16.mxu1 %v5736_v63 }
 0x2b2   : > { %v2356_v51 = vpop.permute.xlu1 %2355  ;;  %5475 = vmatmul.mubr.msk.bf16.vlgmr.msra.gmra.mxu0 %vm439_vm8, %v5681_v59 }
 0x2b3   : > { %v2358_v26 = vsel %vm698_vm3, %v2354_v46, %v2356_v51  ;;  %2437 = vmatpush1.bf16.msra.mxu0 %v6399_v30  ;;  %2454 = vmatprep.mubr.bf16.mxu0 %v5736_v63  ;;  %vm3800_vm3 = vcmask 138240  }
 0x2b4   : > { %2378 = vmatprep.subr.bf16.mxu1 %v2358_v26  ;;  %v2892_v25 = vpop.permute.xlu0 %2891 }
 0x2b5   : > { %2379 = vmatpush1.bf16.msra.mxu1 %v2357_v62  ;;  %v5694_v62 = vld [vmem:[%s7128_s4 + $0x78] sm:$0xff]  }
 0x2b6   : > { %v2788_v6 = vpop.permute.xlu1 %2787 }
 0x2b8   : > { %5480 = vmatmul.mubr.msk.bf16.vlgmr.msra.gmra.mxu1 %vm439_vm8, %v5682_v22  ;;  %v2964_v37 = vpop.permute.xlu0 %2963 }
 0x2b9   : > { %2558 = vmatprep.mubr.bf16.mxu1 %v5736_v63 }
 0x2ba   : > { %v2516_v54 = vpop.permute.xlu1 %2515  ;;  %5484 = vmatmul.mubr.msk.bf16.vlgmr.msra.gmra.mxu0 %vm439_vm8, %v5683_v9  ;;  %v5695_v9 = vld [vmem:[%s7128_s4 + $0x80] sm:$0xff]  }
 0x2bb   : > { %v2520_v58 = vsel %vm667_vm2, %v2516_v54, %v2518_v18  ;;  %v2519_v41 = vsel %vm667_vm2, %v2514_v49, %v2516_v54  ;;  %2656 = vmatprep.mubr.bf16.mxu0 %v5736_v63  ;;  %vm3897_vm2 = vcmask 121856  }
 0x2bc   : > { %2540 = vmatprep.subr.bf16.mxu1 %v2520_v58  ;;  %v2614_v11 = vpop.permute.xlu0 %2613 }
 0x2bd   : > { %2541 = vmatpush1.bf16.msra.mxu1 %v2519_v41  ;;  %v2618_v36 = vsel %vm566_vm1, %v2614_v11, %v2616_v2  ;;  %v2617_v7 = vsel %vm566_vm1, %v2612_v29, %v2614_v11  ;;  %vm3998_vm1 = vcmask 7168  }
 0x2be   : > { %v2890_v61 = vpop.permute.xlu1 %2889  ;;  %2712 = vmatprep.subr.bf16.mxu1 %v2692_v10  ;;  %2638 = vmatprep.subr.bf16.mxu0 %v2618_v36 }
 0x2bf   : > { %2639 = vmatpush1.bf16.msra.mxu0 %v2617_v7  ;;  %v2894_v60 = vsel %vm1247_vm9, %v2890_v61, %v2892_v25 }
 0x2c0   : > { %5489 = vmatmul.mubr.msk.bf16.vlgmr.msra.gmra.mxu1 %vm439_vm8, %v5684_v47  ;;  %v2962_v52 = vpop.permute.xlu0 %2961  ;;  %v5696_v47 = vld [vmem:[%s7128_s4 + $0x88] sm:$0xff]  }
 0x2c1   : > { %2713 = vmatpush1.bf16.msra.mxu1 %v2691_v38  ;;  %2730 = vmatprep.mubr.bf16.mxu1 %v5736_v63  ;;  %v2967_v18 = vsel %vm1322_vm13, %v2962_v52, %v2964_v37 }
 0x2c2   : > { %v2888_v3 = vpop.permute.xlu1 %2887  ;;  %2914 = vmatprep.subr.bf16.mxu1 %v2894_v60  ;;  %5494 = vmatmul.mubr.msk.bf16.vlgmr.msra.gmra.mxu0 %vm439_vm8, %v5685_v43 }
 0x2c3   : > { %2828 = vmatprep.mubr.bf16.mxu0 %v5736_v63  ;;  %v2893_v48 = vsel %vm1247_vm9, %v2888_v3, %v2890_v61 }
 0x2c4   : > { %v2786_v12 = vpop.permute.xlu0 %2785 }
 0x2c5   : > { %v2789_v8 = vsel %vm398_vm0, %v2784_v19, %v2786_v12  ;;  %v2790_v14 = vsel %vm398_vm0, %v2786_v12, %v2788_v6  ;;  %vm3967_vm0 = vcmask 1039360  }
 0x2c6   : > { %v2966_v56 = vpop.permute.xlu1 %2965  ;;  %2810 = vmatprep.subr.bf16.mxu0 %v2790_v14 }
 0x2c7   : > { %v2968_v23 = vsel %vm1322_vm13, %v2964_v37, %v2966_v56  ;;  %2811 = vmatpush1.bf16.msra.mxu0 %v2789_v8 }
 0x2c8   : > { %5498 = vmatmul.mubr.msk.bf16.vlgmr.msra.gmra.mxu1 %vm439_vm8, %v5686_v16  ;;  %2988 = vmatprep.subr.bf16.mxu0 %v2968_v23  ;;  %v3064_v15 = vpop.permute.xlu0 %3063 }
 0x2c9   : > { %2915 = vmatpush1.bf16.msra.mxu1 %v2893_v48  ;;  %2932 = vmatprep.mubr.bf16.mxu1 %v5736_v63 }
 0x2ca   : > { %v3062_v39 = vpop.permute.xlu1 %3061  ;;  %5503 = vmatmul.mubr.msk.bf16.vlgmr.msra.gmra.mxu0 %vm439_vm8, %v5687_v13 }
 0x2cb   : > { %v3066_v2 = vsel %vm1216_vm7, %v3062_v39, %v3064_v15  ;;  %2989 = vmatpush1.bf16.msra.mxu0 %v2967_v18  ;;  %3006 = vmatprep.mubr.bf16.mxu0 %v5736_v63 }
 0x2cc   : > { %3086 = vmatprep.subr.bf16.mxu1 %v3066_v2  ;;  %v3160_v21 = vpop.permute.xlu0 %3159 }
 0x2ce   : > { %v3060_v28 = vpop.permute.xlu1 %3059 }
 0x2cf   : > { %v3065_v40 = vsel %vm1216_vm7, %v3060_v28, %v3062_v39 }
 0x2d0   : > { %5508 = vmatmul.mubr.msk.bf16.vlgmr.msra.gmra.mxu1 %vm439_vm8, %v5688_v17  ;;  %v3158_v50 = vpop.permute.xlu0 %3157 }
 0x2d1   : > { %3087 = vmatpush1.bf16.msra.mxu1 %v3065_v40  ;;  %3104 = vmatprep.mubr.bf16.mxu1 %v5736_v63  ;;  %v3163_v29 = vsel %vm1524_vm11, %v3158_v50, %v3160_v21 }
 0x2d2   : > { %3242 = vmatprep.subr.bf16.mxu1 %v6420_v24  ;;  %v3314_v31 = vpop.permute.xlu1 %3313  ;;  %5512 = vmatmul.mubr.msk.bf16.vlgmr.msra.gmra.mxu0 %vm439_vm8, %v5689_v44  ;;  %v5691_v24 = vld [vmem:[%s7128_s4 + $0x60] sm:$0xff]  }
 0x2d3   : > { %3202 = vmatprep.mubr.bf16.mxu0 %v5736_v63 }
 0x2d4   : > { %v3318_v49 = vpop.permute.xlu0 %3317 }
 0x2d6   : > { %v3162_v46 = vpop.permute.xlu1 %3161 }
 0x2d7   : > { %v3164_v32 = vsel %vm1524_vm11, %v3160_v21, %v3162_v46 }
 0x2d8   : > { %5517 = vmatmul.mubr.msk.bf16.vlgmr.msra.gmra.mxu1 %vm439_vm8, %v5690_v34  ;;  %3184 = vmatprep.subr.bf16.mxu0 %v3164_v32  ;;  %v3420_v42 = vpop.permute.xlu0 %3419 }
 0x2d9   : > { %3243 = vmatpush1.bf16.msra.mxu1 %v6399_v30  ;;  %3185 = vmatpush1.bf16.msra.mxu0 %v3163_v29 }
 0x2da   : > { %v3422_v55 = vpop.permute.xlu1 %3421  ;;  %3260 = vmatprep.mubr.bf16.mxu1 %v5736_v63 }
 0x2db   : > { %v3424_v33 = vsel %vm1247_vm9, %v3420_v42, %v3422_v55 }
 0x2dc   : > { %5522 = vmatmul.mubr.msk.bf16.vlgmr.msra.gmra.mxu0 %vm439_vm8, %v5691_v24  ;;  %3444 = vmatprep.subr.bf16.mxu1 %v3424_v33  ;;  %v3496_v20 = vpop.permute.xlu0 %3495 }
 0x2dd   : > { %3358 = vmatprep.mubr.bf16.mxu0 %v5736_v63 }
 0x2de   : > { %v3316_v53 = vpop.permute.xlu1 %3315 }
 0x2df   : > { %v3319_v30 = vsel %vm1493_vm10, %v3314_v31, %v3316_v53  ;;  %v3320_v35 = vsel %vm1493_vm10, %v3316_v53, %v3318_v49 }
 0x2e0   : > { %5526 = vmatmul.mubr.msk.bf16.vlgmr.msra.gmra.mxu1 %vm439_vm8, %v5692_v57  ;;  %3340 = vmatprep.subr.bf16.mxu0 %v3320_v35  ;;  %v3418_v59 = vpop.permute.xlu0 %3417 }
 0x2e1   : > { %3341 = vmatpush1.bf16.msra.mxu0 %v3319_v30  ;;  %3462 = vmatprep.mubr.bf16.mxu1 %v5736_v63  ;;  %v3423_v19 = vsel %vm1247_vm9, %v3418_v59, %v3420_v42 }
 0x2e2   : > { %v3494_v51 = vpop.permute.xlu1 %3493  ;;  %3445 = vmatpush1.bf16.msra.mxu1 %v3423_v19 }
 0x2e3   : > { %v3498_v26 = vsel %vm1322_vm13, %v3494_v51, %v3496_v20 }
 0x2e4   : > { %5531 = vmatmul.mubr.msk.bf16.vlgmr.msra.gmra.mxu0 %vm439_vm8, %v5693_v27  ;;  %3518 = vmatprep.subr.bf16.mxu0 %v3498_v26  ;;  %v3592_v22 = vpop.permute.xlu0 %3591 }
 0x2e5   : > { %3536 = vmatprep.mubr.bf16.mxu0 %v5736_v63 }
 0x2e6   : > { %v3492_v25 = vpop.permute.xlu1 %3491 }
 0x2e7   : > { %v3497_v6 = vsel %vm1322_vm13, %v3492_v25, %v3494_v51 }
 0x2e8   : > { %5536 = vmatmul.mubr.msk.bf16.vlgmr.msra.gmra.mxu1 %vm439_vm8, %v5694_v62  ;;  %3519 = vmatpush1.bf16.msra.mxu0 %v3497_v6  ;;  %v3590_v37 = vpop.permute.xlu0 %3589 }
 0x2e9   : > { %3634 = vmatprep.mubr.bf16.mxu1 %v5736_v63  ;;  %v3595_v41 = vsel %vm1216_vm7, %v3590_v37, %v3592_v22 }
 0x2ea   : > { %v3594_v54 = vpop.permute.xlu1 %3593 }
 0x2eb   : > { %v3596_v58 = vsel %vm1216_vm7, %v3592_v22, %v3594_v54 }
 0x2ec   : > { %5540 = vmatmul.mubr.msk.bf16.vlgmr.msra.gmra.mxu0 %vm439_vm8, %v5695_v9  ;;  %3616 = vmatprep.subr.bf16.mxu1 %v3596_v58 }
 0x2ed   : > { %3617 = vmatpush1.bf16.msra.mxu1 %v3595_v41  ;;  %3775 = vmatprep.mubr.bf16.mxu0 %v5736_v63 }
 0x2f0   : > { %5545 = vmatmul.mubr.msk.bf16.vlgmr.msra.gmra.mxu1 %vm439_vm8, %v5696_v47 }
 0x2f1   : > { %3840 = vmatprep.mubr.bf16.mxu1 %v5736_v63 }
 0x2f7   : > { %v6764_v11 = vpop.permute.xlu1 %3653 }
 0x2fb   : > { %v6766_v10 = vpop.permute.xlu1 %3695 }
 0x2fc   : > { %v3704_v61 = vmul.f32 0.0, %v6766_v10 }
 0x2fe   : > { %v3710_v36 = vpack.c.bf16 %v3704_v61, %v3704_v61 }
 0x2ff   : > { %v6770_v7 = vpop.permute.xlu1 %3862 }
 0x300   : > { %3794 = vrot.lane.b32.xlu0 %v3710_v36, %s5743_s15  ;;  %v3871_v43 = vmul.f32 0.0, %v6770_v7 }
 0x302   : > { %v3877_v38 = vpack.c.bf16 %v3871_v43, %v3871_v43 }
 0x304   : > { %3891 = vrot.lane.b32.xlu1 %v3877_v38, %s5742_s27 }
 0x362   : > { %v2142_v52 = vpop.f32.mrf.mxu0 }
 0x364   : > { %v2144_v60 = vpop.f32.mrf.mxu0 }
 0x366   : > { %v2146_v3 = vpop.f32.mrf.mxu0 }
 0x368   : > { %v2148_v12 = vpop.f32.mrf.mxu0 }
 0x370   : > { %v2206_v16 = vpop.f32.mrf.mxu1 }
 0x371   : > { %v2207_v29 = vadd.f32 %v2206_v16, %v2142_v52 }
 0x372   : > { %v2208_v8 = vpop.f32.mrf.mxu1  ;;  %v2300_v56 = vpop.f32.mrf.mxu0 }
 0x373   : > { %v2209_v55 = vadd.f32 %v2208_v8, %v2144_v60  ;;  %v2309_v20 = vadd.f32 %v2300_v56, %v2207_v29 }
 0x374   : > { %v2210_v14 = vpop.f32.mrf.mxu1  ;;  %v2302_v23 = vpop.f32.mrf.mxu0 }
 0x375   : > { %v2211_v53 = vadd.f32 %v2210_v14, %v2146_v3  ;;  %v2310_v27 = vadd.f32 %v2302_v23, %v2209_v55 }
 0x376   : > { %v2212_v13 = vpop.f32.mrf.mxu1  ;;  %v2304_v48 = vpop.f32.mrf.mxu0 }
 0x377   : > { %v2213_v59 = vadd.f32 %v2212_v13, %v2148_v12  ;;  %v2311_v62 = vadd.f32 %v2304_v48, %v2211_v53 }
 0x378   : > { %v2398_v15 = vpop.f32.mrf.mxu1  ;;  %v2306_v39 = vpop.f32.mrf.mxu0 }
 0x379   : > { %v2407_v19 = vadd.f32 %v2398_v15, %v2309_v20  ;;  %v2312_v9 = vadd.f32 %v2306_v39, %v2213_v59 }
 0x37a   : > { %v2400_v18 = vpop.f32.mrf.mxu1  ;;  %v2456_v2 = vpop.f32.mrf.mxu0 }
 0x37b   : > { %v2408_v22 = vadd.f32 %v2400_v18, %v2310_v27  ;;  %v2465_v37 = vadd.f32 %v2456_v2, %v2407_v19 }
 0x37c   : > { %v2402_v17 = vpop.f32.mrf.mxu1  ;;  %v2458_v21 = vpop.f32.mrf.mxu0 }
 0x37d   : > { %v2409_v54 = vadd.f32 %v2402_v17, %v2311_v62  ;;  %v2466_v47 = vadd.f32 %v2458_v21, %v2408_v22 }
 0x37e   : > { %v2404_v28 = vpop.f32.mrf.mxu1  ;;  %v2460_v40 = vpop.f32.mrf.mxu0 }
 0x37f   : > { %v2410_v61 = vadd.f32 %v2404_v28, %v2312_v9  ;;  %v2467_v52 = vadd.f32 %v2460_v40, %v2409_v54 }
 0x380   : > { %v2560_v44 = vpop.f32.mrf.mxu1  ;;  %v2462_v50 = vpop.f32.mrf.mxu0 }
 0x381   : > { %v2569_v36 = vadd.f32 %v2560_v44, %v2465_v37  ;;  %v2468_v12 = vadd.f32 %v2462_v50, %v2410_v61 }
 0x382   : > { %v2562_v31 = vpop.f32.mrf.mxu1  ;;  %v2658_v34 = vpop.f32.mrf.mxu0 }
 0x383   : > { %v2570_v60 = vadd.f32 %v2562_v31, %v2466_v47  ;;  %v2667_v8 = vadd.f32 %v2658_v34, %v2569_v36 }
 0x384   : > { %v2564_v49 = vpop.f32.mrf.mxu1  ;;  %v2660_v46 = vpop.f32.mrf.mxu0 }
 0x385   : > { %v2571_v56 = vadd.f32 %v2564_v49, %v2467_v52  ;;  %v2668_v13 = vadd.f32 %v2660_v46, %v2570_v60 }
 0x386   : > { %v2566_v32 = vpop.f32.mrf.mxu1  ;;  %v2662_v24 = vpop.f32.mrf.mxu0 }
 0x387   : > { %v2572_v48 = vadd.f32 %v2566_v32, %v2468_v12  ;;  %v2669_v2 = vadd.f32 %v2662_v24, %v2571_v56  ;;  %v3659_v12 = vpop.permute.xlu0 %3658 }
 0x388   : > { %v2732_v42 = vpop.f32.mrf.mxu1  ;;  %v2664_v33 = vpop.f32.mrf.mxu0 }
 0x389   : > { %v2741_v15 = vadd.f32 %v2732_v42, %v2667_v8  ;;  %v2670_v44 = vadd.f32 %v2664_v33, %v2572_v48 }
 0x38a   : > { %v2734_v57 = vpop.f32.mrf.mxu1  ;;  %v2830_v30 = vpop.f32.mrf.mxu0 }
 0x38b   : > { %v2742_v17 = vadd.f32 %v2734_v57, %v2668_v13  ;;  %v2839_v29 = vadd.f32 %v2830_v30, %v2741_v15 }
 0x38c   : > { %v2736_v35 = vpop.f32.mrf.mxu1  ;;  %v2832_v51 = vpop.f32.mrf.mxu0 }
 0x38d   : > { %v2743_v40 = vadd.f32 %v2736_v35, %v2669_v2  ;;  %v2840_v20 = vadd.f32 %v2832_v51, %v2742_v17 }
 0x38e   : > { %v2738_v26 = vpop.f32.mrf.mxu1  ;;  %v2834_v25 = vpop.f32.mrf.mxu0 }
 0x38f   : > { %v2744_v50 = vadd.f32 %v2738_v26, %v2670_v44  ;;  %v2841_v27 = vadd.f32 %v2834_v25, %v2743_v40 }
 0x390   : > { %v2934_v6 = vpop.f32.mrf.mxu1  ;;  %v2836_v58 = vpop.f32.mrf.mxu0 }
 0x391   : > { %v2943_v34 = vadd.f32 %v2934_v6, %v2839_v29  ;;  %v2842_v59 = vadd.f32 %v2836_v58, %v2744_v50 }
 0x392   : > { %v2936_v41 = vpop.f32.mrf.mxu1  ;;  %v3008_v43 = vpop.f32.mrf.mxu0 }
 0x393   : > { %v2944_v46 = vadd.f32 %v2936_v41, %v2840_v20  ;;  %v3017_v19 = vadd.f32 %v3008_v43, %v2943_v34 }
 0x394   : > { %v2938_v38 = vpop.f32.mrf.mxu1  ;;  %v3010_v3 = vpop.f32.mrf.mxu0 }
 0x395   : > { %v2945_v24 = vadd.f32 %v2938_v38, %v2841_v27  ;;  %v3018_v22 = vadd.f32 %v3010_v3, %v2944_v46 }
 0x396   : > { %v2940_v16 = vpop.f32.mrf.mxu1  ;;  %v3012_v14 = vpop.f32.mrf.mxu0 }
 0x397   : > { %v2946_v33 = vadd.f32 %v2940_v16, %v2842_v59  ;;  %v3019_v37 = vadd.f32 %v3012_v14, %v2945_v24 }
 0x398   : > { %v3106_v23 = vpop.f32.mrf.mxu1  ;;  %v3014_v39 = vpop.f32.mrf.mxu0 }
 0x399   : > { %v3115_v30 = vadd.f32 %v3106_v23, %v3017_v19  ;;  %v3020_v47 = vadd.f32 %v3014_v39, %v2946_v33 }
 0x39a   : > { %v3108_v18 = vpop.f32.mrf.mxu1 }
 0x39b   : > { %v3116_v51 = vadd.f32 %v3108_v18, %v3018_v22 }
 0x39c   : > { %v3110_v21 = vpop.f32.mrf.mxu1  ;;  %v3204_v28 = vpop.f32.mrf.mxu0 }
 0x39d   : > { %v3213_v26 = vadd.f32 %v3204_v28, %v3115_v30  ;;  %v3117_v25 = vadd.f32 %v3110_v21, %v3019_v37  ;;  %v3698_v28 = vpop.permute.xlu0 %3697 }
 0x39e   : > { %v3112_v31 = vpop.f32.mrf.mxu1  ;;  %v3206_v55 = vpop.f32.mrf.mxu0 }
 0x39f   : > { %v3214_v41 = vadd.f32 %v3206_v55, %v3116_v51  ;;  %v3118_v43 = vadd.f32 %v3112_v31, %v3020_v47  ;;  %v3700_v47 = vsel %vm3699_vm15, %v6766_v10, %v3698_v28 }
 0x3a0   : > { %v3208_v49 = vpop.f32.mrf.mxu0  ;;  %v3262_v53 = vpop.f32.mrf.mxu1 }
 0x3a1   : > { %v3271_v61 = vadd.f32 %v3262_v53, %v3213_v26  ;;  %v3215_v38 = vadd.f32 %v3208_v49, %v3117_v25  ;;  %v3964_v25 = vpop.permute.xlu1 %3963 }
 0x3a2   : > { %v3210_v32 = vpop.f32.mrf.mxu0  ;;  %v3264_v42 = vpop.f32.mrf.mxu1 }
 0x3a3   : > { %v3272_v52 = vadd.f32 %v3264_v42, %v3214_v41  ;;  %v3216_v8 = vadd.f32 %v3210_v32, %v3118_v43 }
 0x3a4   : > { %v3266_v57 = vpop.f32.mrf.mxu1  ;;  %v3360_v62 = vpop.f32.mrf.mxu0 }
 0x3a5   : > { %v3369_v60 = vadd.f32 %v3360_v62, %v3271_v61  ;;  %v3273_v56 = vadd.f32 %v3266_v57, %v3215_v38  ;;  %v3865_v62 = vpop.permute.xlu0 %3864 }
 0x3a6   : > { %v3268_v35 = vpop.f32.mrf.mxu1  ;;  %v3362_v9 = vpop.f32.mrf.mxu0  ;;  %v3867_v51 = vsel %vm3866_vm14, %v6770_v7, %v3865_v62 }
 0x3a7   : > { %v3370_v14 = vadd.f32 %v3362_v9, %v3272_v52  ;;  %v3274_v15 = vadd.f32 %v3268_v35, %v3216_v8 }
 0x3a8   : > { %v3364_v6 = vpop.f32.mrf.mxu0  ;;  %v3464_v54 = vpop.f32.mrf.mxu1 }
 0x3a9   : > { %v3473_v23 = vadd.f32 %v3464_v54, %v3369_v60  ;;  %v3371_v39 = vadd.f32 %v3364_v6, %v3273_v56  ;;  %v3966_v41 = vpop.permute.xlu0 %3965 }
 0x3aa   : > { %v3366_v36 = vpop.f32.mrf.mxu0  ;;  %v3466_v58 = vpop.f32.mrf.mxu1  ;;  %v3968_v38 = vsel %vm3967_vm0, %v3964_v25, %v3966_v41 }
 0x3ab   : > { %v3474_v18 = vadd.f32 %v3466_v58, %v3370_v14  ;;  %v3372_v44 = vadd.f32 %v3366_v36, %v3274_v15 }
 0x3ac   : > { %v3468_v3 = vpop.f32.mrf.mxu1  ;;  %v3538_v16 = vpop.f32.mrf.mxu0 }
 0x3ad   : > { %v3547_v2 = vadd.f32 %v3538_v16, %v3473_v23  ;;  %v3475_v29 = vadd.f32 %v3468_v3, %v3371_v39  ;;  %v4129_v16 = vpop.permute.xlu1 %4128 }
 0x3ae   : > { %v3470_v13 = vpop.f32.mrf.mxu1  ;;  %v3540_v48 = vpop.f32.mrf.mxu0 }
 0x3af   : > { %v3548_v40 = vadd.f32 %v3540_v48, %v3474_v18  ;;  %v3476_v50 = vadd.f32 %v3470_v13, %v3372_v44 }
 0x3b0   : > { %v3542_v17 = vpop.f32.mrf.mxu0  ;;  %v3636_v21 = vpop.f32.mrf.mxu1 }
 0x3b1   : > { %v3645_v31 = vadd.f32 %v3636_v21, %v3547_v2  ;;  %v3549_v34 = vadd.f32 %v3542_v17, %v3475_v29  ;;  %v3972_v17 = vmul.f32 0.0, %v3964_v25 }
 0x3b2   : > { %v3544_v55 = vpop.f32.mrf.mxu0  ;;  %v3638_v20 = vpop.f32.mrf.mxu1 }
 0x3b3   : > { %v3661_v49 = vadd.f32 %v6764_v11, %v3645_v31  ;;  %v3646_v53 = vadd.f32 %v3638_v20, %v3548_v40  ;;  %v3550_v46 = vadd.f32 %v3544_v55, %v3476_v50  ;;  %v3978_v31 = vpack.c.bf16 %v3972_v17, %v3972_v17 }
 0x3b4   : > { %v3640_v27 = vpop.f32.mrf.mxu1 }
 0x3b5   : > { %v3662_v32 = vadd.f32 %v6764_v11, %v3646_v53  ;;  %v3647_v42 = vadd.f32 %v3640_v27, %v3549_v34  ;;  %v3665_v19 = vmul.f32 0.2, %v3661_v49 }
 0x3b6   : > { %v3642_v59 = vpop.f32.mrf.mxu1 }
 0x3b7   : > { %v3663_v24 = vadd.f32 %v3659_v12, %v3647_v42  ;;  %v3648_v57 = vadd.f32 %v3642_v59, %v3550_v46  ;;  %v3666_v22 = vmul.f32 0.2, %v3662_v32  ;;  %v6778_v35 = vmax.f32 %v3661_v49, %v3665_v19  ;;  %v4230_v49 = vpop.permute.xlu1 %4229 }
 0x3b9   : > { %v3667_v33 = vmul.f32 0.2, %v3663_v24  ;;  %v3664_v30 = vadd.f32 %v3659_v12, %v3648_v57  ;;  %v6784_v11 = vmax.f32 %v3662_v32, %v3666_v22  ;;  %v3872_v61 = vmul.f32 %v3867_v51, %v6778_v35  ;;  %v4131_v12 = vpop.permute.xlu0 %4130 }
 0x3ba   : > { %v3705_v10 = vmul.f32 %v3700_v47, %v6778_v35  ;;  %v3973_v56 = vmul.f32 %v3968_v38, %v6778_v35  ;;  %v4137_v13 = vmul.f32 %v4129_v16, %v6778_v35  ;;  %v4139_v29 = vmul.f32 0.0, %v4131_v12 }
 0x3bb   : > { %v6780_v9 = vmax.f32 %v3663_v24, %v3667_v33  ;;  %v3668_v37 = vmul.f32 0.2, %v3664_v30  ;;  %v3706_v60 = vmul.f32 %v3698_v28, %v6784_v11  ;;  %v3873_v39 = vmul.f32 %v3865_v62, %v6784_v11 }
 0x3bc   : > { %v3974_v44 = vmul.f32 %v3966_v41, %v6784_v11  ;;  %v4133_v20 = vsel %vm3998_vm1, %v4129_v16, %v4131_v12  ;;  %v4145_v50 = vpack.c.bf16 %v4139_v29, %v4139_v29  ;;  %v4238_v46 = vmul.f32 %v4230_v49, %v6778_v35 }
 0x3bd   : > { %v6786_v26 = vmax.f32 %v3664_v30, %v3668_v37  ;;  %v6790_v6 = vpack.c.bf16 %v6780_v9, %v6778_v35  ;;  %v3875_v54 = vmul.f32 %v3867_v51, %v6780_v9  ;;  %v3708_v36 = vmul.f32 %v3700_v47, %v6780_v9  ;;  %v4232_v2 = vpop.permute.xlu0 %4231 }
 0x3be   : > { %v3976_v3 = vmul.f32 %v3968_v38, %v6780_v9  ;;  %v4140_v14 = vmul.f32 %v4129_v16, %v6780_v9  ;;  %v4240_v21 = vmul.f32 0.0, %v4232_v2  ;;  %v4138_v53 = vmul.f32 %v4133_v20, %v6784_v11  ;;  %v5610_v16 = vld [vmem:[%s7125_s1 + $0x4] ss:$8 sm:$0x3] }
 0x3bf   : > { %3731 = vrot.lane.b32.xlu1 %v6790_v6, %s5744_s18  ;;  %v6799_v7 = vpack.c.bf16 %v6786_v26, %v6784_v11  ;;  %v3878_v58 = vpack.c.bf16 %v3875_v54, %v3872_v61  ;;  %v3709_v43 = vmul.f32 %v3698_v28, %v6786_v26  ;;  %v3711_v52 = vpack.c.bf16 %v3708_v36, %v3705_v10  ;;  %v5596_v10 = vld [vmem:[%s7125_s1 + $0x2] ss:$8 sm:$0x3] }
 0x3c0   : > { %v3979_v23 = vpack.c.bf16 %v3976_v3, %v3973_v56  ;;  %v3876_v48 = vmul.f32 %v3865_v62, %v6786_v26  ;;  %v4143_v15 = vpack.c.bf16 %v4140_v14, %v4137_v13  ;;  %v3977_v18 = vmul.f32 %v3966_v41, %v6786_v26  ;;  %v4406_v62 = vpop.permute.xlu1 %4405  ;;  %v4495_v41 = vld [vmem:[%s7131_s7] sm:$0xff] }
 0x3c1   : > { %3733 = vrot.lane.b32.xlu0 %v6799_v7, %s5744_s18  ;;  %v3712_v8 = vpack.c.bf16 %v3709_v43, %v3706_v60  ;;  %v4246_v55 = vpack.c.bf16 %v4240_v21, %v4240_v21  ;;  %v4141_v34 = vmul.f32 %v4133_v20, %v6786_v26  ;;  %v4241_v27 = vmul.f32 %v4230_v49, %v6780_v9  ;;  %v4408_v57 = vpop.permute.xlu0 %4407  ;;  %v5619_v56 = vld [vmem:[%s7125_s1 + $0x5] ss:$8 sm:$0x3] }
 0x3c2   : > { %v3879_v28 = vpack.c.bf16 %v3876_v48, %v3873_v39  ;;  %v3980_v40 = vpack.c.bf16 %v3977_v18, %v3974_v44  ;;  %v4234_v42 = vsel %vm3897_vm2, %v4230_v49, %v4232_v2  ;;  %v4416_v22 = vmul.f32 0.0, %v4408_v57  ;;  %v5698_v20 = vld [vmem:[%s7130_s6] sm:$0xff]  }
 0x3c3   : > { %3893 = vrot.lane.b32.xlu1 %v3878_v58, %s5742_s27  ;;  %v4144_v32 = vpack.c.bf16 %v4141_v34, %v4138_v53  ;;  %v4244_v59 = vpack.c.bf16 %v4241_v27, %v4238_v46  ;;  %v4242_v19 = vmul.f32 %v4234_v42, %v6786_v26  ;;  %v4239_v24 = vmul.f32 %v4234_v42, %v6784_v11  ;;  %v5699_v46 = vld [vmem:[%s7130_s6 + $0x10] sm:$0xff]  }
 0x3c4   : > { %v4410_v30 = vsel %vm3800_vm3, %v4406_v62, %v4408_v57  ;;  %v4422_v51 = vpack.c.bf16 %v4416_v22, %v4416_v22  ;;  %v4417_v47 = vmul.f32 %v4406_v62, %v6780_v9  ;;  %v5591_v9 = vld [vmem:[%s7125_s1 + $0x1] ss:$8 sm:$0x3]  ;;  %v4789_v38 = vrot.slane %v5596_v10, %v5820_v4 }
 0x3c5   : > { %3796 = vrot.lane.b32.xlu0 %v3711_v52, %s5743_s15  ;;  %v4245_v33 = vpack.c.bf16 %v4242_v19, %v4239_v24  ;;  %v4418_v37 = vmul.f32 %v4410_v30, %v6786_v26  ;;  %v4415_v54 = vmul.f32 %v4410_v30, %v6784_v11  ;;  %v4414_v26 = vmul.f32 %v4406_v62, %v6778_v35  ;;  %v4531_v11 = vld [vmem:[%s7125_s1] ss:$8 sm:$0x3]  ;;  %v5605_v52 = vld [vmem:[%s7125_s1 + $0x3] ss:$8 sm:$0x3]  ;;  %v3795_v18 = vpop.permute.xlu0 %3794 }
 0x3c6   : > { %v4536_v36 = vrot.slane %v4531_v11, %v5820_v4  ;;  %v4496_v35 = vld [vmem:[%s7131_s7 + $0x8] sm:$0xff]  ;;  %v4695_v58 = vrot.slane %v5591_v9, %v5820_v4  ;;  %v4540_v43 = vrot.slane %v4531_v11, %v5823_v5  ;;  %v4699_v60 = vrot.slane %v5591_v9, %v5823_v5  ;;  %v5700_v19 = vld [vmem:[%s7130_s6 + $0x18] sm:$0xff]  }
 0x3c7   : > { %3798 = vrot.lane.b32.xlu1 %v3712_v8, %s5743_s15  ;;  %v4421_v25 = vpack.c.bf16 %v4418_v37, %v4415_v54  ;;  %v4420_v61 = vpack.c.bf16 %v4417_v47, %v4414_v26  ;;  %v4943_v3 = vrot.slane %v5605_v52, %v5820_v4  ;;  %v4793_v12 = vrot.slane %v5596_v10, %v5823_v5 }
 0x3c8   : > { %v5037_v8 = vrot.slane %v5610_v16, %v5820_v4  ;;  %v4947_v14 = vrot.slane %v5605_v52, %v5823_v5  ;;  %v5041_v13 = vrot.slane %v5610_v16, %v5823_v5  ;;  %v5205_v48 = vrot.slane %v5619_v56, %v5823_v5  ;;  %v5697_v5 = vld [vmem:[%s7130_s6 + $0x8] sm:$0xff]  }
 0x3c9   : > { %3994 = vrot.lane.b32.xlu0 %v3979_v23, %s5741_s30  ;;  %v5201_v23 = vrot.slane %v5619_v56, %v5820_v4 }
 0x3cb   : > { %4157 = vrot.lane.b32.xlu1 %v4143_v15, %s5740_s21  ;;  %v3730_v15 = vpop.permute.xlu1 %3729 }
 0x3cd   : > { %3895 = vrot.lane.b32.xlu0 %v3879_v28, %s5742_s27 }
 0x3cf   : > { %3996 = vrot.lane.b32.xlu1 %v3980_v40, %s5741_s30  ;;  %v3892_v39 = vpop.permute.xlu1 %3891 }
 0x3d1   : > { %3992 = vrot.lane.b32.xlu0 %v3978_v31, %s5741_s30 }
 0x3d3   : > { %4262 = vrot.lane.b32.xlu1 %v4246_v55, %s5739_s25 }
 0x3d5   : > { %4161 = vrot.lane.b32.xlu0 %v4145_v50, %s5740_s21 }
 0x3d7   : > { %4159 = vrot.lane.b32.xlu1 %v4144_v32, %s5740_s21 }
 0x3d9   : > { %4258 = vrot.lane.b32.xlu0 %v4244_v59, %s5739_s25 }
 0x3db   : > { %4335 = vrot.lane.b32.xlu1 %v6799_v7, %s5745_s26 }
 0x3dd   : > { %4260 = vrot.lane.b32.xlu0 %v4245_v33, %s5739_s25 }
 0x3df   : > { %4333 = vrot.lane.b32.xlu1 %v6790_v6, %s5745_s26 }
 0x3e1   : > { %4337 = vrot.lane.b32.xlu0 %v5734_v45, %s5745_s26 }
 0x3e3   : > { %4438 = vrot.lane.b32.xlu1 %v4422_v51, %s5738_s22 }
 0x3e5   : > { %4436 = vrot.lane.b32.xlu0 %v4421_v25, %s5738_s22 }
 0x3e7   : > { %4499 = vperm.xlu1 %5660, %v4495_v41   ;;  %v5703_v41 = vld [vmem:[%s7130_s6 + $0x30] sm:$0xff]  }
 0x3e9   : > { %4434 = vrot.lane.b32.xlu0 %v4420_v61, %s5738_s22 }
 0x3eb   : > { %4541 = vrot.lane.b32.xlu1 %v4536_v36, %s5738_s22  ;;  %v5704_v36 = vld [vmem:[%s7130_s6 + $0x38] sm:$0xff]  }
 0x3ed   : > { %4504 = vperm.xlu0 %5659, %v4496_v35  }
 0x3ef   : > { %4700 = vrot.lane.b32.xlu1 %v4695_v58, %s5739_s25 }
 0x3f1   : > { %4543 = vrot.lane.b32.xlu0 %v4540_v43, %s5738_s22 }
 0x3f3   : > { %4794 = vrot.lane.b32.xlu1 %v4789_v38, %s5740_s21  ;;  %v5705_v38 = vld [vmem:[%s7130_s6 + $0x40] sm:$0xff]  }
 0x3f5   : > { %4702 = vrot.lane.b32.xlu0 %v4699_v60, %s5739_s25 }
 0x3f7   : > { %4948 = vrot.lane.b32.xlu1 %v4943_v3, %s5741_s30 }
 0x3f9   : > { %4796 = vrot.lane.b32.xlu0 %v4793_v12, %s5740_s21 }
 0x3fb   : > { %5042 = vrot.lane.b32.xlu1 %v5037_v8, %s5742_s27 }
 0x3fd   : > { %4950 = vrot.lane.b32.xlu0 %v4947_v14, %s5741_s30 }
 0x3ff   : > { %5206 = vrot.lane.b32.xlu1 %v5201_v23, %s5743_s15 }
 0x401   : > { %5044 = vrot.lane.b32.xlu0 %v5041_v13, %s5742_s27 }
 0x403   : > { %4574 = vrot.lane.b32.xlu1 %v5734_v45, %s5744_s18 }
 0x405   : > { %5208 = vrot.lane.b32.xlu0 %v5205_v48, %s5743_s15 }
 0x431   : > { %v3732_v2 = vpop.permute.xlu1 %3731 }
 0x432   : > { %v3736_v21 = vsel %vm439_vm8, %v3730_v15, %v3732_v2 }
 0x433   : > { %v3734_v4 = vpop.permute.xlu0 %3733 }
 0x434   : > { %v3737_v17 = vsel %vm439_vm8, %v3732_v2, %v3734_v4 }
 0x435   : > { %v3894_v28 = vpop.permute.xlu1 %3893  ;;  %3757 = vmatprep.subr.bf16.mxu0 %v3737_v17 }
 0x436   : > { %3758 = vmatpush1.bf16.msra.mxu0 %v3736_v21  ;;  %v3898_v53 = vsel %vm3897_vm2, %v3892_v39, %v3894_v28 }
 0x437   : > { %v3797_v44 = vpop.permute.xlu0 %3796 }
 0x438   : > { %v3801_v31 = vsel %vm3800_vm3, %v3795_v18, %v3797_v44 }
 0x439   : > { %v3799_v29 = vpop.permute.xlu1 %3798  ;;  %5549 = vmatmul.mubr.msk.bf16.vlgmr.msra.gmra.mxu0 %vm439_vm8, %v5697_v5 }
 0x43a   : > { %v3802_v40 = vsel %vm3800_vm3, %v3797_v44, %v3799_v29  ;;  %3937 = vmatprep.mubr.bf16.mxu0 %v5736_v63 }
 0x43b   : > { %3822 = vmatprep.subr.bf16.mxu1 %v3802_v40  ;;  %v3995_v55 = vpop.permute.xlu0 %3994 }
 0x43c   : > { %3823 = vmatpush1.bf16.msra.mxu1 %v3801_v31 }
 0x43d   : > { %v4158_v50 = vpop.permute.xlu1 %4157 }
 0x43f   : > { %5551 = vmatmul.mubr.msk.bf16.vlgmr.msra.gmra.mxu1 %vm439_vm8, %v5698_v20  ;;  %v3896_v34 = vpop.permute.xlu0 %3895 }
 0x440   : > { %v3899_v49 = vsel %vm3897_vm2, %v3894_v28, %v3896_v34  ;;  %4038 = vmatprep.mubr.bf16.mxu1 %v5736_v63 }
 0x441   : > { %v3997_v27 = vpop.permute.xlu1 %3996  ;;  %3919 = vmatprep.subr.bf16.mxu0 %v3899_v49 }
 0x442   : > { %3920 = vmatpush1.bf16.msra.mxu0 %v3898_v53  ;;  %v4000_v32 = vsel %vm3998_vm1, %v3995_v55, %v3997_v27 }
 0x443   : > { %4020 = vmatprep.subr.bf16.mxu1 %v4000_v32  ;;  %4078 = vmatprep.subr.bf16.mxu0 %v6799_v7  ;;  %v3993_v42 = vpop.permute.xlu0 %3992  ;;  %v5701_v7 = vld [vmem:[%s7130_s6 + $0x20] sm:$0xff]  }
 0x444   : > { %v3999_v59 = vsel %vm3998_vm1, %v3993_v42, %v3995_v55 }
 0x445   : > { %v4263_v24 = vpop.permute.xlu1 %4262  ;;  %5556 = vmatmul.mubr.msk.bf16.vlgmr.msra.gmra.mxu0 %vm439_vm8, %v5699_v46  ;;  %4021 = vmatpush1.bf16.msra.mxu1 %v3999_v59 }
 0x446   : > { %4079 = vmatpush1.bf16.msra.mxu0 %v6790_v6  ;;  %4096 = vmatprep.mubr.bf16.mxu0 %v5736_v63  ;;  %v5702_v6 = vld [vmem:[%s7130_s6 + $0x28] sm:$0xff]  }
 0x447   : > { %v4162_v57 = vpop.permute.xlu0 %4161 }
 0x448   : > { %5561 = vmatmul.mubr.msk.bf16.vlgmr.msra.gmra.mxu1 %vm439_vm8, %v5700_v19 }
 0x449   : > { %v4160_v62 = vpop.permute.xlu1 %4159  ;;  %4203 = vmatprep.mubr.bf16.mxu1 %v5736_v63 }
 0x44a   : > { %v4164_v22 = vsel %vm3967_vm0, %v4158_v50, %v4160_v62  ;;  %v4165_v33 = vsel %vm3967_vm0, %v4160_v62, %v4162_v57 }
 0x44b   : > { %4185 = vmatprep.subr.bf16.mxu1 %v4165_v33  ;;  %v4259_v30 = vpop.permute.xlu0 %4258 }
 0x44c   : > { %4186 = vmatpush1.bf16.msra.mxu1 %v4164_v22 }
 0x44d   : > { %v4336_v37 = vpop.permute.xlu1 %4335  ;;  %5565 = vmatmul.mubr.msk.bf16.vlgmr.msra.gmra.mxu0 %vm439_vm8, %v5701_v7 }
 0x44e   : > { %4304 = vmatprep.mubr.bf16.mxu0 %v5736_v63 }
 0x44f   : > { %v4261_v51 = vpop.permute.xlu0 %4260 }
 0x450   : > { %v4265_v54 = vsel %vm3866_vm14, %v4259_v30, %v4261_v51  ;;  %5570 = vmatmul.mubr.msk.bf16.vlgmr.msra.gmra.mxu1 %vm439_vm8, %v5702_v6  ;;  %v4266_v47 = vsel %vm3866_vm14, %v4261_v51, %v4263_v24 }
 0x451   : > { %v4334_v25 = vpop.permute.xlu1 %4333  ;;  %4286 = vmatprep.subr.bf16.mxu0 %v4266_v47  ;;  %4379 = vmatprep.mubr.bf16.mxu1 %v5736_v63 }
 0x452   : > { %4287 = vmatpush1.bf16.msra.mxu0 %v4265_v54  ;;  %v4340_v11 = vsel %vm4339_vm4, %v4334_v25, %v4336_v37 }
 0x453   : > { %v4338_v26 = vpop.permute.xlu0 %4337 }
 0x454   : > { %v4341_v61 = vsel %vm4339_vm4, %v4336_v37, %v4338_v26 }
 0x455   : > { %5575 = vmatmul.mubr.msk.bf16.vlgmr.msra.gmra.mxu0 %vm439_vm8, %v5703_v41  ;;  %4361 = vmatprep.subr.bf16.mxu1 %v4341_v61  ;;  %v4439_v9 = vpop.permute.xlu1 %4438 }
 0x456   : > { %4362 = vmatpush1.bf16.msra.mxu1 %v4340_v11  ;;  %4480 = vmatprep.mubr.bf16.mxu0 %v5736_v63 }
 0x457   : > { %v4437_v35 = vpop.permute.xlu0 %4436 }
 0x458   : > { %v4442_v58 = vsel %vm3699_vm15, %v4437_v35, %v4439_v9 }
 0x459   : > { %5579 = vmatmul.mubr.msk.bf16.vlgmr.msra.gmra.mxu1 %vm439_vm8, %v5704_v36  ;;  %4462 = vmatprep.subr.bf16.mxu0 %v4442_v58 }
 0x45a   : > { %4619 = vmatprep.mubr.bf16.mxu1 %v5736_v63 }
 0x45b   : > { %v4435_v10 = vpop.permute.xlu0 %4434 }
 0x45c   : > { %v4441_v43 = vsel %vm3699_vm15, %v4435_v10, %v4437_v35 }
 0x45d   : > { %4463 = vmatpush1.bf16.msra.mxu0 %v4441_v43 }
 0x460   : > { %5584 = vmatmul.mubr.msk.bf16.vlgmr.msra.gmra.mxu0 %vm439_vm8, %v5705_v38 }
 0x461   : > { %4681 = vmatprep.mubr.bf16.mxu0 %v5736_v63 }
 0x462   : > { %v6965_v52 = vpop.permute.xlu1 %4499 }
 0x466   : > { %v6967_v60 = vpop.permute.xlu1 %4541 }
 0x467   : > { %v4549_v3 = vmul.f32 0.0, %v6967_v60 }
 0x468   : > { %v4505_v11 = vpop.permute.xlu0 %4504 }
 0x469   : > { %v4555_v16 = vpack.c.bf16 %v4549_v3, %v4549_v3 }
 0x46a   : > { %v6970_v12 = vpop.permute.xlu1 %4700 }
 0x46b   : > { %v4708_v8 = vmul.f32 0.0, %v6970_v12  ;;  %4636 = vrot.lane.b32.xlu0 %v4555_v16, %s5743_s15 }
 0x46d   : > { %v4714_v56 = vpack.c.bf16 %v4708_v8, %v4708_v8  ;;  %v4544_v8 = vpop.permute.xlu0 %4543 }
 0x46f   : > { %4728 = vrot.lane.b32.xlu1 %v4714_v56, %s5742_s27 }
 0x4f9   : > { %v3777_v14 = vpop.f32.mrf.mxu0 }
 0x4fb   : > { %v3779_v23 = vpop.f32.mrf.mxu0 }
 0x4fd   : > { %v3781_v13 = vpop.f32.mrf.mxu0 }
 0x4ff   : > { %v3842_v48 = vpop.f32.mrf.mxu1  ;;  %v3783_v39 = vpop.f32.mrf.mxu0 }
 0x500   : > { %v3843_v55 = vadd.f32 %v3842_v48, %v3777_v14 }
 0x501   : > { %v3844_v15 = vpop.f32.mrf.mxu1 }
 0x502   : > { %v3845_v34 = vadd.f32 %v3844_v15, %v3779_v23 }
 0x503   : > { %v3846_v18 = vpop.f32.mrf.mxu1 }
 0x504   : > { %v3847_v46 = vadd.f32 %v3846_v18, %v3781_v13 }
 0x505   : > { %v3848_v2 = vpop.f32.mrf.mxu1  ;;  %v3939_v4 = vpop.f32.mrf.mxu0 }
 0x506   : > { %v3948_v49 = vadd.f32 %v3939_v4, %v3843_v55  ;;  %v3849_v19 = vadd.f32 %v3848_v2, %v3783_v39  ;;  %v4703_v55 = vpop.permute.xlu0 %4702 }
 0x507   : > { %v3941_v17 = vpop.f32.mrf.mxu0 }
 0x508   : > { %v4040_v21 = vpop.f32.mrf.mxu1  ;;  %v3949_v32 = vadd.f32 %v3941_v17, %v3845_v34 }
 0x509   : > { %v3943_v28 = vpop.f32.mrf.mxu0  ;;  %v4049_v24 = vadd.f32 %v4040_v21, %v3948_v49 }
 0x50a   : > { %v4042_v5 = vpop.f32.mrf.mxu1  ;;  %v3950_v57 = vadd.f32 %v3943_v28, %v3847_v46  ;;  %v4704_v46 = vsel %vm3866_vm14, %v6970_v12, %v4703_v55 }
 0x50b   : > { %v3945_v44 = vpop.f32.mrf.mxu0  ;;  %v4050_v22 = vadd.f32 %v4042_v5, %v3949_v32 }
 0x50c   : > { %v4044_v29 = vpop.f32.mrf.mxu1  ;;  %v3951_v33 = vadd.f32 %v3945_v44, %v3849_v19  ;;  %v4545_v19 = vsel %vm3699_vm15, %v6967_v60, %v4544_v8 }
 0x50d   : > { %v4098_v40 = vpop.f32.mrf.mxu0  ;;  %v4051_v37 = vadd.f32 %v4044_v29, %v3950_v57  ;;  %v4797_v57 = vpop.permute.xlu0 %4796 }
 0x50e   : > { %v4046_v31 = vpop.f32.mrf.mxu1  ;;  %v4107_v30 = vadd.f32 %v4098_v40, %v4049_v24  ;;  %v4795_v24 = vpop.permute.xlu1 %4794 }
 0x50f   : > { %v4100_v20 = vpop.f32.mrf.mxu0  ;;  %v4052_v25 = vadd.f32 %v4046_v31, %v3951_v33 }
 0x510   : > { %v4205_v50 = vpop.f32.mrf.mxu1  ;;  %v4108_v51 = vadd.f32 %v4100_v20, %v4050_v22 }
 0x511   : > { %v4102_v53 = vpop.f32.mrf.mxu0  ;;  %v4214_v41 = vadd.f32 %v4205_v50, %v4107_v30  ;;  %v4798_v30 = vsel %vm3967_vm0, %v4795_v24, %v4797_v57 }
 0x512   : > { %v4207_v27 = vpop.f32.mrf.mxu1  ;;  %v4109_v26 = vadd.f32 %v4102_v53, %v4051_v37 }
 0x513   : > { %v4104_v42 = vpop.f32.mrf.mxu0  ;;  %v4215_v9 = vadd.f32 %v4207_v27, %v4108_v51 }
 0x514   : > { %v4209_v59 = vpop.f32.mrf.mxu1  ;;  %v4110_v36 = vadd.f32 %v4104_v42, %v4052_v25 }
 0x515   : > { %v4306_v62 = vpop.f32.mrf.mxu0  ;;  %v4216_v43 = vadd.f32 %v4209_v59, %v4109_v26 }
 0x516   : > { %v4211_v7 = vpop.f32.mrf.mxu1  ;;  %v4315_v35 = vadd.f32 %v4306_v62, %v4214_v41 }
 0x517   : > { %v4308_v6 = vpop.f32.mrf.mxu0  ;;  %v4217_v56 = vadd.f32 %v4211_v7, %v4110_v36 }
 0x518   : > { %v4316_v38 = vadd.f32 %v4308_v6, %v4215_v9 }
 0x519   : > { %v4381_v54 = vpop.f32.mrf.mxu1  ;;  %v4310_v47 = vpop.f32.mrf.mxu0 }
 0x51a   : > { %v4390_v3 = vadd.f32 %v4381_v54, %v4315_v35  ;;  %v4317_v14 = vadd.f32 %v4310_v47, %v4216_v43  ;;  %v4949_v54 = vpop.permute.xlu1 %4948  ;;  %v4951_v47 = vpop.permute.xlu0 %4950  ;;  %v4802_v43 = vmul.f32 0.0, %v4795_v24 }
 0x51b   : > { %v4383_v61 = vpop.f32.mrf.mxu1  ;;  %v4312_v58 = vpop.f32.mrf.mxu0 }
 0x51c   : > { %v4391_v23 = vadd.f32 %v4383_v61, %v4316_v38  ;;  %v4318_v39 = vadd.f32 %v4312_v58, %v4217_v56 }
 0x51d   : > { %v4385_v10 = vpop.f32.mrf.mxu1 }
 0x51e   : > { %v4392_v18 = vadd.f32 %v4385_v10, %v4317_v14  ;;  %v5045_v10 = vpop.permute.xlu0 %5044  ;;  %v4808_v14 = vpack.c.bf16 %v4802_v43, %v4802_v43 }
 0x51f   : > { %v4387_v48 = vpop.f32.mrf.mxu1  ;;  %v5052_v38 = vmul.f32 0.0, %v5045_v10 }
 0x520   : > { %v4482_v16 = vpop.f32.mrf.mxu0  ;;  %v4393_v21 = vadd.f32 %v4387_v48, %v4318_v39  ;;  %v5043_v39 = vpop.permute.xlu1 %5042 }
 0x521   : > { %v4491_v13 = vadd.f32 %v4482_v16, %v4390_v3 }
 0x522   : > { %v4484_v15 = vpop.f32.mrf.mxu0 }
 0x523   : > { %v4507_v2 = vadd.f32 %v6965_v52, %v4491_v13  ;;  %v4492_v4 = vadd.f32 %v4484_v15, %v4391_v23  ;;  %v5058_v23 = vpack.c.bf16 %v5052_v38, %v5052_v38  ;;  %v4952_v13 = vsel %vm3998_vm1, %v4949_v54, %v4951_v47 }
 0x524   : > { %v4486_v17 = vpop.f32.mrf.mxu0 }
 0x525   : > { %v4508_v28 = vadd.f32 %v6965_v52, %v4492_v4  ;;  %v4493_v5 = vadd.f32 %v4486_v17, %v4392_v18  ;;  %v4511_v29 = vmul.f32 0.2, %v4507_v2 }
 0x526   : > { %v4488_v44 = vpop.f32.mrf.mxu0 }
 0x527   : > { %v4509_v40 = vadd.f32 %v4505_v11, %v4493_v5  ;;  %v4494_v31 = vadd.f32 %v4488_v44, %v4393_v21  ;;  %v4512_v20 = vmul.f32 0.2, %v4508_v28  ;;  %v6977_v49 = vmax.f32 %v4507_v2, %v4511_v29  ;;  %v5209_v29 = vpop.permute.xlu0 %5208 }
 0x528   : > { %v5046_v21 = vsel %vm3897_vm2, %v5043_v39, %v5045_v10 }
 0x529   : > { %v4513_v50 = vmul.f32 0.2, %v4509_v40  ;;  %v4510_v34 = vadd.f32 %v4505_v11, %v4494_v31  ;;  %v6983_v32 = vmax.f32 %v4508_v28, %v4512_v20  ;;  %v4709_v62 = vmul.f32 %v4704_v46, %v6977_v49 }
 0x52a   : > { %v4550_v33 = vmul.f32 %v4545_v19, %v6977_v49  ;;  %v4803_v41 = vmul.f32 %v4798_v30, %v6977_v49  ;;  %v4956_v11 = vmul.f32 %v4949_v54, %v6977_v49  ;;  %v5050_v4 = vmul.f32 %v5043_v39, %v6977_v49 }
 0x52b   : > { %v6979_v53 = vmax.f32 %v4509_v40, %v4513_v50  ;;  %v4514_v27 = vmul.f32 0.2, %v4510_v34  ;;  %v4551_v37 = vmul.f32 %v4544_v8, %v6983_v32  ;;  %v4710_v35 = vmul.f32 %v4703_v55, %v6983_v32  ;;  %v5207_v40 = vpop.permute.xlu1 %5206 }
 0x52c   : > { %v4804_v16 = vmul.f32 %v4797_v57, %v6983_v32  ;;  %v4957_v18 = vmul.f32 %v4952_v13, %v6983_v32  ;;  %v5051_v44 = vmul.f32 %v5046_v21, %v6983_v32  ;;  %v5216_v31 = vmul.f32 0.0, %v5209_v29 }
 0x52d   : > { %v6985_v52 = vmax.f32 %v4510_v34, %v4514_v27  ;;  %v6989_v42 = vpack.c.bf16 %v6979_v53, %v6977_v49  ;;  %v4712_v59 = vmul.f32 %v4704_v46, %v6979_v53  ;;  %v4553_v7 = vmul.f32 %v4545_v19, %v6979_v53  ;;  %v5290_v19 = vld [vmem:[%s7133_s9] sm:$0xff] }
 0x52e   : > { %v4806_v51 = vmul.f32 %v4798_v30, %v6979_v53  ;;  %v4959_v26 = vmul.f32 %v4949_v54, %v6979_v53  ;;  %v5053_v2 = vmul.f32 %v5043_v39, %v6979_v53  ;;  %v5210_v20 = vsel %vm3800_vm3, %v5207_v40, %v5209_v29  ;;  %v5707_v54 = vld [vmem:[%s7132_s8] sm:$0xff]  }
 0x52f   : > { %4576 = vrot.lane.b32.xlu1 %v6989_v42, %s5744_s18  ;;  %v6998_v12 = vpack.c.bf16 %v6985_v52, %v6983_v32  ;;  %v4715_v22 = vpack.c.bf16 %v4712_v59, %v4709_v62  ;;  %v4554_v60 = vmul.f32 %v4544_v8, %v6985_v52  ;;  %v4556_v6 = vpack.c.bf16 %v4553_v7, %v4550_v33  ;;  %v5714_v29 = vld [vmem:[%s7132_s8 + $0x40] sm:$0xff]  }
 0x530   : > { %v4809_v61 = vpack.c.bf16 %v4806_v51, %v4803_v41  ;;  %v4713_v9 = vmul.f32 %v4703_v55, %v6985_v52  ;;  %v4962_v36 = vpack.c.bf16 %v4959_v26, %v4956_v11  ;;  %v4807_v58 = vmul.f32 %v4797_v57, %v6985_v52  ;;  %v5708_v11 = vld [vmem:[%s7132_s8 + $0x10] sm:$0xff]  }
 0x531   : > { %4578 = vrot.lane.b32.xlu0 %v6998_v12, %s5744_s18  ;;  %v4557_v25 = vpack.c.bf16 %v4554_v60, %v4551_v37  ;;  %v4958_v8 = vmul.f32 0.0, %v4951_v47  ;;  %v4960_v15 = vmul.f32 %v4952_v13, %v6985_v52  ;;  %v5056_v28 = vpack.c.bf16 %v5053_v2, %v5050_v4 }
 0x532   : > { %v4716_v3 = vpack.c.bf16 %v4713_v9, %v4710_v35  ;;  %v4810_v56 = vpack.c.bf16 %v4807_v58, %v4804_v16  ;;  %v5054_v5 = vmul.f32 %v5046_v21, %v6985_v52  ;;  %v5218_v50 = vmul.f32 %v5210_v20, %v6985_v52  ;;  %v5709_v58 = vld [vmem:[%s7132_s8 + $0x18] sm:$0xff]  }
 0x533   : > { %4730 = vrot.lane.b32.xlu1 %v4715_v22, %s5742_s27  ;;  %v4964_v48 = vpack.c.bf16 %v4958_v8, %v4958_v8  ;;  %v4963_v17 = vpack.c.bf16 %v4960_v15, %v4957_v18  ;;  %v5222_v34 = vpack.c.bf16 %v5216_v31, %v5216_v31  ;;  %v5215_v27 = vmul.f32 %v5210_v20, %v6983_v32  ;;  %v4575_v32 = vpop.permute.xlu1 %4574  ;;  %v5712_v15 = vld [vmem:[%s7132_s8 + $0x30] sm:$0xff]  }
 0x534   : > { %v5057_v55 = vpack.c.bf16 %v5054_v5, %v5051_v44  ;;  %v5217_v46 = vmul.f32 %v5207_v40, %v6979_v53  ;;  %v5214_v52 = vmul.f32 %v5207_v40, %v6977_v49  ;;  %v5706_v49 = vld [vmem:[%s7132_s8 + $0x8] sm:$0xff]  }
 0x535   : > { %4638 = vrot.lane.b32.xlu0 %v4556_v6, %s5743_s15  ;;  %v5221_v59 = vpack.c.bf16 %v5218_v50, %v5215_v27 }
 0x536   : > { %v5220_v24 = vpack.c.bf16 %v5217_v46, %v5214_v52 }
 0x537   : > { %4640 = vrot.lane.b32.xlu1 %v4557_v25, %s5743_s15  ;;  %v4729_v57 = vpop.permute.xlu1 %4728 }
 0x539   : > { %4824 = vrot.lane.b32.xlu0 %v4809_v61, %s5741_s30 }
 0x53b   : > { %4976 = vrot.lane.b32.xlu1 %v4962_v36, %s5740_s21 }
 0x53d   : > { %4732 = vrot.lane.b32.xlu0 %v4716_v3, %s5742_s27 }
 0x53f   : > { %4826 = vrot.lane.b32.xlu1 %v4810_v56, %s5741_s30 }
 0x541   : > { %4822 = vrot.lane.b32.xlu0 %v4808_v14, %s5741_s30  ;;  %s5381_s30 = sshll.u32 %s7145_s14, 1 }
 0x542   : > { %s357_s15 = scalar_lea.vmem %s7134_s10, %s5381_s30 }
 0x543   : > { %5074 = vrot.lane.b32.xlu1 %v5058_v23, %s5739_s25 }
 0x545   : > { %4980 = vrot.lane.b32.xlu0 %v4964_v48, %s5740_s21 }
 0x547   : > { %4978 = vrot.lane.b32.xlu1 %v4963_v17, %s5740_s21  ;;  %v5713_v17 = vld [vmem:[%s7132_s8 + $0x38] sm:$0xff]  }
 0x549   : > { %5070 = vrot.lane.b32.xlu0 %v5056_v28, %s5739_s25 }
 0x54b   : > { %5142 = vrot.lane.b32.xlu1 %v6998_v12, %s5745_s26 }
 0x54d   : > { %5072 = vrot.lane.b32.xlu0 %v5057_v55, %s5739_s25 }
 0x54f   : > { %5140 = vrot.lane.b32.xlu1 %v6989_v42, %s5745_s26 }
 0x551   : > { %5144 = vrot.lane.b32.xlu0 %v5734_v45, %s5745_s26  ;;  %v4637_v45 = vpop.permute.xlu0 %4636 }
 0x553   : > { %5238 = vrot.lane.b32.xlu1 %v5222_v34, %s5738_s22 }
 0x555   : > { %5236 = vrot.lane.b32.xlu0 %v5221_v59, %s5738_s22 }
 0x557   : > { %5293 = vperm.xlu1 %5660, %v5290_v19  }
 0x559   : > { %5234 = vrot.lane.b32.xlu0 %v5220_v24, %s5738_s22 }
 0x5a1   : > { %v4577_v62 = vpop.permute.xlu1 %4576 }
 0x5a2   : > { %v4580_v22 = vsel %vm439_vm8, %v4575_v32, %v4577_v62 }
 0x5a3   : > { %v4579_v53 = vpop.permute.xlu0 %4578 }
 0x5a4   : > { %v4581_v7 = vsel %vm439_vm8, %v4577_v62, %v4579_v53 }
 0x5a5   : > { %v4731_v33 = vpop.permute.xlu1 %4730  ;;  %4601 = vmatprep.subr.bf16.mxu1 %v4581_v7 }
 0x5a6   : > { %4602 = vmatpush1.bf16.msra.mxu1 %v4580_v22  ;;  %v4734_v26 = vsel %vm3897_vm2, %v4729_v57, %v4731_v33 }
 0x5a7   : > { %v4639_v60 = vpop.permute.xlu0 %4638 }
 0x5a8   : > { %v4642_v37 = vsel %vm3800_vm3, %v4637_v45, %v4639_v60 }
 0x5a9   : > { %v4641_v30 = vpop.permute.xlu1 %4640  ;;  %5588 = vmatmul.mubr.msk.bf16.vlgmr.msra.gmra.mxu1 %vm439_vm8, %v5706_v49 }
 0x5aa   : > { %v4643_v6 = vsel %vm3800_vm3, %v4639_v60, %v4641_v30  ;;  %4773 = vmatprep.mubr.bf16.mxu1 %v5736_v63 }
 0x5ab   : > { %4663 = vmatprep.subr.bf16.mxu0 %v4643_v6  ;;  %v4825_v51 = vpop.permute.xlu0 %4824 }
 0x5ac   : > { %4664 = vmatpush1.bf16.msra.mxu0 %v4642_v37 }
 0x5ad   : > { %v4977_v47 = vpop.permute.xlu1 %4976 }
 0x5af   : > { %v4733_v25 = vpop.permute.xlu0 %4732  ;;  %5590 = vmatmul.mubr.msk.bf16.vlgmr.msra.gmra.mxu0 %vm439_vm8, %v5707_v54 }
 0x5b0   : > { %v4735_v41 = vsel %vm3897_vm2, %v4731_v33, %v4733_v25  ;;  %4867 = vmatprep.mubr.bf16.mxu0 %v5736_v63 }
 0x5b1   : > { %v4827_v61 = vpop.permute.xlu1 %4826  ;;  %4755 = vmatprep.subr.bf16.mxu1 %v4735_v41 }
 0x5b2   : > { %4756 = vmatpush1.bf16.msra.mxu1 %v4734_v26  ;;  %v4829_v9 = vsel %vm3998_vm1, %v4825_v51, %v4827_v61 }
 0x5b3   : > { %4849 = vmatprep.subr.bf16.mxu0 %v4829_v9  ;;  %4903 = vmatprep.subr.bf16.mxu1 %v6998_v12  ;;  %v4823_v36 = vpop.permute.xlu0 %4822  ;;  %v5710_v12 = vld [vmem:[%s7132_s8 + $0x20] sm:$0xff]  }
 0x5b4   : > { %v4828_v35 = vsel %vm3998_vm1, %v4823_v36, %v4825_v51 }
 0x5b5   : > { %v5075_v10 = vpop.permute.xlu1 %5074  ;;  %5595 = vmatmul.mubr.msk.bf16.vlgmr.msra.gmra.mxu1 %vm439_vm8, %v5708_v11  ;;  %4850 = vmatpush1.bf16.msra.mxu0 %v4828_v35 }
 0x5b6   : > { %4904 = vmatpush1.bf16.msra.mxu1 %v6989_v42  ;;  %4921 = vmatprep.mubr.bf16.mxu1 %v5736_v63  ;;  %v5711_v42 = vld [vmem:[%s7132_s8 + $0x28] sm:$0xff]  }
 0x5b7   : > { %v4981_v43 = vpop.permute.xlu0 %4980 }
 0x5b8   : > { %5600 = vmatmul.mubr.msk.bf16.vlgmr.msra.gmra.mxu0 %vm439_vm8, %v5709_v58 }
 0x5b9   : > { %v4979_v38 = vpop.permute.xlu1 %4978  ;;  %5021 = vmatprep.mubr.bf16.mxu0 %v5736_v63 }
 0x5ba   : > { %v4982_v3 = vsel %vm3967_vm0, %v4977_v47, %v4979_v38  ;;  %v4983_v16 = vsel %vm3967_vm0, %v4979_v38, %v4981_v43 }
 0x5bb   : > { %5003 = vmatprep.subr.bf16.mxu0 %v4983_v16  ;;  %v5071_v8 = vpop.permute.xlu0 %5070 }
 0x5bc   : > { %5004 = vmatpush1.bf16.msra.mxu0 %v4982_v3  ;;  %v5746_v3 = vmov 1966171168  }
 0x5bd   : > { %v5143_v56 = vpop.permute.xlu1 %5142  ;;  %5604 = vmatmul.mubr.msk.bf16.vlgmr.msra.gmra.mxu1 %vm439_vm8, %v5710_v12  ;;  %v5302_v16 = vunpack.c.l.s4 %v5746_v3 }
 0x5be   : > { %5115 = vmatprep.mubr.bf16.mxu1 %v5736_v63 }
 0x5bf   : > { %v5073_v14 = vpop.permute.xlu0 %5072 }
 0x5c0   : > { %v5076_v23 = vsel %vm3866_vm14, %v5071_v8, %v5073_v14  ;;  %5609 = vmatmul.mubr.msk.bf16.vlgmr.msra.gmra.mxu0 %vm439_vm8, %v5711_v42  ;;  %v5077_v13 = vsel %vm3866_vm14, %v5073_v14, %v5075_v10 }
 0x5c1   : > { %v5141_v48 = vpop.permute.xlu1 %5140  ;;  %5097 = vmatprep.subr.bf16.mxu1 %v5077_v13  ;;  %5185 = vmatprep.mubr.bf16.mxu0 %v5736_v63 }
 0x5c2   : > { %5098 = vmatpush1.bf16.msra.mxu1 %v5076_v23  ;;  %v5146_v2 = vsel %vm4339_vm4, %v5141_v48, %v5143_v56  ;;  %v5303_v48 = vunpack.c.0.s8 %v5302_v16 }
 0x5c3   : > { %v5145_v39 = vpop.permute.xlu0 %5144 }
 0x5c4   : > { %v5147_v18 = vsel %vm4339_vm4, %v5143_v56, %v5145_v39 }
 0x5c5   : > { %5614 = vmatmul.mubr.msk.bf16.vlgmr.msra.gmra.mxu1 %vm439_vm8, %v5712_v15  ;;  %5167 = vmatprep.subr.bf16.mxu0 %v5147_v18  ;;  %v5239_v4 = vpop.permute.xlu1 %5238 }
 0x5c6   : > { %5168 = vmatpush1.bf16.msra.mxu0 %v5146_v2  ;;  %5279 = vmatprep.mubr.bf16.mxu1 %v5736_v63 }
 0x5c7   : > { %v5237_v21 = vpop.permute.xlu0 %5236 }
 0x5c8   : > { %v5241_v28 = vsel %vm3699_vm15, %v5237_v21, %v5239_v4 }
 0x5c9   : > { %5618 = vmatmul.mubr.msk.bf16.vlgmr.msra.gmra.mxu0 %vm439_vm8, %v5713_v17  ;;  %5261 = vmatprep.subr.bf16.mxu1 %v5241_v28 }
 0x5cb   : > { %v5235_v5 = vpop.permute.xlu0 %5234 }
 0x5cc   : > { %v5240_v44 = vsel %vm3699_vm15, %v5235_v5, %v5237_v21  ;;  %v5306_v21 = vsub.s32 %v5303_v48, %v5811_v1 }
 0x5cd   : > { %5262 = vmatpush1.bf16.msra.mxu1 %v5240_v44 }
 0x5d0   : > { %5623 = vmatmul.mubr.msk.bf16.vlgmr.msra.gmra.mxu1 %vm439_vm8, %v5714_v29 }
 0x5d2   : > { %v5294_v18 = vpop.permute.xlu1 %5293 }
 0x669   : > { %v4621_v40 = vpop.f32.mrf.mxu1 }
 0x66b   : > { %v4623_v31 = vpop.f32.mrf.mxu1 }
 0x66d   : > { %v4625_v55 = vpop.f32.mrf.mxu1 }
 0x66f   : > { %v4683_v63 = vpop.f32.mrf.mxu0  ;;  %v4626_v20 = vpop.f32.mrf.mxu1 }
 0x670   : > { %v4684_v53 = vadd.f32 %v4683_v63, %v4621_v40 }
 0x671   : > { %v4685_v50 = vpop.f32.mrf.mxu0 }
 0x672   : > { %v4686_v33 = vadd.f32 %v4685_v50, %v4623_v31 }
 0x673   : > { %v4687_v34 = vpop.f32.mrf.mxu0 }
 0x675   : > { %v4775_v27 = vpop.f32.mrf.mxu1  ;;  %v4688_v46 = vpop.f32.mrf.mxu0 }
 0x676   : > { %v4782_v49 = vadd.f32 %v4775_v27, %v4684_v53 }
 0x677   : > { %v4777_v59 = vpop.f32.mrf.mxu1 }
 0x678   : > { %v4869_v19 = vpop.f32.mrf.mxu0  ;;  %v4783_v6 = vadd.f32 %v4777_v59, %v4686_v33 }
 0x679   : > { %v4779_v52 = vpop.f32.mrf.mxu1  ;;  %v4876_v54 = vadd.f32 %v4869_v19, %v4782_v49 }
 0x67a   : > { %v4871_v24 = vpop.f32.mrf.mxu0 }
 0x67b   : > { %v4780_v32 = vpop.f32.mrf.mxu1  ;;  %v4877_v41 = vadd.f32 %v4871_v24, %v4783_v6 }
 0x67c   : > { %v4873_v57 = vpop.f32.mrf.mxu0 }
 0x67d   : > { %v4923_v45 = vpop.f32.mrf.mxu1 }
 0x67e   : > { %v4874_v62 = vpop.f32.mrf.mxu0  ;;  %v4930_v26 = vadd.f32 %v4923_v45, %v4876_v54 }
 0x67f   : > { %v4925_v7 = vpop.f32.mrf.mxu1 }
 0x680   : > { %v5023_v22 = vpop.f32.mrf.mxu0  ;;  %v4931_v11 = vadd.f32 %v4925_v7, %v4877_v41 }
 0x681   : > { %v4927_v60 = vpop.f32.mrf.mxu1  ;;  %v5030_v35 = vadd.f32 %v5023_v22, %v4930_v26 }
 0x682   : > { %v5025_v30 = vpop.f32.mrf.mxu0 }
 0x683   : > { %v4928_v37 = vpop.f32.mrf.mxu1  ;;  %v5031_v43 = vadd.f32 %v5025_v30, %v4931_v11 }
 0x684   : > { %v5027_v51 = vpop.f32.mrf.mxu0 }
 0x685   : > { %v5117_v47 = vpop.f32.mrf.mxu1 }
 0x686   : > { %v5028_v25 = vpop.f32.mrf.mxu0  ;;  %v5124_v38 = vadd.f32 %v5117_v47, %v5030_v35 }
 0x687   : > { %v5119_v61 = vpop.f32.mrf.mxu1 }
 0x688   : > { %v5125_v8 = vadd.f32 %v5119_v61, %v5031_v43 }
 0x689   : > { %v5187_v9 = vpop.f32.mrf.mxu0  ;;  %v5121_v36 = vpop.f32.mrf.mxu1 }
 0x68a   : > { %v5194_v42 = vadd.f32 %v5187_v9, %v5124_v38 }
 0x68b   : > { %v5189_v58 = vpop.f32.mrf.mxu0  ;;  %v5122_v10 = vpop.f32.mrf.mxu1 }
 0x68c   : > { %v5195_v23 = vadd.f32 %v5189_v58, %v5125_v8 }
 0x68d   : > { %v5191_v12 = vpop.f32.mrf.mxu0 }
 0x68f   : > { %v5192_v56 = vpop.f32.mrf.mxu0 }
 0x690   : > { %v5281_v14 = vpop.f32.mrf.mxu1 }
 0x691   : > { %v5288_v13 = vadd.f32 %v5281_v14, %v5194_v42 }
 0x692   : > { %v5283_v15 = vpop.f32.mrf.mxu1 }
 0x693   : > { %v5289_v39 = vadd.f32 %v5283_v15, %v5195_v23  ;;  %v5296_v4 = vadd.f32 %v5294_v18, %v5288_v13 }
 0x694   : > { %v5285_v2 = vpop.f32.mrf.mxu1 }
 0x695   : > { %v5297_v17 = vadd.f32 %v5294_v18, %v5289_v39 }
 0x696   : > { %v5286_v28 = vpop.f32.mrf.mxu1 }
 0x697   : > { %v5300_v5 = vcombine.low %v5296_v4, %v5297_v17 }
 0x699   : > { %v5307_v44 = vrot.slane %v5300_v5, %v5306_v21 }
 0x69b   : > { %v5314_v29 = vrot.slane %v5307_v44, %v5306_v21 }
 0x69d   : > { %5320 = vst.msk [vmem:[%s357_s15] sm:$0x3] %vm5318_vm5, %v5314_v29 }
 0x69e PF: > { %s20_s13 = sadd.s32 1, %s5721_s13  }
 0x69f   : > { %p17_p4 = scmp.ge.s32.totalorder %s20_s13, 4  }
 0x6a1   :  { %19 = sbr.rel (!%p17_p4) target bundleno = 1 (0x1), region = 157 }

</bundles_post_ra>
